<compile_context>
chip_gen: v7x
topology: tpu7x:2x2x1
jax: 0.10.0
libtpu: 0.0.40
codegen_flags: <defaults>
</compile_context>

<pallas_src>
import functools
import numpy as np
import jax
import jax.numpy as jnp
from jax.experimental import pallas as pl
from jax.experimental.pallas import tpu as pltpu

BN_EPS = 1e-5
LANES = 128


# ----------------------------- pass 1 -----------------------------
def _conv1_skip_kernel(xph_ref, w1_ref, *rest, stride, Bt, Ho, Wo, Hph, has_skip):
    """Per block of Bt images: 3x3/stride-s conv1 and (optional) 1x1/stride-s
    skip conv, both pre-BN, plus packed partial sums for the BN statistics."""
    if has_skip:
        wsk_ref, y1_ref, ysk_ref, st_ref = rest
    else:
        y1_ref, st_ref = rest
    M = Bt * Ho * Wo
    Cin = xph_ref.shape[-1]
    Cp = w1_ref.shape[-1]

    # Tap (ky,kx) of the strided conv is a static slice of polyphase component
    # (ky%s, kx%s) of the zero-padded input.
    taps = []
    for k in range(9):
        ky, kx = k // 3, k % 3
        p = (ky % stride) * stride + (kx % stride)
        oy, ox = ky // stride, kx // stride
        tap = xph_ref[:, p * Hph + oy: p * Hph + oy + Ho, ox: ox + Wo, :]
        taps.append(tap.reshape(M, Cin))

    # Single MXU matmul with K = 9*Cin (no per-tap accumulator adds).
    cat = jnp.concatenate(taps, axis=-1)                       # (M, 9*Cin) bf16
    acc = jnp.dot(cat, w1_ref[...], preferred_element_type=jnp.float32)
    y1_ref[...] = acc.reshape(Bt, Ho, Wo, Cp).astype(y1_ref.dtype)

    rows = [jnp.sum(acc, axis=0, keepdims=True),
            jnp.sum(acc * acc, axis=0, keepdims=True)]
    if has_skip:
        # centre tap (k==4) == x[::s, ::s] -> 1x1 strided skip conv.
        ysk = jnp.dot(taps[4], wsk_ref[...], preferred_element_type=jnp.float32)
        ysk_ref[...] = ysk.reshape(Bt, Ho, Wo, Cp).astype(ysk_ref.dtype)
        rows += [jnp.sum(ysk, axis=0, keepdims=True),
                 jnp.sum(ysk * ysk, axis=0, keepdims=True)]
    st_ref[0] = jnp.concatenate(rows, axis=0)                  # one packed store


# ----------------------------- pass 2 -----------------------------
def _conv2_kernel(y1_ref, bn1_ref, w2_ref, z2_ref, st_ref, pad_ref, *, Bt, Ho, Wo):
    """Per block: bn1 (global affine) + relu, then 3x3/stride-1/pad-1 conv2
    (pre-BN) via a bf16 zero-padded VMEM scratch, plus bn2 partial sums."""
    M = Bt * Ho * Wo
    Cp = y1_ref.shape[-1]
    y1 = y1_ref[...].reshape(M, Cp).astype(jnp.float32)
    h = jnp.maximum(y1 * bn1_ref[0:1, :] + bn1_ref[1:2, :], 0.0)

    # Zero only the 1-pixel halo (interior is fully overwritten below); the
    # halo is re-zeroed every step so megacore "parallel" sharding stays safe.
    dt = pad_ref.dtype
    pad_ref[:, 0:1, :, :] = jnp.zeros((Bt, 1, Wo + 2, Cp), dt)
    pad_ref[:, Ho + 1:Ho + 2, :, :] = jnp.zeros((Bt, 1, Wo + 2, Cp), dt)
    pad_ref[:, 1:Ho + 1, 0:1, :] = jnp.zeros((Bt, Ho, 1, Cp), dt)
    pad_ref[:, 1:Ho + 1, Wo + 1:Wo + 2, :] = jnp.zeros((Bt, Ho, 1, Cp), dt)
    pad_ref[:, 1:Ho + 1, 1:Wo + 1, :] = h.reshape(Bt, Ho, Wo, Cp).astype(dt)

    # Taps concatenated per ky-row: 3 matmuls with K = 3*Cp instead of 9 @ Cp.
    acc = jnp.zeros((M, Cp), jnp.float32)
    for ky in range(3):
        row = jnp.concatenate(
            [pad_ref[:, ky:ky + Ho, kx:kx + Wo, :] for kx in range(3)],
            axis=-1).reshape(M, 3 * Cp)
        acc = acc + jnp.dot(row, w2_ref[ky], preferred_element_type=jnp.float32)
    z2_ref[...] = acc.reshape(Bt, Ho, Wo, Cp).astype(z2_ref.dtype)
    st_ref[0] = jnp.concatenate([jnp.sum(acc, axis=0, keepdims=True),
                                 jnp.sum(acc * acc, axis=0, keepdims=True)], axis=0)


# ----------------------------- pass 3 -----------------------------
def _finalize_kernel(z2_ref, id_ref, *rest, Bt, Ho, Wo, has_skip):
    """Per block: bn2, skip-BN (if any), residual add, relu (lane-dense VPU)."""
    if has_skip:
        bn2_ref, bnsk_ref, out_ref = rest
    else:
        bn2_ref, out_ref = rest
    M = Bt * Ho * Wo
    Cp = z2_ref.shape[-1]
    z2 = z2_ref[...].reshape(M, Cp).astype(jnp.float32)
    idn = id_ref[...].reshape(M, Cp).astype(jnp.float32)
    y2 = z2 * bn2_ref[0:1, :] + bn2_ref[1:2, :]
    if has_skip:
        idn = idn * bnsk_ref[0:1, :] + bnsk_ref[1:2, :]
    out_ref[...] = jnp.maximum(y2 + idn, 0.0).reshape(Bt, Ho, Wo, Cp)


# --------------------------- batch blocking ---------------------------
def _choose_bt(N, Ho, Wo, Cp, xph_img_bytes,
               target_m=512, budget_bytes=24 * 1024 * 1024):
    """Largest batch sub-tile Bt (divisor of N) that fits a conservative VMEM
    budget; stop growing once the matmul M dimension is comfortably filled."""
    per_img = 2 * 2 * (Ho * Wo * Cp * 2)          # y1 in + z2 out, double-buffered bf16
    per_img += (Ho + 2) * (Wo + 2) * Cp * 2       # padded conv2 scratch (bf16)
    per_img += Ho * Wo * 3 * Cp * 2               # tap-concat temporary (bf16)
    per_img += Ho * Wo * Cp * 4                   # f32 accumulator
    per_img += 2 * xph_img_bytes                  # pass-1 input tile, double-buffered
    bt = 1
    for cand in range(1, N + 1):
        if N % cand:
            continue
        if cand * per_img > budget_bytes:
            break
        bt = cand
        if cand * Ho * Wo >= target_m:
            break
    return bt


# ----------------------------- wrapper -----------------------------
def residual_block(x, w1, w2, wskip, bn, *, stride):
    """x: NCHW f32.  w1: (Cout,Cin,3,3), w2: (Cout,Cout,3,3),
    wskip: (Cout,Cin,1,1) or None, bn: (6, Cout) rows [g1,b1,g2,b2,gs,bs].
    Returns NCHW f32, matching the torch module (training-mode BatchNorm)."""
    N, Cin, H, W = x.shape
    Cout = w1.shape[0]
    s = int(stride)
    Ho = (H + 2 - 3) // s + 1
    Wo = (W + 2 - 3) // s + 1
    Mtot = N * Ho * Wo
    has_skip = (s != 1) or (Cin != Cout)
    assert (wskip is not None) == has_skip
    Cp = -(-Cout // LANES) * LANES                 # lane-dense channel axis
    pad_c = Cp - Cout

    # ---------------- layout glue (no compute) ----------------
    # TODO(synk): keep NHWC / Cp-padded channels end-to-end across stacked
    # blocks to remove the NCHW<->NHWC transposes (module spec is NCHW here).
    x_nhwc = jnp.transpose(x, (0, 2, 3, 1)).astype(jnp.float32)
    Hp2 = -(-(H + 2) // s) * s
    Wp2 = -(-(W + 2) // s) * s
    xpad = jnp.pad(x_nhwc, ((0, 0), (1, Hp2 - H - 1), (1, Wp2 - W - 1), (0, 0)))
    Hph, Wph = Hp2 // s, Wp2 // s
    assert 2 // s + Ho <= Hph and 2 // s + Wo <= Wph
    # Polyphase decomposition: ~0.5x the f32 input in bytes (bf16), no 9x im2col.
    # TODO(synk): when Cin << 128, fold a spatial factor into the channel axis
    # of x_ph so its DMA'd tiles are lane-dense.
    x_ph = jnp.concatenate(
        [xpad[:, py::s, px::s, :] for py in range(s) for px in range(s)],
        axis=1).astype(jnp.bfloat16)

    xph_img_bytes = (s * s * Hph) * (-(-Wph // 16) * 16) * LANES * 2
    Bt = _choose_bt(N, Ho, Wo, Cp, xph_img_bytes)
    G = N // Bt

    # Weights: channels-last, zero-padded to Cp lanes, stacked along K, bf16.
    w1_r = jnp.pad(jnp.transpose(w1, (2, 3, 1, 0)).reshape(9, Cin, Cout),
                   ((0, 0), (0, 0), (0, pad_c)))
    w1_r = w1_r.reshape(9 * Cin, Cp).astype(jnp.bfloat16)              # (9*Cin, Cp)
    w2_r = jnp.pad(jnp.transpose(w2, (2, 3, 1, 0)),
                   ((0, 0), (0, 0), (0, pad_c), (0, pad_c)))
    w2_r = w2_r.reshape(3, 3 * Cp, Cp).astype(jnp.bfloat16)            # (3, 3*Cp, Cp)

    # gamma padded with 1, beta with 0 so padded lanes stay exactly zero.
    def pad_gb(g, b):
        return (jnp.concatenate([g, jnp.ones((pad_c,), jnp.float32)]),
                jnp.concatenate([b, jnp.zeros((pad_c,), jnp.float32)]))
    g1, b1 = pad_gb(bn[0], bn[1])
    g2, b2 = pad_gb(bn[2], bn[3])
    gs, bs = pad_gb(bn[4], bn[5])

    img_spec = pl.BlockSpec((Bt, Ho, Wo, Cp), lambda g: (g, 0, 0, 0))
    parallel = pltpu.CompilerParams(dimension_semantics=("parallel",),
                                    vmem_limit_bytes=48 * 1024 * 1024)

    def full(a):
        nd = a.ndim
        return pl.BlockSpec(a.shape, lambda g: (0,) * nd)

    def bf16_img():
        return jax.ShapeDtypeStruct((N, Ho, Wo, Cp), jnp.bfloat16)

    # -------- pass 1: conv1 + skip conv (pre-BN) + BN partial sums --------
    nst = 4 if has_skip else 2
    in_arrays = [x_ph, w1_r]
    in_specs = [pl.BlockSpec((Bt, s * s * Hph, Wph, Cin), lambda g: (g, 0, 0, 0)),
                full(w1_r)]
    out_shape = [bf16_img()]
    out_specs = [img_spec]
    if has_skip:
        wsk_r = jnp.pad(jnp.transpose(wskip.reshape(Cout, Cin), (1, 0)),
                        ((0, 0), (0, pad_c))).astype(jnp.bfloat16)      # (Cin, Cp)
        in_arrays.append(wsk_r)
        in_specs.append(full(wsk_r))
        out_shape.append(bf16_img())
        out_specs.append(img_spec)
    out_shape.append(jax.ShapeDtypeStruct((G, nst, Cp), jnp.float32))
    out_specs.append(pl.BlockSpec((1, nst, Cp), lambda g: (g, 0, 0)))

    flops1 = 2 * Mtot * Cp * (9 * Cin + (Cin if has_skip else 0))
    bytes1 = 2 * (x_ph.size + w1_r.size
                  + (1 + int(has_skip)) * N * Ho * Wo * Cp) + 4 * G * nst * Cp
    res1 = pl.pallas_call(
        functools.partial(_conv1_skip_kernel, stride=s, Bt=Bt, Ho=Ho, Wo=Wo,
                          Hph=Hph, has_skip=has_skip),
        grid=(G,),
        in_specs=in_specs, out_specs=out_specs, out_shape=out_shape,
        compiler_params=parallel,
        cost_estimate=pl.CostEstimate(flops=int(flops1), transcendentals=0,
                                      bytes_accessed=int(bytes1)),
    )(*in_arrays)
    if has_skip:
        y1, ysk, st1 = res1
    else:
        y1, st1 = res1

    # Global training-mode BN statistics from per-block partial sums (tiny glue).
    def affine(total, total_sq, g, b):
        mean = total / Mtot
        var = jnp.maximum(total_sq / Mtot - mean * mean, 0.0)   # biased, clamped >= 0
        scale = g * jax.lax.rsqrt(var + BN_EPS)
        return jnp.stack([scale, b - mean * scale], axis=0)     # (2, Cp)

    s1 = jnp.sum(st1, axis=0)
    bn1p = affine(s1[0], s1[1], g1, b1)
    bnskp = affine(s1[2], s1[3], gs, bs) if has_skip else None

    # -------- pass 2: bn1 + relu + conv2 (pre-BN) + BN partial sums --------
    flops2 = 2 * Mtot * 9 * Cp * Cp
    bytes2 = 2 * (2 * N * Ho * Wo * Cp + w2_r.size) + 4 * (2 * Cp + G * 2 * Cp)
    z2, st2 = pl.pallas_call(
        functools.partial(_conv2_kernel, Bt=Bt, Ho=Ho, Wo=Wo),
        grid=(G,),
        in_specs=[img_spec, full(bn1p), full(w2_r)],
        out_specs=[img_spec, pl.BlockSpec((1, 2, Cp), lambda g: (g, 0, 0))],
        out_shape=[bf16_img(), jax.ShapeDtypeStruct((G, 2, Cp), jnp.float32)],
        scratch_shapes=[pltpu.VMEM((Bt, Ho + 2, Wo + 2, Cp), jnp.bfloat16)],
        compiler_params=parallel,
        cost_estimate=pl.CostEstimate(flops=int(flops2), transcendentals=0,
                                      bytes_accessed=int(bytes2)),
    )(y1, bn1p, w2_r)

    s2 = jnp.sum(st2, axis=0)
    bn2p = affine(s2[0], s2[1], g2, b2)

    # -------- pass 3: bn2 + skip BN + residual add + relu --------
    if has_skip:
        ident = ysk
        extra, extra_specs = [bnskp], [full(bnskp)]
    else:
        # Identity path: read the lane-padded input directly (ysk never exists).
        ident = jnp.pad(x_nhwc, ((0, 0), (0, 0), (0, 0), (0, pad_c))).astype(jnp.bfloat16)
        extra, extra_specs = [], []
    out = pl.pallas_call(
        functools.partial(_finalize_kernel, Bt=Bt, Ho=Ho, Wo=Wo, has_skip=has_skip),
        grid=(G,),
        in_specs=[img_spec, img_spec, full(bn2p)] + extra_specs,
        out_specs=img_spec,
        out_shape=jax.ShapeDtypeStruct((N, Ho, Wo, Cp), jnp.float32),
        compiler_params=parallel,
        cost_estimate=pl.CostEstimate(
            flops=int(6 * Mtot * Cp), transcendentals=0,
            bytes_accessed=int(2 * 2 * N * Ho * Wo * Cp + 4 * N * Ho * Wo * Cp)),
    )(z2, ident, bn2p, *extra)

    return jnp.transpose(out[:, :, :, :Cout], (0, 3, 1, 2))


# ------------------------- pure-JAX reference -------------------------
def reference_forward(x, w1, w2, wskip, stride):
    def conv(a, w, s_, pad):
        return jax.lax.conv_general_dilated(
            a, w, window_strides=(s_, s_), padding=[(pad, pad), (pad, pad)],
            dimension_numbers=('NCHW', 'OIHW', 'NCHW'))

    def bn(a):  # gamma=1, beta=0, training-mode (biased) statistics
        mean = jnp.mean(a, axis=(0, 2, 3), keepdims=True)
        var = jnp.mean((a - mean) ** 2, axis=(0, 2, 3), keepdims=True)
        return (a - mean) / jnp.sqrt(var + BN_EPS)

    out = jax.nn.relu(bn(conv(x, w1, stride, 1)))
    out = bn(conv(out, w2, 1, 1))
    identity = bn(conv(x, wskip, stride, 0)) if wskip is not None else x
    return jax.nn.relu(out + identity)


if __name__ == "__main__":
    key = jax.random.PRNGKey(0)

    def make_params(k, Cin, Cout, with_skip):
        k1, k2, k3 = jax.random.split(k, 3)
        # Kaiming normal, mode='fan_out', nonlinearity='relu': std = sqrt(2/fan_out)
        w1 = jax.random.normal(k1, (Cout, Cin, 3, 3), jnp.float32) * np.sqrt(2.0 / (Cout * 9))
        w2 = jax.random.normal(k2, (Cout, Cout, 3, 3), jnp.float32) * np.sqrt(2.0 / (Cout * 9))
        wsk = (jax.random.normal(k3, (Cout, Cin, 1, 1), jnp.float32) * np.sqrt(2.0 / Cout)
               if with_skip else None)
        # BN params (module init): gamma=1, beta=0 for bn1 / bn2 / skip-bn.
        bnp = jnp.stack([jnp.ones(Cout), jnp.zeros(Cout),
                         jnp.ones(Cout), jnp.zeros(Cout),
                         jnp.ones(Cout), jnp.zeros(Cout)]).astype(jnp.float32)
        return w1, w2, wsk, bnp

    kp1, kx1, kp2, kx2 = jax.random.split(key, 4)

    # 1) Downsampling block: stride 2, Cin != Cout -> 1x1-conv + BN skip branch.
    N, Cin, Cout, H, W, stride = 2, 4, 8, 16, 16, 2
    w1, w2, wskip, bnp = make_params(kp1, Cin, Cout, True)
    x = jax.random.normal(kx1, (N, Cin, H, W), jnp.float32)
    run = jax.jit(functools.partial(residual_block, stride=stride))
    out = jax.block_until_ready(run(x, w1, w2, wskip, bnp))
    ref = jax.block_until_ready(reference_forward(x, w1, w2, wskip, stride))
    # Tolerance reflects bf16 MXU operands / bf16 intermediates vs an all-f32 ref.
    np.testing.assert_allclose(np.asarray(out), np.asarray(ref), rtol=2e-2, atol=4e-2)

    # 2) Identity block: stride 1, Cin == Cout -> plain residual add (no skip conv).
    N2, C2, H2, W2 = 2, 8, 8, 8
    w1b, w2b, _, bnb = make_params(kp2, C2, C2, False)
    xb = jax.random.normal(kx2, (N2, C2, H2, W2), jnp.float32)
    run2 = jax.jit(functools.partial(residual_block, stride=1))
    out2 = jax.block_until_ready(run2(xb, w1b, w2b, None, bnb))
    ref2 = jax.block_until_ready(reference_forward(xb, w1b, w2b, None, 1))
    np.testing.assert_allclose(np.asarray(out2), np.asarray(ref2), rtol=2e-2, atol=4e-2)

    print("KERNEL_OK")
</pallas_src>

<mosaic_0001>
module attributes {stable_mosaic.version = 11 : i64} {
  func.func @_conv1_skip_kernel(%arg0: i32, %arg1: memref<2x36x9x4xbf16, #tpu.memory_space<vmem>>, %arg2: memref<36x128xbf16, #tpu.memory_space<vmem>>, %arg3: memref<4x128xbf16, #tpu.memory_space<vmem>>, %arg4: memref<2x8x8x128xbf16, #tpu.memory_space<vmem>>, %arg5: memref<2x8x8x128xbf16, #tpu.memory_space<vmem>>, %arg6: memref<1x4x128xf32, #tpu.memory_space<vmem>>) attributes {dimension_semantics = [#tpu.dimension_semantics<parallel>], iteration_bounds = array<i64: 1>, scalar_prefetch = 0 : i64, scratch_operands = 0 : i64, tpu.core_type = #tpu.core_type<tc>, window_params = [{transform_indices = @transform_0, window_bounds = array<i64: 2, 36, 9, 4>}, {pipeline_mode = #tpu.pipeline_mode<synchronous>, transform_indices = @transform_1, window_bounds = array<i64: 36, 128>}, {pipeline_mode = #tpu.pipeline_mode<synchronous>, transform_indices = @transform_2, window_bounds = array<i64: 4, 128>}, {transform_indices = @transform_3, window_bounds = array<i64: 2, 8, 8, 128>}, {transform_indices = @transform_4, window_bounds = array<i64: 2, 8, 8, 128>}, {transform_indices = @transform_5, window_bounds = array<i64: 1, 4, 128>}]} {
    %c0 = arith.constant 0 : index
    %c0_0 = arith.constant 0 : index
    %c0_1 = arith.constant 0 : index
    %c0_2 = arith.constant 0 : index
    %0 = vector.load %arg1[%c0, %c0_0, %c0_1, %c0_2] : memref<2x36x9x4xbf16, #tpu.memory_space<vmem>>, vector<2x8x8x4xbf16>
    %1 = vector.shape_cast %0 : vector<2x8x8x4xbf16> to vector<128x4xbf16>
    %c0_3 = arith.constant 0 : index
    %c9 = arith.constant 9 : index
    %c0_4 = arith.constant 0 : index
    %c0_5 = arith.constant 0 : index
    %2 = vector.load %arg1[%c0_3, %c9, %c0_4, %c0_5] : memref<2x36x9x4xbf16, #tpu.memory_space<vmem>>, vector<2x8x8x4xbf16>
    %3 = vector.shape_cast %2 : vector<2x8x8x4xbf16> to vector<128x4xbf16>
    %c0_6 = arith.constant 0 : index
    %c0_7 = arith.constant 0 : index
    %c1 = arith.constant 1 : index
    %c0_8 = arith.constant 0 : index
    %4 = vector.load %arg1[%c0_6, %c0_7, %c1, %c0_8] : memref<2x36x9x4xbf16, #tpu.memory_space<vmem>>, vector<2x8x8x4xbf16>
    %5 = vector.shape_cast %4 : vector<2x8x8x4xbf16> to vector<128x4xbf16>
    %c0_9 = arith.constant 0 : index
    %c18 = arith.constant 18 : index
    %c0_10 = arith.constant 0 : index
    %c0_11 = arith.constant 0 : index
    %6 = vector.load %arg1[%c0_9, %c18, %c0_10, %c0_11] : memref<2x36x9x4xbf16, #tpu.memory_space<vmem>>, vector<2x8x8x4xbf16>
    %7 = vector.shape_cast %6 : vector<2x8x8x4xbf16> to vector<128x4xbf16>
    %c0_12 = arith.constant 0 : index
    %c27 = arith.constant 27 : index
    %c0_13 = arith.constant 0 : index
    %c0_14 = arith.constant 0 : index
    %8 = vector.load %arg1[%c0_12, %c27, %c0_13, %c0_14] : memref<2x36x9x4xbf16, #tpu.memory_space<vmem>>, vector<2x8x8x4xbf16>
    %9 = vector.shape_cast %8 : vector<2x8x8x4xbf16> to vector<128x4xbf16>
    %c0_15 = arith.constant 0 : index
    %c18_16 = arith.constant 18 : index
    %c1_17 = arith.constant 1 : index
    %c0_18 = arith.constant 0 : index
    %10 = vector.load %arg1[%c0_15, %c18_16, %c1_17, %c0_18] : memref<2x36x9x4xbf16, #tpu.memory_space<vmem>>, vector<2x8x8x4xbf16>
    %11 = vector.shape_cast %10 : vector<2x8x8x4xbf16> to vector<128x4xbf16>
    %c0_19 = arith.constant 0 : index
    %c1_20 = arith.constant 1 : index
    %c0_21 = arith.constant 0 : index
    %c0_22 = arith.constant 0 : index
    %12 = vector.load %arg1[%c0_19, %c1_20, %c0_21, %c0_22] : memref<2x36x9x4xbf16, #tpu.memory_space<vmem>>, vector<2x8x8x4xbf16>
    %13 = vector.shape_cast %12 : vector<2x8x8x4xbf16> to vector<128x4xbf16>
    %c0_23 = arith.constant 0 : index
    %c10 = arith.constant 10 : index
    %c0_24 = arith.constant 0 : index
    %c0_25 = arith.constant 0 : index
    %14 = vector.load %arg1[%c0_23, %c10, %c0_24, %c0_25] : memref<2x36x9x4xbf16, #tpu.memory_space<vmem>>, vector<2x8x8x4xbf16>
    %15 = vector.shape_cast %14 : vector<2x8x8x4xbf16> to vector<128x4xbf16>
    %c0_26 = arith.constant 0 : index
    %c1_27 = arith.constant 1 : index
    %c1_28 = arith.constant 1 : index
    %c0_29 = arith.constant 0 : index
    %16 = vector.load %arg1[%c0_26, %c1_27, %c1_28, %c0_29] : memref<2x36x9x4xbf16, #tpu.memory_space<vmem>>, vector<2x8x8x4xbf16>
    %17 = vector.shape_cast %16 : vector<2x8x8x4xbf16> to vector<128x4xbf16>
    %18 = tpu.concatenate %1, %3, %5, %7, %9, %11, %13, %15, %17 in 1 : vector<128x4xbf16>, vector<128x4xbf16>, vector<128x4xbf16>, vector<128x4xbf16>, vector<128x4xbf16>, vector<128x4xbf16>, vector<128x4xbf16>, vector<128x4xbf16>, vector<128x4xbf16> -> vector<128x36xbf16>
    %c0_30 = arith.constant 0 : index
    %c0_31 = arith.constant 0 : index
    %19 = vector.load %arg2[%c0_30, %c0_31] : memref<36x128xbf16, #tpu.memory_space<vmem>>, vector<36x128xbf16>
    %cst = arith.constant dense<0.000000e+00> : vector<128x128xf32>
    %20 = tpu.matmul %18, %19, %cst {dimension_numbers = #tpu.dot_dimension_numbers<[1], [0], [0], [1], [0, 0, 1, 1], [], []>} : vector<128x36xbf16>, vector<36x128xbf16>, vector<128x128xf32> -> vector<128x128xf32>
    %21 = vector.shape_cast %20 : vector<128x128xf32> to vector<2x8x8x128xf32>
    %22 = arith.truncf %21 : vector<2x8x8x128xf32> to vector<2x8x8x128xbf16>
    %c0_32 = arith.constant 0 : index
    %c0_33 = arith.constant 0 : index
    %c0_34 = arith.constant 0 : index
    %c0_35 = arith.constant 0 : index
    %23 = vector.load %arg4[%c0_32, %c0_33, %c0_34, %c0_35] : memref<2x8x8x128xbf16, #tpu.memory_space<vmem>>, vector<2x8x8x128xbf16>
    tpu.vector_store %arg4[%c0_32, %c0_33, %c0_34, %c0_35], %22 {strides = array<i32>} : memref<2x8x8x128xbf16, #tpu.memory_space<vmem>>, vector<2x8x8x128xbf16>,
    %cst_36 = arith.constant dense<0.000000e+00> : vector<128xf32>
    %24 = vector.multi_reduction <add>, %20, %cst_36 [0] : vector<128x128xf32> to vector<128xf32>
    %25 = vector.shape_cast %24 : vector<128xf32> to vector<1x128xf32>
    %26 = arith.mulf %20, %20 : vector<128x128xf32>
    %cst_37 = arith.constant dense<0.000000e+00> : vector<128xf32>
    %27 = vector.multi_reduction <add>, %26, %cst_37 [0] : vector<128x128xf32> to vector<128xf32>
    %28 = vector.shape_cast %27 : vector<128xf32> to vector<1x128xf32>
    %c0_38 = arith.constant 0 : index
    %c0_39 = arith.constant 0 : index
    %29 = vector.load %arg3[%c0_38, %c0_39] : memref<4x128xbf16, #tpu.memory_space<vmem>>, vector<4x128xbf16>
    %cst_40 = arith.constant dense<0.000000e+00> : vector<128x128xf32>
    %30 = tpu.matmul %9, %29, %cst_40 {dimension_numbers = #tpu.dot_dimension_numbers<[1], [0], [0], [1], [0, 0, 1, 1], [], []>} : vector<128x4xbf16>, vector<4x128xbf16>, vector<128x128xf32> -> vector<128x128xf32>
    %31 = vector.shape_cast %30 : vector<128x128xf32> to vector<2x8x8x128xf32>
    %32 = arith.truncf %31 : vector<2x8x8x128xf32> to vector<2x8x8x128xbf16>
    %c0_41 = arith.constant 0 : index
    %c0_42 = arith.constant 0 : index
    %c0_43 = arith.constant 0 : index
    %c0_44 = arith.constant 0 : index
    %33 = vector.load %arg5[%c0_41, %c0_42, %c0_43, %c0_44] : memref<2x8x8x128xbf16, #tpu.memory_space<vmem>>, vector<2x8x8x128xbf16>
    tpu.vector_store %arg5[%c0_41, %c0_42, %c0_43, %c0_44], %32 {strides = array<i32>} : memref<2x8x8x128xbf16, #tpu.memory_space<vmem>>, vector<2x8x8x128xbf16>,
    %cst_45 = arith.constant dense<0.000000e+00> : vector<128xf32>
    %34 = vector.multi_reduction <add>, %30, %cst_45 [0] : vector<128x128xf32> to vector<128xf32>
    %35 = vector.shape_cast %34 : vector<128xf32> to vector<1x128xf32>
    %36 = arith.mulf %30, %30 : vector<128x128xf32>
    %cst_46 = arith.constant dense<0.000000e+00> : vector<128xf32>
    %37 = vector.multi_reduction <add>, %36, %cst_46 [0] : vector<128x128xf32> to vector<128xf32>
    %38 = vector.shape_cast %37 : vector<128xf32> to vector<1x128xf32>
    %39 = tpu.concatenate %25, %28, %35, %38 in 0 : vector<1x128xf32>, vector<1x128xf32>, vector<1x128xf32>, vector<1x128xf32> -> vector<4x128xf32>
    %c0_47 = arith.constant 0 : index
    %c0_48 = arith.constant 0 : index
    %c0_49 = arith.constant 0 : index
    %40 = vector.load %arg6[%c0_47, %c0_48, %c0_49] : memref<1x4x128xf32, #tpu.memory_space<vmem>>, vector<1x4x128xf32>
    %41 = vector.shape_cast %40 : vector<1x4x128xf32> to vector<4x128xf32>
    %42 = vector.shape_cast %39 : vector<4x128xf32> to vector<1x4x128xf32>
    tpu.vector_store %arg6[%c0_47, %c0_48, %c0_49], %42 {strides = array<i32>} : memref<1x4x128xf32, #tpu.memory_space<vmem>>, vector<1x4x128xf32>,
    return
  }
  func.func @transform_0(%arg0: i32) -> (i32, i32, i32, i32) {
    %c0_i32 = arith.constant 0 : i32
    %c0_i32_0 = arith.constant 0 : i32
    %c0_i32_1 = arith.constant 0 : i32
    %c0_i32_2 = arith.constant 0 : i32
    return %arg0, %c0_i32, %c0_i32_0, %c0_i32_1 : i32, i32, i32, i32
  }
  func.func @transform_1(%arg0: i32) -> (i32, i32) {
    %c0_i32 = arith.constant 0 : i32
    %c0_i32_0 = arith.constant 0 : i32
    %c0_i32_1 = arith.constant 0 : i32
    return %c0_i32, %c0_i32_0 : i32, i32
  }
  func.func @transform_2(%arg0: i32) -> (i32, i32) {
    %c0_i32 = arith.constant 0 : i32
    %c0_i32_0 = arith.constant 0 : i32
    %c0_i32_1 = arith.constant 0 : i32
    return %c0_i32, %c0_i32_0 : i32, i32
  }
  func.func @transform_3(%arg0: i32) -> (i32, i32, i32, i32) {
    %c0_i32 = arith.constant 0 : i32
    %c0_i32_0 = arith.constant 0 : i32
    %c0_i32_1 = arith.constant 0 : i32
    %c0_i32_2 = arith.constant 0 : i32
    return %arg0, %c0_i32, %c0_i32_0, %c0_i32_1 : i32, i32, i32, i32
  }
  func.func @transform_4(%arg0: i32) -> (i32, i32, i32, i32) {
    %c0_i32 = arith.constant 0 : i32
    %c0_i32_0 = arith.constant 0 : i32
    %c0_i32_1 = arith.constant 0 : i32
    %c0_i32_2 = arith.constant 0 : i32
    return %arg0, %c0_i32, %c0_i32_0, %c0_i32_1 : i32, i32, i32, i32
  }
  func.func @transform_5(%arg0: i32) -> (i32, i32, i32) {
    %c0_i32 = arith.constant 0 : i32
    %c0_i32_0 = arith.constant 0 : i32
    %c0_i32_1 = arith.constant 0 : i32
    return %arg0, %c0_i32, %c0_i32_0 : i32, i32, i32
  }
}

module attributes {stable_mosaic.version = 11 : i64} {
  func.func @_conv2_kernel(%arg0: i32, %arg1: memref<2x8x8x128xbf16, #tpu.memory_space<vmem>>, %arg2: memref<2x128xf32, #tpu.memory_space<vmem>>, %arg3: memref<3x384x128xbf16, #tpu.memory_space<vmem>>, %arg4: memref<2x8x8x128xbf16, #tpu.memory_space<vmem>>, %arg5: memref<1x2x128xf32, #tpu.memory_space<vmem>>, %arg6: memref<2x10x10x128xbf16, #tpu.memory_space<vmem>>) attributes {dimension_semantics = [#tpu.dimension_semantics<parallel>], iteration_bounds = array<i64: 1>, scalar_prefetch = 0 : i64, scratch_operands = 1 : i64, tpu.core_type = #tpu.core_type<tc>, window_params = [{transform_indices = @transform_0, window_bounds = array<i64: 2, 8, 8, 128>}, {pipeline_mode = #tpu.pipeline_mode<synchronous>, transform_indices = @transform_1, window_bounds = array<i64: 2, 128>}, {pipeline_mode = #tpu.pipeline_mode<synchronous>, transform_indices = @transform_2, window_bounds = array<i64: 3, 384, 128>}, {transform_indices = @transform_3, window_bounds = array<i64: 2, 8, 8, 128>}, {transform_indices = @transform_4, window_bounds = array<i64: 1, 2, 128>}]} {
    %c0 = arith.constant 0 : index
    %c0_0 = arith.constant 0 : index
    %c0_1 = arith.constant 0 : index
    %c0_2 = arith.constant 0 : index
    %0 = vector.load %arg1[%c0, %c0_0, %c0_1, %c0_2] : memref<2x8x8x128xbf16, #tpu.memory_space<vmem>>, vector<2x8x8x128xbf16>
    %1 = vector.shape_cast %0 : vector<2x8x8x128xbf16> to vector<128x128xbf16>
    %2 = arith.extf %1 : vector<128x128xbf16> to vector<128x128xf32>
    %c0_3 = arith.constant 0 : index
    %c0_4 = arith.constant 0 : index
    %3 = vector.load %arg2[%c0_3, %c0_4] : memref<2x128xf32, #tpu.memory_space<vmem>>, vector<1x128xf32>
    %4 = vector.broadcast %3 : vector<1x128xf32> to vector<128x128xf32>
    %5 = arith.mulf %2, %4 : vector<128x128xf32>
    %c1 = arith.constant 1 : index
    %c0_5 = arith.constant 0 : index
    %6 = vector.load %arg2[%c1, %c0_5] : memref<2x128xf32, #tpu.memory_space<vmem>>, vector<1x128xf32>
    %7 = vector.broadcast %6 : vector<1x128xf32> to vector<128x128xf32>
    %8 = arith.addf %5, %7 : vector<128x128xf32>
    %cst = arith.constant 0.000000e+00 : f32
    %9 = vector.broadcast %cst : f32 to vector<128x128xf32>
    %10 = arith.maximumf %8, %9 : vector<128x128xf32>
    %cst_6 = arith.constant 0.000000e+00 : bf16
    %11 = vector.broadcast %cst_6 : bf16 to vector<2x1x10x128xbf16>
    %c0_7 = arith.constant 0 : index
    %c0_8 = arith.constant 0 : index
    %c0_9 = arith.constant 0 : index
    %c0_10 = arith.constant 0 : index
    %12 = vector.load %arg6[%c0_7, %c0_8, %c0_9, %c0_10] : memref<2x10x10x128xbf16, #tpu.memory_space<vmem>>, vector<2x1x10x128xbf16>
    tpu.vector_store %arg6[%c0_7, %c0_8, %c0_9, %c0_10], %11 {strides = array<i32>} : memref<2x10x10x128xbf16, #tpu.memory_space<vmem>>, vector<2x1x10x128xbf16>,
    %cst_11 = arith.constant 0.000000e+00 : bf16
    %13 = vector.broadcast %cst_11 : bf16 to vector<2x1x10x128xbf16>
    %c0_12 = arith.constant 0 : index
    %c9 = arith.constant 9 : index
    %c0_13 = arith.constant 0 : index
    %c0_14 = arith.constant 0 : index
    %14 = vector.load %arg6[%c0_12, %c9, %c0_13, %c0_14] : memref<2x10x10x128xbf16, #tpu.memory_space<vmem>>, vector<2x1x10x128xbf16>
    tpu.vector_store %arg6[%c0_12, %c9, %c0_13, %c0_14], %13 {strides = array<i32>} : memref<2x10x10x128xbf16, #tpu.memory_space<vmem>>, vector<2x1x10x128xbf16>,
    %cst_15 = arith.constant 0.000000e+00 : bf16
    %15 = vector.broadcast %cst_15 : bf16 to vector<2x8x1x128xbf16>
    %c0_16 = arith.constant 0 : index
    %c1_17 = arith.constant 1 : index
    %c0_18 = arith.constant 0 : index
    %c0_19 = arith.constant 0 : index
    %16 = vector.load %arg6[%c0_16, %c1_17, %c0_18, %c0_19] : memref<2x10x10x128xbf16, #tpu.memory_space<vmem>>, vector<2x8x1x128xbf16>
    tpu.vector_store %arg6[%c0_16, %c1_17, %c0_18, %c0_19], %15 {strides = array<i32>} : memref<2x10x10x128xbf16, #tpu.memory_space<vmem>>, vector<2x8x1x128xbf16>,
    %cst_20 = arith.constant 0.000000e+00 : bf16
    %17 = vector.broadcast %cst_20 : bf16 to vector<2x8x1x128xbf16>
    %c0_21 = arith.constant 0 : index
    %c1_22 = arith.constant 1 : index
    %c9_23 = arith.constant 9 : index
    %c0_24 = arith.constant 0 : index
    %18 = vector.load %arg6[%c0_21, %c1_22, %c9_23, %c0_24] : memref<2x10x10x128xbf16, #tpu.memory_space<vmem>>, vector<2x8x1x128xbf16>
    tpu.vector_store %arg6[%c0_21, %c1_22, %c9_23, %c0_24], %17 {strides = array<i32>} : memref<2x10x10x128xbf16, #tpu.memory_space<vmem>>, vector<2x8x1x128xbf16>,
    %19 = vector.shape_cast %10 : vector<128x128xf32> to vector<2x8x8x128xf32>
    %20 = arith.truncf %19 : vector<2x8x8x128xf32> to vector<2x8x8x128xbf16>
    %c0_25 = arith.constant 0 : index
    %c1_26 = arith.constant 1 : index
    %c1_27 = arith.constant 1 : index
    %c0_28 = arith.constant 0 : index
    %21 = vector.load %arg6[%c0_25, %c1_26, %c1_27, %c0_28] : memref<2x10x10x128xbf16, #tpu.memory_space<vmem>>, vector<2x8x8x128xbf16>
    tpu.vector_store %arg6[%c0_25, %c1_26, %c1_27, %c0_28], %20 {strides = array<i32>} : memref<2x10x10x128xbf16, #tpu.memory_space<vmem>>, vector<2x8x8x128xbf16>,
    %cst_29 = arith.constant 0.000000e+00 : f32
    %22 = vector.broadcast %cst_29 : f32 to vector<128x128xf32>
    %c0_30 = arith.constant 0 : index
    %c0_31 = arith.constant 0 : index
    %c0_32 = arith.constant 0 : index
    %c0_33 = arith.constant 0 : index
    %23 = vector.load %arg6[%c0_30, %c0_31, %c0_32, %c0_33] : memref<2x10x10x128xbf16, #tpu.memory_space<vmem>>, vector<2x8x8x128xbf16>
    %c0_34 = arith.constant 0 : index
    %c0_35 = arith.constant 0 : index
    %c1_36 = arith.constant 1 : index
    %c0_37 = arith.constant 0 : index
    %24 = vector.load %arg6[%c0_34, %c0_35, %c1_36, %c0_37] : memref<2x10x10x128xbf16, #tpu.memory_space<vmem>>, vector<2x8x8x128xbf16>
    %c0_38 = arith.constant 0 : index
    %c0_39 = arith.constant 0 : index
    %c2 = arith.constant 2 : index
    %c0_40 = arith.constant 0 : index
    %25 = vector.load %arg6[%c0_38, %c0_39, %c2, %c0_40] : memref<2x10x10x128xbf16, #tpu.memory_space<vmem>>, vector<2x8x8x128xbf16>
    %26 = tpu.concatenate %23, %24, %25 in 3 : vector<2x8x8x128xbf16>, vector<2x8x8x128xbf16>, vector<2x8x8x128xbf16> -> vector<2x8x8x384xbf16>
    %27 = vector.shape_cast %26 : vector<2x8x8x384xbf16> to vector<128x384xbf16>
    %c0_41 = arith.constant 0 : index
    %c0_42 = arith.constant 0 : index
    %c0_43 = arith.constant 0 : index
    %28 = vector.load %arg3[%c0_41, %c0_42, %c0_43] : memref<3x384x128xbf16, #tpu.memory_space<vmem>>, vector<1x384x128xbf16>
    %29 = vector.shape_cast %28 : vector<1x384x128xbf16> to vector<384x128xbf16>
    %cst_44 = arith.constant dense<0.000000e+00> : vector<128x128xf32>
    %30 = tpu.matmul %27, %29, %cst_44 {dimension_numbers = #tpu.dot_dimension_numbers<[1], [0], [0], [1], [0, 0, 1, 1], [], []>} : vector<128x384xbf16>, vector<384x128xbf16>, vector<128x128xf32> -> vector<128x128xf32>
    %31 = arith.addf %22, %30 : vector<128x128xf32>
    %c0_45 = arith.constant 0 : index
    %c1_46 = arith.constant 1 : index
    %c0_47 = arith.constant 0 : index
    %c0_48 = arith.constant 0 : index
    %32 = vector.load %arg6[%c0_45, %c1_46, %c0_47, %c0_48] : memref<2x10x10x128xbf16, #tpu.memory_space<vmem>>, vector<2x8x8x128xbf16>
    %c0_49 = arith.constant 0 : index
    %c1_50 = arith.constant 1 : index
    %c1_51 = arith.constant 1 : index
    %c0_52 = arith.constant 0 : index
    %33 = vector.load %arg6[%c0_49, %c1_50, %c1_51, %c0_52] : memref<2x10x10x128xbf16, #tpu.memory_space<vmem>>, vector<2x8x8x128xbf16>
    %c0_53 = arith.constant 0 : index
    %c1_54 = arith.constant 1 : index
    %c2_55 = arith.constant 2 : index
    %c0_56 = arith.constant 0 : index
    %34 = vector.load %arg6[%c0_53, %c1_54, %c2_55, %c0_56] : memref<2x10x10x128xbf16, #tpu.memory_space<vmem>>, vector<2x8x8x128xbf16>
    %35 = tpu.concatenate %32, %33, %34 in 3 : vector<2x8x8x128xbf16>, vector<2x8x8x128xbf16>, vector<2x8x8x128xbf16> -> vector<2x8x8x384xbf16>
    %36 = vector.shape_cast %35 : vector<2x8x8x384xbf16> to vector<128x384xbf16>
    %c1_57 = arith.constant 1 : index
    %c0_58 = arith.constant 0 : index
    %c0_59 = arith.constant 0 : index
    %37 = vector.load %arg3[%c1_57, %c0_58, %c0_59] : memref<3x384x128xbf16, #tpu.memory_space<vmem>>, vector<1x384x128xbf16>
    %38 = vector.shape_cast %37 : vector<1x384x128xbf16> to vector<384x128xbf16>
    %cst_60 = arith.constant dense<0.000000e+00> : vector<128x128xf32>
    %39 = tpu.matmul %36, %38, %cst_60 {dimension_numbers = #tpu.dot_dimension_numbers<[1], [0], [0], [1], [0, 0, 1, 1], [], []>} : vector<128x384xbf16>, vector<384x128xbf16>, vector<128x128xf32> -> vector<128x128xf32>
    %40 = arith.addf %31, %39 : vector<128x128xf32>
    %c0_61 = arith.constant 0 : index
    %c2_62 = arith.constant 2 : index
    %c0_63 = arith.constant 0 : index
    %c0_64 = arith.constant 0 : index
    %41 = vector.load %arg6[%c0_61, %c2_62, %c0_63, %c0_64] : memref<2x10x10x128xbf16, #tpu.memory_space<vmem>>, vector<2x8x8x128xbf16>
    %c0_65 = arith.constant 0 : index
    %c2_66 = arith.constant 2 : index
    %c1_67 = arith.constant 1 : index
    %c0_68 = arith.constant 0 : index
    %42 = vector.load %arg6[%c0_65, %c2_66, %c1_67, %c0_68] : memref<2x10x10x128xbf16, #tpu.memory_space<vmem>>, vector<2x8x8x128xbf16>
    %c0_69 = arith.constant 0 : index
    %c2_70 = arith.constant 2 : index
    %c2_71 = arith.constant 2 : index
    %c0_72 = arith.constant 0 : index
    %43 = vector.load %arg6[%c0_69, %c2_70, %c2_71, %c0_72] : memref<2x10x10x128xbf16, #tpu.memory_space<vmem>>, vector<2x8x8x128xbf16>
    %44 = tpu.concatenate %41, %42, %43 in 3 : vector<2x8x8x128xbf16>, vector<2x8x8x128xbf16>, vector<2x8x8x128xbf16> -> vector<2x8x8x384xbf16>
    %45 = vector.shape_cast %44 : vector<2x8x8x384xbf16> to vector<128x384xbf16>
    %c2_73 = arith.constant 2 : index
    %c0_74 = arith.constant 0 : index
    %c0_75 = arith.constant 0 : index
    %46 = vector.load %arg3[%c2_73, %c0_74, %c0_75] : memref<3x384x128xbf16, #tpu.memory_space<vmem>>, vector<1x384x128xbf16>
    %47 = vector.shape_cast %46 : vector<1x384x128xbf16> to vector<384x128xbf16>
    %cst_76 = arith.constant dense<0.000000e+00> : vector<128x128xf32>
    %48 = tpu.matmul %45, %47, %cst_76 {dimension_numbers = #tpu.dot_dimension_numbers<[1], [0], [0], [1], [0, 0, 1, 1], [], []>} : vector<128x384xbf16>, vector<384x128xbf16>, vector<128x128xf32> -> vector<128x128xf32>
    %49 = arith.addf %40, %48 : vector<128x128xf32>
    %50 = vector.shape_cast %49 : vector<128x128xf32> to vector<2x8x8x128xf32>
    %51 = arith.truncf %50 : vector<2x8x8x128xf32> to vector<2x8x8x128xbf16>
    %c0_77 = arith.constant 0 : index
    %c0_78 = arith.constant 0 : index
    %c0_79 = arith.constant 0 : index
    %c0_80 = arith.constant 0 : index
    %52 = vector.load %arg4[%c0_77, %c0_78, %c0_79, %c0_80] : memref<2x8x8x128xbf16, #tpu.memory_space<vmem>>, vector<2x8x8x128xbf16>
    tpu.vector_store %arg4[%c0_77, %c0_78, %c0_79, %c0_80], %51 {strides = array<i32>} : memref<2x8x8x128xbf16, #tpu.memory_space<vmem>>, vector<2x8x8x128xbf16>,
    %cst_81 = arith.constant dense<0.000000e+00> : vector<128xf32>
    %53 = vector.multi_reduction <add>, %49, %cst_81 [0] : vector<128x128xf32> to vector<128xf32>
    %54 = vector.shape_cast %53 : vector<128xf32> to vector<1x128xf32>
    %55 = arith.mulf %49, %49 : vector<128x128xf32>
    %cst_82 = arith.constant dense<0.000000e+00> : vector<128xf32>
    %56 = vector.multi_reduction <add>, %55, %cst_82 [0] : vector<128x128xf32> to vector<128xf32>
    %57 = vector.shape_cast %56 : vector<128xf32> to vector<1x128xf32>
    %58 = tpu.concatenate %54, %57 in 0 : vector<1x128xf32>, vector<1x128xf32> -> vector<2x128xf32>
    %c0_83 = arith.constant 0 : index
    %c0_84 = arith.constant 0 : index
    %c0_85 = arith.constant 0 : index
    %59 = vector.load %arg5[%c0_83, %c0_84, %c0_85] : memref<1x2x128xf32, #tpu.memory_space<vmem>>, vector<1x2x128xf32>
    %60 = vector.shape_cast %59 : vector<1x2x128xf32> to vector<2x128xf32>
    %61 = vector.shape_cast %58 : vector<2x128xf32> to vector<1x2x128xf32>
    tpu.vector_store %arg5[%c0_83, %c0_84, %c0_85], %61 {strides = array<i32>} : memref<1x2x128xf32, #tpu.memory_space<vmem>>, vector<1x2x128xf32>,
    return
  }
  func.func @transform_0(%arg0: i32) -> (i32, i32, i32, i32) {
    %c0_i32 = arith.constant 0 : i32
    %c0_i32_0 = arith.constant 0 : i32
    %c0_i32_1 = arith.constant 0 : i32
    %c0_i32_2 = arith.constant 0 : i32
    return %arg0, %c0_i32, %c0_i32_0, %c0_i32_1 : i32, i32, i32, i32
  }
  func.func @transform_1(%arg0: i32) -> (i32, i32) {
    %c0_i32 = arith.constant 0 : i32
    %c0_i32_0 = arith.constant 0 : i32
    %c0_i32_1 = arith.constant 0 : i32
    return %c0_i32, %c0_i32_0 : i32, i32
  }
  func.func @transform_2(%arg0: i32) -> (i32, i32, i32) {
    %c0_i32 = arith.constant 0 : i32
    %c0_i32_0 = arith.constant 0 : i32
    %c0_i32_1 = arith.constant 0 : i32
    %c0_i32_2 = arith.constant 0 : i32
    return %c0_i32, %c0_i32_0, %c0_i32_1 : i32, i32, i32
  }
  func.func @transform_3(%arg0: i32) -> (i32, i32, i32, i32) {
    %c0_i32 = arith.constant 0 : i32
    %c0_i32_0 = arith.constant 0 : i32
    %c0_i32_1 = arith.constant 0 : i32
    %c0_i32_2 = arith.constant 0 : i32
    return %arg0, %c0_i32, %c0_i32_0, %c0_i32_1 : i32, i32, i32, i32
  }
  func.func @transform_4(%arg0: i32) -> (i32, i32, i32) {
    %c0_i32 = arith.constant 0 : i32
    %c0_i32_0 = arith.constant 0 : i32
    %c0_i32_1 = arith.constant 0 : i32
    return %arg0, %c0_i32, %c0_i32_0 : i32, i32, i32
  }
}

module attributes {stable_mosaic.version = 11 : i64} {
  func.func @_finalize_kernel(%arg0: i32, %arg1: memref<2x8x8x128xbf16, #tpu.memory_space<vmem>>, %arg2: memref<2x8x8x128xbf16, #tpu.memory_space<vmem>>, %arg3: memref<2x128xf32, #tpu.memory_space<vmem>>, %arg4: memref<2x128xf32, #tpu.memory_space<vmem>>, %arg5: memref<2x8x8x128xf32, #tpu.memory_space<vmem>>) attributes {dimension_semantics = [#tpu.dimension_semantics<parallel>], iteration_bounds = array<i64: 1>, scalar_prefetch = 0 : i64, scratch_operands = 0 : i64, tpu.core_type = #tpu.core_type<tc>, window_params = [{transform_indices = @transform_0, window_bounds = array<i64: 2, 8, 8, 128>}, {transform_indices = @transform_1, window_bounds = array<i64: 2, 8, 8, 128>}, {pipeline_mode = #tpu.pipeline_mode<synchronous>, transform_indices = @transform_2, window_bounds = array<i64: 2, 128>}, {pipeline_mode = #tpu.pipeline_mode<synchronous>, transform_indices = @transform_3, window_bounds = array<i64: 2, 128>}, {transform_indices = @transform_4, window_bounds = array<i64: 2, 8, 8, 128>}]} {
    %c0 = arith.constant 0 : index
    %c0_0 = arith.constant 0 : index
    %c0_1 = arith.constant 0 : index
    %c0_2 = arith.constant 0 : index
    %0 = vector.load %arg1[%c0, %c0_0, %c0_1, %c0_2] : memref<2x8x8x128xbf16, #tpu.memory_space<vmem>>, vector<2x8x8x128xbf16>
    %1 = vector.shape_cast %0 : vector<2x8x8x128xbf16> to vector<128x128xbf16>
    %2 = arith.extf %1 : vector<128x128xbf16> to vector<128x128xf32>
    %c0_3 = arith.constant 0 : index
    %c0_4 = arith.constant 0 : index
    %c0_5 = arith.constant 0 : index
    %c0_6 = arith.constant 0 : index
    %3 = vector.load %arg2[%c0_3, %c0_4, %c0_5, %c0_6] : memref<2x8x8x128xbf16, #tpu.memory_space<vmem>>, vector<2x8x8x128xbf16>
    %4 = vector.shape_cast %3 : vector<2x8x8x128xbf16> to vector<128x128xbf16>
    %5 = arith.extf %4 : vector<128x128xbf16> to vector<128x128xf32>
    %c0_7 = arith.constant 0 : index
    %c0_8 = arith.constant 0 : index
    %6 = vector.load %arg3[%c0_7, %c0_8] : memref<2x128xf32, #tpu.memory_space<vmem>>, vector<1x128xf32>
    %7 = vector.broadcast %6 : vector<1x128xf32> to vector<128x128xf32>
    %8 = arith.mulf %2, %7 : vector<128x128xf32>
    %c1 = arith.constant 1 : index
    %c0_9 = arith.constant 0 : index
    %9 = vector.load %arg3[%c1, %c0_9] : memref<2x128xf32, #tpu.memory_space<vmem>>, vector<1x128xf32>
    %10 = vector.broadcast %9 : vector<1x128xf32> to vector<128x128xf32>
    %11 = arith.addf %8, %10 : vector<128x128xf32>
    %c0_10 = arith.constant 0 : index
    %c0_11 = arith.constant 0 : index
    %12 = vector.load %arg4[%c0_10, %c0_11] : memref<2x128xf32, #tpu.memory_space<vmem>>, vector<1x128xf32>
    %13 = vector.broadcast %12 : vector<1x128xf32> to vector<128x128xf32>
    %14 = arith.mulf %5, %13 : vector<128x128xf32>
    %c1_12 = arith.constant 1 : index
    %c0_13 = arith.constant 0 : index
    %15 = vector.load %arg4[%c1_12, %c0_13] : memref<2x128xf32, #tpu.memory_space<vmem>>, vector<1x128xf32>
    %16 = vector.broadcast %15 : vector<1x128xf32> to vector<128x128xf32>
    %17 = arith.addf %14, %16 : vector<128x128xf32>
    %18 = arith.addf %11, %17 : vector<128x128xf32>
    %cst = arith.constant 0.000000e+00 : f32
    %19 = vector.broadcast %cst : f32 to vector<128x128xf32>
    %20 = arith.maximumf %18, %19 : vector<128x128xf32>
    %21 = vector.shape_cast %20 : vector<128x128xf32> to vector<2x8x8x128xf32>
    %c0_14 = arith.constant 0 : index
    %c0_15 = arith.constant 0 : index
    %c0_16 = arith.constant 0 : index
    %c0_17 = arith.constant 0 : index
    %22 = vector.load %arg5[%c0_14, %c0_15, %c0_16, %c0_17] : memref<2x8x8x128xf32, #tpu.memory_space<vmem>>, vector<2x8x8x128xf32>
    tpu.vector_store %arg5[%c0_14, %c0_15, %c0_16, %c0_17], %21 {strides = array<i32>} : memref<2x8x8x128xf32, #tpu.memory_space<vmem>>, vector<2x8x8x128xf32>,
    return
  }
  func.func @transform_0(%arg0: i32) -> (i32, i32, i32, i32) {
    %c0_i32 = arith.constant 0 : i32
    %c0_i32_0 = arith.constant 0 : i32
    %c0_i32_1 = arith.constant 0 : i32
    %c0_i32_2 = arith.constant 0 : i32
    return %arg0, %c0_i32, %c0_i32_0, %c0_i32_1 : i32, i32, i32, i32
  }
  func.func @transform_1(%arg0: i32) -> (i32, i32, i32, i32) {
    %c0_i32 = arith.constant 0 : i32
    %c0_i32_0 = arith.constant 0 : i32
    %c0_i32_1 = arith.constant 0 : i32
    %c0_i32_2 = arith.constant 0 : i32
    return %arg0, %c0_i32, %c0_i32_0, %c0_i32_1 : i32, i32, i32, i32
  }
  func.func @transform_2(%arg0: i32) -> (i32, i32) {
    %c0_i32 = arith.constant 0 : i32
    %c0_i32_0 = arith.constant 0 : i32
    %c0_i32_1 = arith.constant 0 : i32
    return %c0_i32, %c0_i32_0 : i32, i32
  }
  func.func @transform_3(%arg0: i32) -> (i32, i32) {
    %c0_i32 = arith.constant 0 : i32
    %c0_i32_0 = arith.constant 0 : i32
    %c0_i32_1 = arith.constant 0 : i32
    return %c0_i32, %c0_i32_0 : i32, i32
  }
  func.func @transform_4(%arg0: i32) -> (i32, i32, i32, i32) {
    %c0_i32 = arith.constant 0 : i32
    %c0_i32_0 = arith.constant 0 : i32
    %c0_i32_1 = arith.constant 0 : i32
    %c0_i32_2 = arith.constant 0 : i32
    return %arg0, %c0_i32, %c0_i32_0, %c0_i32_1 : i32, i32, i32, i32
  }
}

</mosaic_0001>

<bundles_post_ra>
// kernel: residual_block.5
= control target key start
LH: loop header
LB: loop body
LE: loop exit
PB: predicated region body
PF: predicated region fallthrough
CT: control target
= control target key end

     0   :  { %s504_s0 = inlined_call_operand.vmem [shape: bf16[2,8,8,128], index: 0, kind: input, shape index: {}]   ;;  %s505_s1 = inlined_call_operand.vmem [shape: bf16[2,8,8,128], index: 1, kind: input, shape index: {}]   ;;  %s506_s2 = inlined_call_operand.vmem [shape: f32[2,128], index: 2, kind: input, shape index: {}]   ;;  %s507_s3 = inlined_call_operand.vmem [shape: f32[2,128], index: 3, kind: input, shape index: {}]   ;;  %s508_s4 = inlined_call_operand.vmem [shape: f32[2,8,8,128], index: 4, kind: output, shape index: {}]  }
   0x1   :  { %v222_v0 = vld [vmem:[%s504_s0] sm:$0xff]   ;;  %v285_v10 = vld [vmem:[%s504_s0 + $0x8] sm:$0xff]   ;;  %v286_v20 = vld [vmem:[%s504_s0 + $0x10] sm:$0xff]  }
   0x2   :  { %v254_v1 = vld [vmem:[%s505_s1] sm:$0xff]   ;;  %v223_v3 = vunpack.c.l.bf16 %v222_v0  ;;  %v224_v7 = vunpack.c.h.bf16 %v222_v0  ;;  %v292_v11 = vld [vmem:[%s505_s1 + $0x8] sm:$0xff]   ;;  %v227_v16 = vunpack.c.l.bf16 %v285_v10  ;;  %v228_v18 = vunpack.c.h.bf16 %v285_v10  ;;  %v293_v21 = vld [vmem:[%s505_s1 + $0x10] sm:$0xff]  }
   0x3   :  { %v333_v2 = vld [vmem:[%s506_s2] ss:$0 sm:$0xff]  ;;  %v255_v4 = vunpack.c.l.bf16 %v254_v1  ;;  %v338_v5 = vld [vmem:[%s506_s2 + $0x1] ss:$0 sm:$0xff]  ;;  %v256_v8 = vunpack.c.h.bf16 %v254_v1  ;;  %v259_v17 = vunpack.c.l.bf16 %v292_v11  ;;  %v260_v19 = vunpack.c.h.bf16 %v292_v11  ;;  %v287_v38 = vld [vmem:[%s504_s0 + $0x18] sm:$0xff]  }
   0x4   :  { %v343_v6 = vld [vmem:[%s507_s3] ss:$0 sm:$0xff]  ;;  %v348_v9 = vld [vmem:[%s507_s3 + $0x1] ss:$0 sm:$0xff]  ;;  %v86_v12 = vmul.f32 %v223_v3, %v333_v2  ;;  %v87_v14 = vmul.f32 %v224_v7, %v333_v2  ;;  %v88_v26 = vmul.f32 %v227_v16, %v333_v2  ;;  %v89_v28 = vmul.f32 %v228_v18, %v333_v2  ;;  %v294_v39 = vld [vmem:[%s505_s1 + $0x18] sm:$0xff]  }
   0x5   :  { %v128_v13 = vmul.f32 %v255_v4, %v343_v6  ;;  %v129_v15 = vmul.f32 %v256_v8, %v343_v6  ;;  %v130_v27 = vmul.f32 %v259_v17, %v343_v6  ;;  %v131_v29 = vmul.f32 %v260_v19, %v343_v6  ;;  %v288_v52 = vld [vmem:[%s504_s0 + $0x20] sm:$0xff]   ;;  %v296_v19 = vld [vmem:[%s505_s1 + $0x28] sm:$0xff]  }
   0x6   :  { %v107_v22 = vadd.f32 %v338_v5, %v86_v12  ;;  %v108_v24 = vadd.f32 %v338_v5, %v87_v14  ;;  %v231_v32 = vunpack.c.l.bf16 %v286_v20  ;;  %v263_v33 = vunpack.c.l.bf16 %v293_v21  ;;  %v295_v61 = vld [vmem:[%s505_s1 + $0x20] sm:$0xff]   ;;  %v289_v14 = vld [vmem:[%s504_s0 + $0x28] sm:$0xff]  }
   0x7   :  { %v149_v23 = vadd.f32 %v348_v9, %v128_v13  ;;  %v150_v25 = vadd.f32 %v348_v9, %v129_v15  ;;  %v109_v34 = vadd.f32 %v338_v5, %v88_v26  ;;  %v151_v35 = vadd.f32 %v348_v9, %v130_v27 }
   0x8   :  { %v110_v36 = vadd.f32 %v338_v5, %v89_v28  ;;  %v152_v37 = vadd.f32 %v348_v9, %v131_v29  ;;  %v90_v42 = vmul.f32 %v231_v32, %v333_v2  ;;  %v132_v43 = vmul.f32 %v263_v33, %v343_v6  ;;  %v290_v32 = vld [vmem:[%s504_s0 + $0x30] sm:$0xff]  }
   0x9   :  { %v165_v30 = vadd.f32 %v149_v23, %v107_v22  ;;  %v166_v31 = vadd.f32 %v150_v25, %v108_v24  ;;  %v167_v44 = vadd.f32 %v151_v35, %v109_v34  ;;  %v232_v46 = vunpack.c.h.bf16 %v286_v20 }
   0xa   :  { %v168_v45 = vadd.f32 %v152_v37, %v110_v36  ;;  %v264_v47 = vunpack.c.h.bf16 %v293_v21  ;;  %v111_v48 = vadd.f32 %v338_v5, %v90_v42  ;;  %v153_v49 = vadd.f32 %v348_v9, %v132_v43  ;;  %v297_v37 = vld [vmem:[%s505_s1 + $0x30] sm:$0xff]  }
   0xb   :  { %v181_v40 = vmax.f32 %v165_v30, 0.0  ;;  %v182_v41 = vmax.f32 %v166_v31, 0.0  ;;  %v235_v50 = vunpack.c.l.bf16 %v287_v38  ;;  %v267_v51 = vunpack.c.l.bf16 %v294_v39 }
   0xc   :  { %v183_v53 = vmax.f32 %v167_v44, 0.0  ;;  %v184_v54 = vmax.f32 %v168_v45, 0.0  ;;  %v91_v55 = vmul.f32 %v232_v46, %v333_v2  ;;  %v133_v56 = vmul.f32 %v264_v47, %v343_v6  ;;  %v291_v46 = vld [vmem:[%s504_s0 + $0x38] sm:$0xff]  }
   0xd   :  { %197 = vst [vmem:[%s508_s4] sm:$0xff] %v181_v40  ;;  %198 = vst [vmem:[%s508_s4 + $0x8] sm:$0xff] %v182_v41  ;;  %v169_v57 = vadd.f32 %v153_v49, %v111_v48  ;;  %v92_v58 = vmul.f32 %v235_v50, %v333_v2  ;;  %v134_v59 = vmul.f32 %v267_v51, %v343_v6  ;;  %v236_v60 = vunpack.c.h.bf16 %v287_v38  ;;  %v298_v51 = vld [vmem:[%s505_s1 + $0x38] sm:$0xff]  }
   0xe   :  { %199 = vst [vmem:[%s508_s4 + $0x10] sm:$0xff] %v183_v53  ;;  %200 = vst [vmem:[%s508_s4 + $0x18] sm:$0xff] %v184_v54  ;;  %v112_v62 = vadd.f32 %v338_v5, %v91_v55  ;;  %v154_v63 = vadd.f32 %v348_v9, %v133_v56  ;;  %v268_v0 = vunpack.c.h.bf16 %v294_v39  ;;  %v239_v1 = vunpack.c.l.bf16 %v288_v52 }
   0xf   :  { %v185_v3 = vmax.f32 %v169_v57, 0.0  ;;  %v113_v4 = vadd.f32 %v338_v5, %v92_v58  ;;  %v155_v7 = vadd.f32 %v348_v9, %v134_v59  ;;  %v93_v8 = vmul.f32 %v236_v60, %v333_v2 }
  0x10   :  { %v170_v10 = vadd.f32 %v154_v63, %v112_v62  ;;  %v135_v11 = vmul.f32 %v268_v0, %v343_v6  ;;  %v271_v12 = vunpack.c.l.bf16 %v295_v61  ;;  %v94_v13 = vmul.f32 %v239_v1, %v333_v2 }
  0x11   :  { %201 = vst [vmem:[%s508_s4 + $0x20] sm:$0xff] %v185_v3  ;;  %v171_v15 = vadd.f32 %v155_v7, %v113_v4  ;;  %v114_v16 = vadd.f32 %v338_v5, %v93_v8  ;;  %v240_v17 = vunpack.c.h.bf16 %v288_v52  ;;  %v272_v18 = vunpack.c.h.bf16 %v295_v61 }
  0x12   :  { %v186_v20 = vmax.f32 %v170_v10, 0.0  ;;  %v156_v21 = vadd.f32 %v348_v9, %v135_v11  ;;  %v115_v22 = vadd.f32 %v338_v5, %v94_v13  ;;  %v136_v23 = vmul.f32 %v271_v12, %v343_v6 }
  0x13   :  { %v187_v24 = vmax.f32 %v171_v15, 0.0  ;;  %v95_v25 = vmul.f32 %v240_v17, %v333_v2  ;;  %v137_v26 = vmul.f32 %v272_v18, %v343_v6  ;;  %v243_v27 = vunpack.c.l.bf16 %v289_v14 }
  0x14   :  { %202 = vst [vmem:[%s508_s4 + $0x28] sm:$0xff] %v186_v20  ;;  %v172_v28 = vadd.f32 %v156_v21, %v114_v16  ;;  %v157_v29 = vadd.f32 %v348_v9, %v136_v23  ;;  %v275_v30 = vunpack.c.l.bf16 %v296_v19  ;;  %v244_v31 = vunpack.c.h.bf16 %v289_v14 }
  0x15   :  { %203 = vst [vmem:[%s508_s4 + $0x30] sm:$0xff] %v187_v24  ;;  %v116_v33 = vadd.f32 %v338_v5, %v95_v25  ;;  %v158_v34 = vadd.f32 %v348_v9, %v137_v26  ;;  %v96_v35 = vmul.f32 %v243_v27, %v333_v2  ;;  %v276_v36 = vunpack.c.h.bf16 %v296_v19 }
  0x16   :  { %v188_v38 = vmax.f32 %v172_v28, 0.0  ;;  %v173_v39 = vadd.f32 %v157_v29, %v115_v22  ;;  %v138_v40 = vmul.f32 %v275_v30, %v343_v6  ;;  %v97_v41 = vmul.f32 %v244_v31, %v333_v2 }
  0x17   :  { %v174_v42 = vadd.f32 %v158_v34, %v116_v33  ;;  %v117_v43 = vadd.f32 %v338_v5, %v96_v35  ;;  %v139_v44 = vmul.f32 %v276_v36, %v343_v6  ;;  %v247_v45 = vunpack.c.l.bf16 %v290_v32 }
  0x18   :  { %204 = vst [vmem:[%s508_s4 + $0x38] sm:$0xff] %v188_v38  ;;  %v189_v47 = vmax.f32 %v173_v39, 0.0  ;;  %v159_v48 = vadd.f32 %v348_v9, %v138_v40  ;;  %v118_v49 = vadd.f32 %v338_v5, %v97_v41  ;;  %v279_v50 = vunpack.c.l.bf16 %v297_v37 }
  0x19   :  { %v190_v52 = vmax.f32 %v174_v42, 0.0  ;;  %v160_v53 = vadd.f32 %v348_v9, %v139_v44  ;;  %v98_v54 = vmul.f32 %v247_v45, %v333_v2  ;;  %v248_v55 = vunpack.c.h.bf16 %v290_v32 }
  0x1a   :  { %205 = vst [vmem:[%s508_s4 + $0x40] sm:$0xff] %v189_v47  ;;  %v175_v56 = vadd.f32 %v159_v48, %v117_v43  ;;  %v140_v57 = vmul.f32 %v279_v50, %v343_v6  ;;  %v280_v58 = vunpack.c.h.bf16 %v297_v37  ;;  %v251_v59 = vunpack.c.l.bf16 %v291_v46 }
  0x1b   :  { %206 = vst [vmem:[%s508_s4 + $0x48] sm:$0xff] %v190_v52  ;;  %v176_v60 = vadd.f32 %v160_v53, %v118_v49  ;;  %v119_v61 = vadd.f32 %v338_v5, %v98_v54  ;;  %v99_v62 = vmul.f32 %v248_v55, %v333_v2  ;;  %v283_v63 = vunpack.c.l.bf16 %v298_v51 }
  0x1c   :  { %v191_v0 = vmax.f32 %v175_v56, 0.0  ;;  %v161_v1 = vadd.f32 %v348_v9, %v140_v57  ;;  %v141_v3 = vmul.f32 %v280_v58, %v343_v6  ;;  %v100_v4 = vmul.f32 %v251_v59, %v333_v2 }
  0x1d   :  { %v192_v7 = vmax.f32 %v176_v60, 0.0  ;;  %v120_v8 = vadd.f32 %v338_v5, %v99_v62  ;;  %v142_v10 = vmul.f32 %v283_v63, %v343_v6  ;;  %v252_v11 = vunpack.c.h.bf16 %v291_v46 }
  0x1e   :  { %207 = vst [vmem:[%s508_s4 + $0x50] sm:$0xff] %v191_v0  ;;  %v177_v12 = vadd.f32 %v161_v1, %v119_v61  ;;  %v162_v13 = vadd.f32 %v348_v9, %v141_v3  ;;  %v121_v14 = vadd.f32 %v338_v5, %v100_v4  ;;  %v284_v15 = vunpack.c.h.bf16 %v298_v51 }
  0x1f   :  { %208 = vst [vmem:[%s508_s4 + $0x58] sm:$0xff] %v192_v7  ;;  %v163_v16 = vadd.f32 %v348_v9, %v142_v10  ;;  %v101_v17 = vmul.f32 %v252_v11, %v333_v2 }
  0x20   :  { %v193_v18 = vmax.f32 %v177_v12, 0.0  ;;  %v178_v19 = vadd.f32 %v162_v13, %v120_v8  ;;  %v143_v20 = vmul.f32 %v284_v15, %v343_v6 }
  0x21   :  { %v179_v21 = vadd.f32 %v163_v16, %v121_v14  ;;  %v122_v22 = vadd.f32 %v338_v5, %v101_v17 }
  0x22   :  { %209 = vst [vmem:[%s508_s4 + $0x60] sm:$0xff] %v193_v18  ;;  %v194_v23 = vmax.f32 %v178_v19, 0.0  ;;  %v164_v24 = vadd.f32 %v348_v9, %v143_v20 }
  0x23   :  { %v195_v25 = vmax.f32 %v179_v21, 0.0 }
  0x24   :  { %210 = vst [vmem:[%s508_s4 + $0x68] sm:$0xff] %v194_v23  ;;  %v180_v2 = vadd.f32 %v164_v24, %v122_v22 }
  0x25   :  { %211 = vst [vmem:[%s508_s4 + $0x70] sm:$0xff] %v195_v25 }
  0x26   :  { %v196_v6 = vmax.f32 %v180_v2, 0.0 }
  0x28   :  { %212 = vst [vmem:[%s508_s4 + $0x78] sm:$0xff] %v196_v6 }

// kernel: residual_block.3
= control target key start
LH: loop header
LB: loop body
LE: loop exit
PB: predicated region body
PF: predicated region fallthrough
CT: control target
= control target key end

     0   :  { %s2306_s24 = smov 4   ;;  %vm67_vm0 = vsmask.f32 3328  ;;  %vm68_vm1 = vsmask.f32 7440  ;;  %s2307_s27 = smov 12   ;;  %s3296_s0 = inlined_call_operand.vmem [shape: bf16[2,36,9,4], index: 0, kind: input, shape index: {}]   ;;  %s3297_s1 = inlined_call_operand.vmem [shape: bf16[36,128], index: 1, kind: input, shape index: {}]   ;;  %s3298_s2 = inlined_call_operand.vmem [shape: bf16[4,128], index: 2, kind: input, shape index: {}]   ;;  %s3299_s4 = inlined_call_operand.vmem [shape: bf16[2,8,8,128], index: 4, kind: output, shape index: {1}]   ;;  %s3300_s3 = inlined_call_operand.vmem [shape: bf16[2,8,8,128], index: 3, kind: output, shape index: {0}]   ;;  %s3301_s5 = inlined_call_operand.vmem [shape: f32[1,4,128], index: 5, kind: output, shape index: {2}]  }
   0x1   :  { %v2254_v0 = vld [vmem:[%s3296_s0 + $0x48] ss:$8 sps:$4 sm:$0xff]   ;;  %v1905_v1 = vld [vmem:[%s3296_s0 + $0xa0] sm:$0xf]  ;;  %v1904_v16 = vld [vmem:[%s3296_s0 + $0x98] sm:$0xf] }
   0x2   :  { %v1906_v2 = vld [vmem:[%s3296_s0 + $0xa8] sm:$0xf]  ;;  %922 = vrot.lane.b32.xlu0 %v2254_v0, %s2306_s24  ;;  %v373_v6 = vshrl.u32 %v1905_v1, 16  ;;  %v376_v7 = vshll.u32 %v1905_v1, 16  ;;  %v2256_v8 = vld [vmem:[%s3296_s0 + $0x58] ss:$8 sps:$4 sm:$0xff]   ;;  %vm2421_vm2 = vmor %vm67_vm0, %vm68_vm1 }
   0x3   :  { %v387_v3 = vshrl.u32 %v1906_v2, 16  ;;  %v390_v4 = vshll.u32 %v1906_v2, 16  ;;  %v2024_v5 = vcombine.low %v1905_v1, %v1906_v2  ;;  %v2257_v13 = vld [vmem:[%s3296_s0 + $0xe8] ss:$8 sps:$4 sm:$0xff]   ;;  %v2371_v19 = vld [vmem:[%s3296_s0] sm:$0xf] }
   0x4   :  { %v375_v11 = vrot.slane %v373_v6, 4  ;;  %v378_v12 = vrot.slane %v376_v7, 5  ;;  %v1903_v14 = vld [vmem:[%s3296_s0 + $0x90] sm:$0xf]  ;;  %v359_v21 = vshrl.u32 %v1904_v16, 16  ;;  %v362_v22 = vshll.u32 %v1904_v16, 16 }
   0x5   :  { %v389_v9 = vrot.slane %v387_v3, 4  ;;  %v392_v10 = vrot.slane %v390_v4, 5  ;;  %1020 = vrot.lane.b32.xlu1 %v2024_v5, %s2307_s27  ;;  %v345_v17 = vshrl.u32 %v1903_v14, 16  ;;  %v348_v18 = vshll.u32 %v1903_v14, 16  ;;  %v2376_v24 = vld [vmem:[%s3296_s0 + $0x8] sm:$0xf] }
   0x6   :  { %924 = vrot.lane.b32.xlu0 %v2256_v8, %s2306_s24  ;;  %v379_v20 = vor.u32 %v378_v12, %v375_v11  ;;  %v2023_v23 = vcombine.low %v1903_v14, %v1904_v16  ;;  %v51_v25 = vld [vmem:[%s3296_s0 + $0x4] sm:$0x1]  ;;  %s2308_s15 = smov 16   ;;  %v52_v29 = vld [vmem:[%s3296_s0 + $0xc] sm:$0x1]  ;;  %v71_v30 = vshrl.u32 %v2371_v19, 16  ;;  %v1999_v55 = vcombine.low %v2371_v19, %v2376_v24 }
   0x7   :  { %v393_v15 = vor.u32 %v392_v10, %v389_v9  ;;  %v347_v27 = vrot.slane %v345_v17, 4  ;;  %v350_v28 = vrot.slane %v348_v18, 5  ;;  %v361_v32 = vrot.slane %v359_v21, 4  ;;  %v2397_v41 = vld [vmem:[%s3296_s0 + $0xd8] ss:$8 sps:$4 sm:$0xff]   ;;  %s2309_s18 = smov 8  }
   0x8   :  { %v2388_v31 = vrot.slane %v379_v20, 4  ;;  %v364_v33 = vrot.slane %v362_v22, 5  ;;  %v74_v34 = vshll.u32 %v2371_v19, 16  ;;  %v73_v35 = vrot.slane %v71_v30, 4  ;;  %v2402_v42 = vld [vmem:[%s3296_s0 + $0x10] sm:$0xf] }
   0x9   :  { %v2381_v26 = vrot.slane %v393_v15, 4  ;;  %1076 = vrot.lane.b32.xlu1 %v2257_v13, %s2308_s15  ;;  %v80_v36 = vshll.u32 %v51_v25, 16  ;;  %v85_v37 = vshrl.u32 %v2376_v24, 16  ;;  %v88_v38 = vshll.u32 %v2376_v24, 16  ;;  %v2407_v48 = vld [vmem:[%s3296_s0 + $0x18] sm:$0xf] }
   0xa   :  { %1018 = vrot.lane.b32.xlu0 %v2023_v23, %s2307_s27  ;;  %v76_v39 = vrot.slane %v74_v34, 5  ;;  %v94_v40 = vshll.u32 %v52_v29, 16  ;;  %v351_v43 = vor.u32 %v350_v28, %v347_v27  ;;  %v365_v44 = vor.u32 %v364_v33, %v361_v32  ;;  %v53_v52 = vld [vmem:[%s3296_s0 + $0x14] sm:$0x1]  ;;  %v54_v53 = vld [vmem:[%s3296_s0 + $0x1c] sm:$0x1] }
   0xb   :  { %v82_v45 = vrot.slane %v80_v36, 5  ;;  %v87_v46 = vrot.slane %v85_v37, 4  ;;  %v90_v47 = vrot.slane %v88_v38, 5  ;;  %v99_v49 = vshrl.u32 %v2402_v42, 16  ;;  %v1935_v61 = vld [vmem:[%s3296_s0 + $0x94] sm:$0x1] }
   0xc   :  { %v77_v50 = vor.u32 %v76_v39, %v73_v35  ;;  %v96_v51 = vrot.slane %v94_v40, 5  ;;  %v102_v54 = vshll.u32 %v2402_v42, 16  ;;  %v108_v59 = vshll.u32 %v53_v52, 16  ;;  %v1936_v2 = vld [vmem:[%s3296_s0 + $0x9c] sm:$0x1]  ;;  %v2296_v35 = vld [vmem:[%s3297_s1] sm:$0xff]  }
   0xd   :  { %v91_v57 = vor.u32 %v90_v47, %v87_v46  ;;  %v101_v58 = vrot.slane %v99_v49, 4  ;;  %v113_v60 = vshrl.u32 %v2407_v48, 16  ;;  %v116_v0 = vshll.u32 %v2407_v48, 16  ;;  %v1937_v7 = vld [vmem:[%s3296_s0 + $0xa4] sm:$0x1]  ;;  %2204 = vmatprep.subr.bf16.mxu0 %v2296_v35  ;;  %v2297_v49 = vld [vmem:[%s3297_s1 + $0x8] sm:$0xff]  }
   0xe   :  { %1074 = vrot.lane.b32.xlu0 %v2397_v41, %s2308_s15  ;;  %v78_v62 = vrot.slane %v77_v50, 4  ;;  %v104_v63 = vrot.slane %v102_v54, 5  ;;  %v122_v1 = vshll.u32 %v54_v53, 16  ;;  %v110_v4 = vrot.slane %v108_v59, 5  ;;  %v1938_v12 = vld [vmem:[%s3296_s0 + $0xac] sm:$0x1]  ;;  %2205 = vmatpush3.bf16.msra.mxu0 %v2296_v35 }
   0xf   :  { %v92_v3 = vrot.slane %v91_v57, 4  ;;  %v115_v5 = vrot.slane %v113_v60, 4  ;;  %v352_v6 = vrot.slane %v351_v43, 4  ;;  %v118_v10 = vrot.slane %v116_v0, 5  ;;  %v2446_v13 = vld [vmem:[%s3296_s0 + $0x8] sm:$0xf]  ;;  %2206 = vmatprep.subr.bf16.mxu0 %v2297_v49 }
  0x10   :  { %v83_v8 = vsel %vm2421_vm2, %v78_v62, %v82_v45  ;;  %v105_v9 = vor.u32 %v104_v63, %v101_v58  ;;  %v124_v11 = vrot.slane %v122_v1, 5  ;;  %v354_v15 = vshll.u32 %v1935_v61, 16  ;;  %v1952_v23 = vld [vmem:[%s3296_s0 + $0x10] sm:$0xf]  ;;  %v2468_v40 = vld [vmem:[%s3296_s0 + $0x18] sm:$0xf] }
  0x11   :  { %v97_v14 = vsel %vm2421_vm2, %v92_v3, %v96_v51  ;;  %v366_v16 = vrot.slane %v365_v44, 4  ;;  %v368_v17 = vshll.u32 %v1936_v2, 16  ;;  %v119_v21 = vor.u32 %v118_v10, %v115_v5  ;;  %v2478_v47 = vld [vmem:[%s3296_s0 + $0x20] sm:$0xf]  ;;  %s2310_s6 = smov 20   ;;  %s2311_s16 = smov 24  }
  0x12   :  { %v2015_v18 = vcombine.low %v83_v8, %v97_v14  ;;  %v106_v20 = vrot.slane %v105_v9, 4  ;;  %v382_v22 = vshll.u32 %v1937_v7, 16  ;;  %v356_v25 = vrot.slane %v354_v15, 5  ;;  %v1984_v63 = vld [vmem:[%s3296_s0 + $0x14] sm:$0x1]  ;;  %2207 = vmatpush3.bf16.msra.mxu0 %v2297_v49  ;;  %s2312_s25 = smov 28  }
  0x13   :  { %v370_v27 = vrot.slane %v368_v17, 5  ;;  %v396_v28 = vshll.u32 %v1938_v12, 16  ;;  %v619_v29 = vshrl.u32 %v2446_v13, 16  ;;  %v120_v32 = vrot.slane %v119_v21, 4  ;;  %v2262_v3 = vld [vmem:[%s3296_s0 + $0x50] ss:$8 sps:$4 sm:$0xff]  }
  0x14   :  { %962 = vrot.lane.b32.xlu1 %v2015_v18, %s2309_s18  ;;  %v111_v30 = vsel %vm2421_vm2, %v106_v20, %v110_v4  ;;  %v384_v33 = vrot.slane %v382_v22, 5  ;;  %v622_v34 = vshll.u32 %v2446_v13, 16  ;;  %v357_v36 = vsel %vm2421_vm2, %v352_v6, %v356_v25  ;;  %v1985_v5 = vld [vmem:[%s3296_s0 + $0x1c] sm:$0x1]  ;;  %v1986_v6 = vld [vmem:[%s3296_s0 + $0x24] sm:$0x1] }
  0x15   :  { %v371_v37 = vsel %vm2421_vm2, %v366_v16, %v370_v27  ;;  %v398_v38 = vrot.slane %v396_v28, 5  ;;  %v621_v39 = vrot.slane %v619_v29, 4  ;;  %v125_v43 = vsel %vm2421_vm2, %v120_v32, %v124_v11  ;;  %v2522_v29 = vld [vmem:[%s3296_s0 + $0x28] sm:$0xf]  ;;  %v56_v35 = vld [vmem:[%s3296_s0 + $0x2c] sm:$0x1] }
  0x16   :  { %v2039_v44 = vcombine.low %v357_v36, %v371_v37  ;;  %v385_v45 = vsel %vm2421_vm2, %v2388_v31, %v384_v33  ;;  %v624_v46 = vrot.slane %v622_v34, 5  ;;  %v2016_v50 = vcombine.low %v111_v30, %v125_v43  ;;  %v1983_v31 = vld [vmem:[%s3296_s0 + $0xc] sm:$0x1]  ;;  %v55_v30 = vld [vmem:[%s3296_s0 + $0x24] sm:$0x1]  ;;  %s2313_s17 = smov 32  }
  0x17   :  { %v399_v51 = vsel %vm2421_vm2, %v2381_v26, %v398_v38  ;;  %v633_v52 = vshrl.u32 %v1952_v23, 16  ;;  %v636_v53 = vshll.u32 %v1952_v23, 16  ;;  %v2047_v57 = vcombine.low %v2446_v13, %v1952_v23  ;;  %v2515_v23 = vld [vmem:[%s3296_s0 + $0x20] sm:$0xf] }
  0x18   :  { %1114 = vrot.lane.b32.xlu0 %v2039_v44, %s2310_s6  ;;  %v2040_v54 = vcombine.low %v385_v45, %v399_v51  ;;  %v647_v58 = vshrl.u32 %v2468_v40, 16  ;;  %v650_v59 = vshll.u32 %v2468_v40, 16  ;;  %964 = vrot.lane.b32.xlu1 %v2016_v50, %s2309_s18  ;;  %v661_v61 = vshrl.u32 %v2478_v47, 16  ;;  %v2263_v38 = vld [vmem:[%s3296_s0 + $0x60] ss:$8 sps:$4 sm:$0xff]  }
  0x19   :  { %v635_v26 = vrot.slane %v633_v52, 4  ;;  %v638_v60 = vrot.slane %v636_v53, 5  ;;  %v664_v62 = vshll.u32 %v2478_v47, 16  ;;  %v2048_v2 = vcombine.low %v2468_v40, %v2478_v47  ;;  %v57_v45 = vld [vmem:[%s3296_s0 + $0x34] sm:$0x1] }
  0x1a   :  { %v649_v0 = vrot.slane %v647_v58, 4  ;;  %v652_v1 = vrot.slane %v650_v59, 5  ;;  %v625_v4 = vor.u32 %v624_v46, %v621_v39  ;;  %v663_v7 = vrot.slane %v661_v61, 4  ;;  %v2560_v51 = vld [vmem:[%s3296_s0 + $0x38] sm:$0xf] }
  0x1b   :  { %v666_v8 = vrot.slane %v664_v62, 5  ;;  %v628_v9 = vshll.u32 %v1983_v31, 16  ;;  %v639_v10 = vor.u32 %v638_v60, %v635_v26  ;;  %v642_v12 = vshll.u32 %v1984_v63, 16  ;;  %v2571_v61 = vld [vmem:[%s3296_s0 + $0xb0] sm:$0xf] }
  0x1c   :  { %1170 = vrot.lane.b32.xlu0 %v2047_v57, %s2311_s16  ;;  %v626_v11 = vrot.slane %v625_v4, 4  ;;  %v653_v13 = vor.u32 %v652_v1, %v649_v0  ;;  %v656_v14 = vshll.u32 %v1985_v5, 16  ;;  %1116 = vrot.lane.b32.xlu1 %v2040_v54, %s2310_s6  ;;  %v670_v18 = vshll.u32 %v1986_v6, 16  ;;  %v58_v54 = vld [vmem:[%s3296_s0 + $0x3c] sm:$0x1] }
  0x1d   :  { %v630_v15 = vrot.slane %v628_v9, 5  ;;  %v640_v16 = vrot.slane %v639_v10, 4  ;;  %v667_v17 = vor.u32 %v666_v8, %v663_v7  ;;  %v644_v20 = vrot.slane %v642_v12, 5  ;;  %v2264_v62 = vld [vmem:[%s3296_s0 + $0x68] ss:$8 sps:$4 sm:$0xff]  }
  0x1e   :  { %v654_v21 = vrot.slane %v653_v13, 4  ;;  %v658_v22 = vrot.slane %v656_v14, 5  ;;  %vm1282_vm3 = vcmask 31744   ;;  %v672_v28 = vrot.slane %v670_v18, 5  ;;  %v1908_v7 = vld [vmem:[%s3296_s0 + $0xb8] sm:$0xf] }
  0x1f   :  { %v631_v25 = vsel %vm2421_vm2, %v626_v11, %v630_v15  ;;  %v668_v27 = vrot.slane %v667_v17, 4  ;;  %v2000_v32 = vcombine.low %v2402_v42, %v2407_v48  ;;  %2228 = vmatprep.mubr.msk.bf16.mxu1 %vm1282_vm3, %v2397_v41  ;;  %v645_v33 = vsel %vm2421_vm2, %v640_v16, %v644_v20  ;;  %v2544_v41 = vld [vmem:[%s3296_s0 + $0x30] sm:$0xf]  ;;  %v2265_v8 = vld [vmem:[%s3296_s0 + $0x78] ss:$8 sps:$4 sm:$0xff]  }
  0x20   :  { %1226 = vrot.lane.b32.xlu0 %v2262_v3, %s2312_s25  ;;  %v659_v34 = vsel %vm2421_vm2, %v654_v21, %v658_v22  ;;  %v127_v36 = vshrl.u32 %v2515_v23, 16  ;;  %v130_v37 = vshll.u32 %v2515_v23, 16  ;;  %1172 = vrot.lane.b32.xlu1 %v2048_v2, %s2311_s16  ;;  %v2063_v39 = vcombine.low %v631_v25, %v645_v33  ;;  %v2589_v13 = vld [vmem:[%s3296_s0 + $0xc0] sm:$0xf]  ;;  %v2598_v18 = vld [vmem:[%s3296_s0 + $0xc8] sm:$0xf] }
  0x21   :  { %v673_v40 = vsel %vm2421_vm2, %v668_v27, %v672_v28  ;;  %v136_v43 = vshll.u32 %v55_v30, 16  ;;  %v141_v44 = vshrl.u32 %v2522_v29, 16  ;;  %v144_v50 = vshll.u32 %v2522_v29, 16 }
  0x22   :  { %v2064_v46 = vcombine.low %v659_v34, %v673_v40  ;;  %v129_v47 = vrot.slane %v127_v36, 4  ;;  %v132_v49 = vrot.slane %v130_v37, 5  ;;  %v150_v31 = vshll.u32 %v56_v35, 16 }
  0x23   :  { %v138_v52 = vrot.slane %v136_v43, 5  ;;  %v143_v53 = vrot.slane %v141_v44, 4  ;;  %v155_v57 = vshrl.u32 %v2544_v41, 16  ;;  %v146_v59 = vrot.slane %v144_v50, 5  ;;  %v1939_v44 = vld [vmem:[%s3296_s0 + $0xb4] sm:$0x1] }
  0x24   :  { %1266 = vrot.lane.b32.xlu0 %v2063_v39, %s2313_s17  ;;  %v133_v58 = vor.u32 %v132_v49, %v129_v47  ;;  %v158_v26 = vshll.u32 %v2544_v41, 16  ;;  %v164_v60 = vshll.u32 %v57_v45, 16  ;;  %1228 = vrot.lane.b32.xlu1 %v2263_v38, %s2312_s25  ;;  %v152_v63 = vrot.slane %v150_v31, 5  ;;  %v1940_v50 = vld [vmem:[%s3296_s0 + $0xbc] sm:$0x1] }
  0x25   :  { %v157_v0 = vrot.slane %v155_v57, 4  ;;  %v169_v1 = vshrl.u32 %v2560_v51, 16  ;;  %v172_v2 = vshll.u32 %v2560_v51, 16  ;;  %v147_v4 = vor.u32 %v146_v59, %v143_v53 }
  0x26   :  { %v134_v3 = vrot.slane %v133_v58, 4  ;;  %v160_v5 = vrot.slane %v158_v26, 5  ;;  %v166_v6 = vrot.slane %v164_v60, 5  ;;  %v178_v11 = vshll.u32 %v58_v54, 16  ;;  %v1942_v58 = vld [vmem:[%s3296_s0 + $0xcc] sm:$0x1] }
  0x27   :  { %v171_v9 = vrot.slane %v169_v1, 4  ;;  %v174_v10 = vrot.slane %v172_v2, 5  ;;  %v401_v12 = vshrl.u32 %v2571_v61, 16  ;;  %v148_v15 = vrot.slane %v147_v4, 4  ;;  %v2631_v60 = vld [vmem:[%s3296_s0 + $0xf8] ss:$8 sps:$4 sm:$0xff]  }
  0x28   :  { %1268 = vrot.lane.b32.xlu0 %v2064_v46, %s2313_s17  ;;  %v139_v14 = vsel %vm2421_vm2, %v134_v3, %v138_v52  ;;  %v161_v16 = vor.u32 %v160_v5, %v157_v0  ;;  %v404_v17 = vshll.u32 %v2571_v61, 16  ;;  %926 = vrot.lane.b32.xlu1 %v2264_v62, %s2306_s24  ;;  %v180_v21 = vrot.slane %v178_v11, 5  ;;  %v1941_v52 = vld [vmem:[%s3296_s0 + $0xc4] sm:$0x1]  ;;  %v2641_v4 = vld [vmem:[%s3296_s0 + $0x30] sm:$0xf] }
  0x29   :  { %v175_v20 = vor.u32 %v174_v10, %v171_v9  ;;  %v403_v22 = vrot.slane %v401_v12, 4  ;;  %v415_v25 = vshrl.u32 %v1908_v7, 16  ;;  %v153_v27 = vsel %vm2421_vm2, %v148_v15, %v152_v63  ;;  %v2636_v63 = vld [vmem:[%s3296_s0 + $0x28] sm:$0xf]  ;;  %v2648_v9 = vld [vmem:[%s3296_s0 + $0x38] sm:$0xf] }
  0x2a   :  { %v162_v28 = vrot.slane %v161_v16, 4  ;;  %v406_v30 = vrot.slane %v404_v17, 5  ;;  %v418_v33 = vshll.u32 %v1908_v7, 16  ;;  %v2017_v34 = vcombine.low %v139_v14, %v153_v27  ;;  %v2670_v27 = vld [vmem:[%s3296_s0 + $0x108] ss:$8 sps:$4 sm:$0xff]  }
  0x2b   :  { %v176_v35 = vrot.slane %v175_v20, 4  ;;  %v417_v36 = vrot.slane %v415_v25, 4  ;;  %v2025_v37 = vcombine.low %v2571_v61, %v1908_v7  ;;  %v429_v40 = vshrl.u32 %v2589_v13, 16 }
  0x2c   :  { %v167_v38 = vsel %vm2421_vm2, %v162_v28, %v166_v6  ;;  %v420_v39 = vrot.slane %v418_v33, 5  ;;  %v432_v43 = vshll.u32 %v2589_v13, 16  ;;  %928 = vrot.lane.b32.xlu1 %v2265_v8, %s2306_s24  ;;  %966 = vrot.lane.b32.xlu0 %v2017_v34, %s2309_s18  ;;  %v443_v46 = vshrl.u32 %v2598_v18, 16 }
  0x2d   :  { %v181_v45 = vsel %vm2421_vm2, %v176_v35, %v180_v21  ;;  %v446_v47 = vshll.u32 %v2598_v18, 16  ;;  %v2026_v49 = vcombine.low %v2589_v13, %v2598_v18  ;;  %v431_v31 = vrot.slane %v429_v40, 4  ;;  %v2657_v18 = vld [vmem:[%s3296_s0 + $0x40] sm:$0xf]  ;;  %v1987_v35 = vld [vmem:[%s3296_s0 + $0x2c] sm:$0x1] }
  0x2e   :  { %v2018_v53 = vcombine.low %v167_v38, %v181_v45  ;;  %v434_v54 = vrot.slane %v432_v43, 5  ;;  %v407_v57 = vor.u32 %v406_v30, %v403_v22  ;;  %v445_v59 = vrot.slane %v443_v46, 4  ;;  %v1988_v40 = vld [vmem:[%s3296_s0 + $0x34] sm:$0x1] }
  0x2f   :  { %v448_v26 = vrot.slane %v446_v47, 5  ;;  %v410_v61 = vshll.u32 %v1939_v44, 16  ;;  %v421_v62 = vor.u32 %v420_v39, %v417_v36  ;;  %v424_v1 = vshll.u32 %v1940_v50, 16 }
  0x30   :  { %v408_v0 = vrot.slane %v407_v57, 4  ;;  %v435_v2 = vor.u32 %v434_v54, %v431_v31  ;;  %v438_v3 = vshll.u32 %v1941_v52, 16  ;;  %968 = vrot.lane.b32.xlu1 %v2018_v53, %s2309_s18  ;;  %1022 = vrot.lane.b32.xlu0 %v2025_v37, %s2307_s27  ;;  %v452_v8 = vshll.u32 %v1942_v58, 16  ;;  %v1989_v53 = vld [vmem:[%s3296_s0 + $0x3c] sm:$0x1] }
  0x31   :  { %v412_v5 = vrot.slane %v410_v61, 5  ;;  %v422_v6 = vrot.slane %v421_v62, 4  ;;  %v449_v7 = vor.u32 %v448_v26, %v445_v59  ;;  %v426_v10 = vrot.slane %v424_v1, 5  ;;  %v1990_v59 = vld [vmem:[%s3296_s0 + $0x44] sm:$0x1] }
  0x32   :  { %v436_v11 = vrot.slane %v435_v2, 4  ;;  %v440_v12 = vrot.slane %v438_v3, 5  ;;  %v675_v13 = vshrl.u32 %v2636_v63, 16  ;;  %v454_v16 = vrot.slane %v452_v8, 5  ;;  %v2706_v8 = vld [vmem:[%s3296_s0 + $0x120] sm:$0xf] }
  0x33   :  { %v413_v14 = vsel %vm2421_vm2, %v408_v0, %v412_v5  ;;  %v450_v15 = vrot.slane %v449_v7, 4  ;;  %v678_v17 = vshll.u32 %v2636_v63, 16  ;;  %v427_v20 = vsel %vm2421_vm2, %v422_v6, %v426_v10  ;;  %v2272_v0 = vld [vmem:[%s3296_s0 + $0x70] ss:$8 sps:$4 sm:$0xff]  }
  0x34   :  { %v441_v21 = vsel %vm2421_vm2, %v436_v11, %v440_v12  ;;  %v677_v22 = vrot.slane %v675_v13, 4  ;;  %v689_v25 = vshrl.u32 %v2641_v4, 16  ;;  %1024 = vrot.lane.b32.xlu1 %v2026_v49, %s2307_s27  ;;  %1078 = vrot.lane.b32.xlu0 %v2631_v60, %s2308_s15  ;;  %v2041_v28 = vcombine.low %v413_v14, %v427_v20  ;;  %v59_v14 = vld [vmem:[%s3296_s0 + $0x124] sm:$0x1] }
  0x35   :  { %v455_v30 = vsel %vm2421_vm2, %v450_v15, %v454_v16  ;;  %v680_v33 = vrot.slane %v678_v17, 5  ;;  %v692_v34 = vshll.u32 %v2641_v4, 16  ;;  %v2049_v38 = vcombine.low %v2636_v63, %v2641_v4  ;;  %v60_v17 = vld [vmem:[%s3296_s0 + $0x12c] sm:$0x1] }
  0x36   :  { %v2042_v36 = vcombine.low %v441_v21, %v455_v30  ;;  %v691_v37 = vrot.slane %v689_v25, 4  ;;  %v703_v39 = vshrl.u32 %v2648_v9, 16  ;;  %v706_v44 = vshll.u32 %v2648_v9, 16 }
  0x37   :  { %v694_v43 = vrot.slane %v692_v34, 5  ;;  %v717_v45 = vshrl.u32 %v2657_v18, 16  ;;  %v720_v46 = vshll.u32 %v2657_v18, 16  ;;  %v2050_v49 = vcombine.low %v2648_v9, %v2657_v18  ;;  %v2711_v9 = vld [vmem:[%s3296_s0 + $0x128] sm:$0xf] }
  0x38   :  { %v705_v47 = vrot.slane %v703_v39, 4  ;;  %v681_v50 = vor.u32 %v680_v33, %v677_v22  ;;  %v684_v52 = vshll.u32 %v1987_v35, 16  ;;  %1080 = vrot.lane.b32.xlu1 %v2670_v27, %s2308_s15  ;;  %1118 = vrot.lane.b32.xlu0 %v2041_v28, %s2310_s6  ;;  %v708_v31 = vrot.slane %v706_v44, 5  ;;  %v2273_v22 = vld [vmem:[%s3296_s0 + $0x80] ss:$8 sps:$4 sm:$0xff]  }
  0x39   :  { %v719_v54 = vrot.slane %v717_v45, 4  ;;  %v722_v57 = vrot.slane %v720_v46, 5  ;;  %v695_v58 = vor.u32 %v694_v43, %v691_v37  ;;  %v698_v62 = vshll.u32 %v1988_v40, 16  ;;  %v2738_v34 = vld [vmem:[%s3296_s0 + $0x130] sm:$0xf] }
  0x3a   :  { %v682_v26 = vrot.slane %v681_v50, 4  ;;  %v686_v61 = vrot.slane %v684_v52, 5  ;;  %v712_v63 = vshll.u32 %v1989_v53, 16  ;;  %v709_v2 = vor.u32 %v708_v31, %v705_v47  ;;  %v2743_v35 = vld [vmem:[%s3296_s0 + $0x138] sm:$0xf] }
  0x3b   :  { %v696_v1 = vrot.slane %v695_v58, 4  ;;  %v723_v3 = vor.u32 %v722_v57, %v719_v54  ;;  %v726_v4 = vshll.u32 %v1990_v59, 16  ;;  %v700_v6 = vrot.slane %v698_v62, 5  ;;  %v61_v40 = vld [vmem:[%s3296_s0 + $0x134] sm:$0x1] }
  0x3c   :  { %v687_v5 = vsel %vm2421_vm2, %v682_v26, %v686_v61  ;;  %v714_v7 = vrot.slane %v712_v63, 5  ;;  %v2001_v10 = vcombine.low %v2515_v23, %v2522_v29  ;;  %1120 = vrot.lane.b32.xlu1 %v2042_v36, %s2310_s6  ;;  %1174 = vrot.lane.b32.xlu0 %v2049_v38, %s2311_s16  ;;  %v710_v11 = vrot.slane %v709_v2, 4  ;;  %v62_v45 = vld [vmem:[%s3296_s0 + $0x13c] sm:$0x1]  ;;  %v2766_v26 = vld [vmem:[%s3296_s0 + $0x1b8] sm:$0xf] }
  0x3d   :  { %v724_v12 = vrot.slane %v723_v3, 4  ;;  %v728_v13 = vrot.slane %v726_v4, 5  ;;  %v183_v15 = vshrl.u32 %v2706_v8, 16  ;;  %v701_v16 = vsel %vm2421_vm2, %v696_v1, %v700_v6  ;;  %v2274_v61 = vld [vmem:[%s3296_s0 + $0x168] ss:$8 sps:$4 sm:$0xff]  }
  0x3e   :  { %v186_v18 = vshll.u32 %v2706_v8, 16  ;;  %v192_v20 = vshll.u32 %v59_v14, 16  ;;  %v197_v21 = vshrl.u32 %v2711_v9, 16  ;;  %v2065_v25 = vcombine.low %v687_v5, %v701_v16  ;;  %v2777_v6 = vld [vmem:[%s3296_s0 + $0x1c0] sm:$0xf] }
  0x3f   :  { %v715_v28 = vsel %vm2421_vm2, %v710_v11, %v714_v7  ;;  %v729_v30 = vsel %vm2421_vm2, %v724_v12, %v728_v13  ;;  %v185_v33 = vrot.slane %v183_v15, 4  ;;  %v200_v43 = vshll.u32 %v2711_v9, 16  ;;  %v2786_v14 = vld [vmem:[%s3296_s0 + $0x1c8] sm:$0xf] }
  0x40   :  { %v2066_v36 = vcombine.low %v715_v28, %v729_v30  ;;  %v188_v37 = vrot.slane %v186_v18, 5  ;;  %v194_v38 = vrot.slane %v192_v20, 5  ;;  %v199_v39 = vrot.slane %v197_v21, 4  ;;  %1176 = vrot.lane.b32.xlu1 %v2050_v49, %s2311_s16  ;;  %1230 = vrot.lane.b32.xlu0 %v2272_v0, %s2312_s25  ;;  %v2761_v49 = vld [vmem:[%s3296_s0 + $0x1b0] sm:$0xf] }
  0x41   :  { %v206_v44 = vshll.u32 %v60_v17, 16  ;;  %v211_v46 = vshrl.u32 %v2738_v34, 16  ;;  %v214_v47 = vshll.u32 %v2738_v34, 16  ;;  %v220_v52 = vshll.u32 %v61_v40, 16  ;;  %v2275_v28 = vld [vmem:[%s3296_s0 + $0x178] ss:$8 sps:$4 sm:$0xff]  }
  0x42   :  { %v189_v50 = vor.u32 %v188_v37, %v185_v33  ;;  %v225_v53 = vshrl.u32 %v2743_v35, 16  ;;  %v228_v31 = vshll.u32 %v2743_v35, 16  ;;  %v202_v54 = vrot.slane %v200_v43, 5 }
  0x43   :  { %v208_v57 = vrot.slane %v206_v44, 5  ;;  %v213_v58 = vrot.slane %v211_v46, 4  ;;  %v216_v59 = vrot.slane %v214_v47, 5  ;;  %v222_v63 = vrot.slane %v220_v52, 5 }
  0x44   :  { %v190_v62 = vrot.slane %v189_v50, 4  ;;  %v227_v0 = vrot.slane %v225_v53, 4  ;;  %v230_v1 = vrot.slane %v228_v31, 5  ;;  %1232 = vrot.lane.b32.xlu1 %v2273_v22, %s2312_s25  ;;  %1270 = vrot.lane.b32.xlu0 %v2065_v25, %s2313_s17  ;;  %v203_v2 = vor.u32 %v202_v54, %v199_v39  ;;  %v1943_v39 = vld [vmem:[%s3296_s0 + $0x1b4] sm:$0x1] }
  0x45   :  { %v217_v3 = vor.u32 %v216_v59, %v213_v58  ;;  %v234_v4 = vshll.u32 %v62_v45, 16  ;;  %v457_v5 = vshrl.u32 %v2761_v49, 16  ;;  %v460_v12 = vshll.u32 %v2761_v49, 16  ;;  %v1944_v45 = vld [vmem:[%s3296_s0 + $0x1bc] sm:$0x1] }
  0x46   :  { %v195_v7 = vsel %vm2421_vm2, %v190_v62, %v194_v38  ;;  %v231_v11 = vor.u32 %v230_v1, %v227_v0  ;;  %v471_v13 = vshrl.u32 %v2766_v26, 16  ;;  %v204_v15 = vrot.slane %v203_v2, 4  ;;  %v1945_v53 = vld [vmem:[%s3296_s0 + $0x1c4] sm:$0x1]  ;;  %v1946_v58 = vld [vmem:[%s3296_s0 + $0x1cc] sm:$0x1] }
  0x47   :  { %v218_v16 = vrot.slane %v217_v3, 4  ;;  %v236_v17 = vrot.slane %v234_v4, 5  ;;  %v459_v18 = vrot.slane %v457_v5, 4  ;;  %v462_v21 = vrot.slane %v460_v12, 5  ;;  %v2830_v4 = vld [vmem:[%s3296_s0 + $0x130] sm:$0xf] }
  0x48   :  { %v232_v20 = vrot.slane %v231_v11, 4  ;;  %v473_v22 = vrot.slane %v471_v13, 4  ;;  %v474_v25 = vshll.u32 %v2766_v26, 16  ;;  %930 = vrot.lane.b32.xlu1 %v2274_v61, %s2306_s24  ;;  %1272 = vrot.lane.b32.xlu0 %v2066_v36, %s2313_s17  ;;  %v209_v30 = vsel %vm2421_vm2, %v204_v15, %v208_v57  ;;  %v2835_v5 = vld [vmem:[%s3296_s0 + $0x1f8] ss:$8 sps:$4 sm:$0xff]  }
  0x49   :  { %v223_v33 = vsel %vm2421_vm2, %v218_v16, %v222_v63  ;;  %v2027_v37 = vcombine.low %v2761_v49, %v2766_v26  ;;  %v485_v38 = vshrl.u32 %v2777_v6, 16  ;;  %v2019_v36 = vcombine.low %v195_v7, %v209_v30  ;;  %v2825_v63 = vld [vmem:[%s3296_s0 + $0x128] sm:$0xf]  ;;  %v2840_v13 = vld [vmem:[%s3296_s0 + $0x138] sm:$0xf] }
  0x4a   :  { %v237_v40 = vsel %vm2421_vm2, %v232_v20, %v236_v17  ;;  %v476_v43 = vrot.slane %v474_v25, 5  ;;  %v488_v44 = vshll.u32 %v2777_v6, 16  ;;  %v499_v50 = vshrl.u32 %v2786_v14, 16  ;;  %v2853_v25 = vld [vmem:[%s3296_s0 + $0x140] sm:$0xf] }
  0x4b   :  { %v2020_v46 = vcombine.low %v223_v33, %v237_v40  ;;  %v487_v47 = vrot.slane %v485_v38, 4  ;;  %v502_v52 = vshll.u32 %v2786_v14, 16  ;;  %v2028_v49 = vcombine.low %v2777_v6, %v2786_v14 }
  0x4c   :  { %v490_v31 = vrot.slane %v488_v44, 5  ;;  %v463_v54 = vor.u32 %v462_v21, %v459_v18  ;;  %v466_v57 = vshll.u32 %v1943_v39, 16  ;;  %932 = vrot.lane.b32.xlu1 %v2275_v28, %s2306_s24  ;;  %970 = vrot.lane.b32.xlu0 %v2019_v36, %s2309_s18  ;;  %v501_v59 = vrot.slane %v499_v50, 4  ;;  %v1991_v44 = vld [vmem:[%s3296_s0 + $0x12c] sm:$0x1] }
  0x4d   :  { %v504_v26 = vrot.slane %v502_v52, 5  ;;  %v477_v61 = vor.u32 %v476_v43, %v473_v22  ;;  %v480_v62 = vshll.u32 %v1944_v45, 16  ;;  %v494_v3 = vshll.u32 %v1945_v53, 16  ;;  %v1992_v52 = vld [vmem:[%s3296_s0 + $0x134] sm:$0x1] }
  0x4e   :  { %v464_v0 = vrot.slane %v463_v54, 4  ;;  %v468_v1 = vrot.slane %v466_v57, 5  ;;  %v491_v2 = vor.u32 %v490_v31, %v487_v47  ;;  %v508_v12 = vshll.u32 %v1946_v58, 16 }
  0x4f   :  { %v478_v6 = vrot.slane %v477_v61, 4  ;;  %v482_v7 = vrot.slane %v480_v62, 5  ;;  %v505_v11 = vor.u32 %v504_v26, %v501_v59  ;;  %v496_v16 = vrot.slane %v494_v3, 5  ;;  %v1993_v3 = vld [vmem:[%s3296_s0 + $0x13c] sm:$0x1] }
  0x50   :  { %v469_v14 = vsel %vm2421_vm2, %v464_v0, %v468_v1  ;;  %v492_v15 = vrot.slane %v491_v2, 4  ;;  %v731_v17 = vshrl.u32 %v2825_v63, 16  ;;  %972 = vrot.lane.b32.xlu1 %v2020_v46, %s2309_s18  ;;  %1026 = vrot.lane.b32.xlu0 %v2027_v37, %s2307_s27  ;;  %v510_v21 = vrot.slane %v508_v12, 5  ;;  %v2861_v37 = vld [vmem:[%s3296_s0 + $0x208] ss:$8 sps:$4 sm:$0xff]  }
  0x51   :  { %v483_v18 = vsel %vm2421_vm2, %v478_v6, %v482_v7  ;;  %v506_v20 = vrot.slane %v505_v11, 4  ;;  %v734_v22 = vshll.u32 %v2825_v63, 16  ;;  %v745_v38 = vshrl.u32 %v2830_v4, 16 }
  0x52   :  { %v2043_v28 = vcombine.low %v469_v14, %v483_v18  ;;  %v497_v30 = vsel %vm2421_vm2, %v492_v15, %v496_v16  ;;  %v733_v33 = vrot.slane %v731_v17, 4  ;;  %v748_v40 = vshll.u32 %v2830_v4, 16 }
  0x53   :  { %v511_v39 = vsel %vm2421_vm2, %v506_v20, %v510_v21  ;;  %v736_v36 = vrot.slane %v734_v22, 5  ;;  %v2051_v43 = vcombine.low %v2825_v63, %v2830_v4  ;;  %v747_v46 = vrot.slane %v745_v38, 4  ;;  %v1994_v4 = vld [vmem:[%s3296_s0 + $0x144] sm:$0x1]  ;;  %v2282_v20 = vld [vmem:[%s3296_s0 + $0x170] ss:$8 sps:$4 sm:$0xff]  }
  0x54   :  { %v2044_v45 = vcombine.low %v497_v30, %v511_v39  ;;  %v759_v47 = vshrl.u32 %v2840_v13, 16  ;;  %v762_v50 = vshll.u32 %v2840_v13, 16  ;;  %1028 = vrot.lane.b32.xlu1 %v2028_v49, %s2307_s27  ;;  %1082 = vrot.lane.b32.xlu0 %v2835_v5, %s2308_s15  ;;  %v750_v53 = vrot.slane %v748_v40, 5  ;;  %v2911_v30 = vld [vmem:[%s3296_s0 + $0x148] sm:$0xf] }
  0x55   :  { %v773_v31 = vshrl.u32 %v2853_v25, 16  ;;  %v776_v54 = vshll.u32 %v2853_v25, 16  ;;  %v2052_v57 = vcombine.low %v2840_v13, %v2853_v25  ;;  %v737_v26 = vor.u32 %v736_v36, %v733_v33  ;;  %v63_v36 = vld [vmem:[%s3296_s0 + $0x144] sm:$0x1]  ;;  %v64_v40 = vld [vmem:[%s3296_s0 + $0x14c] sm:$0x1] }
  0x56   :  { %v761_v58 = vrot.slane %v759_v47, 4  ;;  %v764_v59 = vrot.slane %v762_v50, 5  ;;  %v740_v61 = vshll.u32 %v1991_v44, 16  ;;  %v751_v0 = vor.u32 %v750_v53, %v747_v46 }
  0x57   :  { %v775_v62 = vrot.slane %v773_v31, 4  ;;  %v778_v63 = vrot.slane %v776_v54, 5  ;;  %v754_v1 = vshll.u32 %v1992_v52, 16  ;;  %v738_v49 = vrot.slane %v737_v26, 4  ;;  %v2933_v31 = vld [vmem:[%s3296_s0 + $0x150] sm:$0xf] }
  0x58   :  { %v742_v2 = vrot.slane %v740_v61, 5  ;;  %v765_v6 = vor.u32 %v764_v59, %v761_v58  ;;  %v2002_v7 = vcombine.low %v2544_v41, %v2560_v51  ;;  %1084 = vrot.lane.b32.xlu1 %v2861_v37, %s2308_s15  ;;  %1122 = vrot.lane.b32.xlu0 %v2043_v28, %s2310_s6  ;;  %v752_v11 = vrot.slane %v751_v0, 4  ;;  %v2906_v28 = vld [vmem:[%s3296_s0 + $0x140] sm:$0xf]  ;;  %v2941_v59 = vld [vmem:[%s3296_s0 + $0x158] sm:$0xf] }
  0x59   :  { %v756_v12 = vrot.slane %v754_v1, 5  ;;  %v768_v13 = vshll.u32 %v1993_v3, 16  ;;  %v779_v14 = vor.u32 %v778_v63, %v775_v62  ;;  %v782_v17 = vshll.u32 %v1994_v4, 16  ;;  %v2283_v26 = vld [vmem:[%s3296_s0 + $0x180] ss:$8 sps:$4 sm:$0xff]  }
  0x5a   :  { %v743_v15 = vsel %vm2421_vm2, %v738_v49, %v742_v2  ;;  %v766_v16 = vrot.slane %v765_v6, 4  ;;  %v2003_v18 = vcombine.low %v2706_v8, %v2711_v9  ;;  %v2004_v33 = vcombine.low %v2738_v34, %v2743_v35  ;;  %v65_v1 = vld [vmem:[%s3296_s0 + $0x154] sm:$0x1]  ;;  %v66_v3 = vld [vmem:[%s3296_s0 + $0x15c] sm:$0x1] }
  0x5b   :  { %v757_v21 = vsel %vm2421_vm2, %v752_v11, %v756_v12  ;;  %v770_v22 = vrot.slane %v768_v13, 5  ;;  %v780_v25 = vrot.slane %v779_v14, 4  ;;  %v784_v39 = vrot.slane %v782_v17, 5 }
  0x5c   :  { %v2067_v38 = vcombine.low %v743_v15, %v757_v21  ;;  %v239_v44 = vshrl.u32 %v2906_v28, 16  ;;  %v2005_v46 = vcombine.low %v2906_v28, %v2911_v30  ;;  %1124 = vrot.lane.b32.xlu1 %v2044_v45, %s2310_s6  ;;  %1178 = vrot.lane.b32.xlu0 %v2051_v43, %s2311_s16  ;;  %v242_v50 = vshll.u32 %v2906_v28, 16  ;;  %v2961_v15 = vld [vmem:[%s3296_s0 + $0x1d0] sm:$0xf] }
  0x5d   :  { %v771_v47 = vsel %vm2421_vm2, %v766_v16, %v770_v22  ;;  %v248_v52 = vshll.u32 %v63_v36, 16  ;;  %v253_v53 = vshrl.u32 %v2911_v30, 16  ;;  %v785_v54 = vsel %vm2421_vm2, %v780_v25, %v784_v39 }
  0x5e   :  { %v241_v58 = vrot.slane %v239_v44, 4  ;;  %v256_v45 = vshll.u32 %v2911_v30, 16  ;;  %v262_v43 = vshll.u32 %v64_v40, 16  ;;  %v2068_v61 = vcombine.low %v771_v47, %v785_v54 }
  0x5f   :  { %v244_v62 = vrot.slane %v242_v50, 5  ;;  %v250_v63 = vrot.slane %v248_v52, 5  ;;  %v255_v0 = vrot.slane %v253_v53, 4  ;;  %v267_v4 = vshrl.u32 %v2933_v31, 16  ;;  %v2975_v53 = vld [vmem:[%s3296_s0 + $0x1e0] sm:$0xf] }
  0x60   :  { %v258_v49 = vrot.slane %v256_v45, 5  ;;  %v264_v2 = vrot.slane %v262_v43, 5  ;;  %v270_v6 = vshll.u32 %v2933_v31, 16  ;;  %1180 = vrot.lane.b32.xlu1 %v2052_v57, %s2311_s16  ;;  %1234 = vrot.lane.b32.xlu0 %v2282_v20, %s2312_s25  ;;  %v276_v12 = vshll.u32 %v65_v1, 16  ;;  %v2966_v57 = vld [vmem:[%s3296_s0 + $0x1d8] sm:$0xf] }
  0x61   :  { %v245_v11 = vor.u32 %v244_v62, %v241_v58  ;;  %v281_v13 = vshrl.u32 %v2941_v59, 16  ;;  %v284_v14 = vshll.u32 %v2941_v59, 16  ;;  %v269_v17 = vrot.slane %v267_v4, 4  ;;  %v2284_v20 = vld [vmem:[%s3296_s0 + $0x188] ss:$8 sps:$4 sm:$0xff]  }
  0x62   :  { %v259_v16 = vor.u32 %v258_v49, %v255_v0  ;;  %v272_v21 = vrot.slane %v270_v6, 5  ;;  %v290_v22 = vshll.u32 %v66_v3, 16  ;;  %v278_v39 = vrot.slane %v276_v12, 5 }
  0x63   :  { %v246_v25 = vrot.slane %v245_v11, 4  ;;  %v283_v36 = vrot.slane %v281_v13, 4  ;;  %v286_v40 = vrot.slane %v284_v14, 5  ;;  %v513_v52 = vshrl.u32 %v2961_v15, 16 }
  0x64   :  { %v260_v44 = vrot.slane %v259_v16, 4  ;;  %v273_v47 = vor.u32 %v272_v21, %v269_v17  ;;  %v292_v50 = vrot.slane %v290_v22, 5  ;;  %1236 = vrot.lane.b32.xlu1 %v2283_v26, %s2312_s25  ;;  %1274 = vrot.lane.b32.xlu0 %v2067_v38, %s2313_s17  ;;  %v516_v45 = vshll.u32 %v2961_v15, 16  ;;  %v2989_v26 = vld [vmem:[%s3296_s0 + $0x1e8] sm:$0xf] }
  0x65   :  { %v251_v54 = vsel %vm2421_vm2, %v246_v25, %v250_v63  ;;  %v287_v58 = vor.u32 %v286_v40, %v283_v36  ;;  %v527_v43 = vshrl.u32 %v2966_v57, 16  ;;  %v515_v1 = vrot.slane %v513_v52, 4  ;;  %v2285_v38 = vld [vmem:[%s3296_s0 + $0x198] ss:$8 sps:$4 sm:$0xff]   ;;  %v1947_v21 = vld [vmem:[%s3296_s0 + $0x1d4] sm:$0x1] }
  0x66   :  { %v265_v62 = vsel %vm2421_vm2, %v260_v44, %v264_v2  ;;  %v274_v0 = vrot.slane %v273_v47, 4  ;;  %v530_v49 = vshll.u32 %v2966_v57, 16  ;;  %v518_v4 = vrot.slane %v516_v45, 5  ;;  %v1949_v36 = vld [vmem:[%s3296_s0 + $0x1e4] sm:$0x1] }
  0x67   :  { %v2021_v63 = vcombine.low %v251_v54, %v265_v62  ;;  %v288_v3 = vrot.slane %v287_v58, 4  ;;  %v529_v2 = vrot.slane %v527_v43, 4  ;;  %v541_v12 = vshrl.u32 %v2975_v53, 16  ;;  %v1950_v52 = vld [vmem:[%s3296_s0 + $0x1ec] sm:$0x1] }
  0x68   :  { %v279_v6 = vsel %vm2421_vm2, %v274_v0, %v278_v39  ;;  %v532_v11 = vrot.slane %v530_v49, 5  ;;  %934 = vrot.lane.b32.xlu1 %v2284_v20, %s2306_s24  ;;  %1276 = vrot.lane.b32.xlu0 %v2068_v61, %s2313_s17  ;;  %v544_v14 = vshll.u32 %v2975_v53, 16  ;;  %v555_v16 = vshrl.u32 %v2989_v26, 16  ;;  %v1948_v61 = vld [vmem:[%s3296_s0 + $0x1dc] sm:$0x1] }
  0x69   :  { %v293_v13 = vsel %vm2421_vm2, %v288_v3, %v292_v50  ;;  %v558_v17 = vshll.u32 %v2989_v26, 16  ;;  %v2029_v25 = vcombine.low %v2961_v15, %v2966_v57  ;;  %v543_v20 = vrot.slane %v541_v12, 4  ;;  %v3021_v45 = vld [vmem:[%s3296_s0 + $0x148] sm:$0xf]  ;;  %v3028_v49 = vld [vmem:[%s3296_s0 + $0x150] sm:$0xf] }
  0x6a   :  { %v2022_v22 = vcombine.low %v279_v6, %v293_v13  ;;  %v519_v39 = vor.u32 %v518_v4, %v515_v1  ;;  %v546_v40 = vrot.slane %v544_v14, 5  ;;  %v557_v44 = vrot.slane %v555_v16, 4  ;;  %v3041_v12 = vld [vmem:[%s3296_s0 + $0x160] sm:$0xf] }
  0x6b   :  { %v560_v47 = vrot.slane %v558_v17, 5  ;;  %v522_v50 = vshll.u32 %v1947_v21, 16  ;;  %v533_v15 = vor.u32 %v532_v11, %v529_v2  ;;  %v536_v57 = vshll.u32 %v1948_v61, 16  ;;  %v3034_v2 = vld [vmem:[%s3296_s0 + $0x158] sm:$0xf] }
  0x6c   :  { %v520_v54 = vrot.slane %v519_v39, 4  ;;  %v550_v58 = vshll.u32 %v1949_v36, 16  ;;  %936 = vrot.lane.b32.xlu1 %v2285_v38, %s2306_s24  ;;  %974 = vrot.lane.b32.xlu0 %v2021_v63, %s2309_s18  ;;  %v547_v62 = vor.u32 %v546_v40, %v543_v20  ;;  %v564_v1 = vshll.u32 %v1950_v52, 16  ;;  %v1995_v52 = vld [vmem:[%s3296_s0 + $0x14c] sm:$0x1] }
  0x6d   :  { %v524_v43 = vrot.slane %v522_v50, 5  ;;  %v561_v0 = vor.u32 %v560_v47, %v557_v44  ;;  %v534_v3 = vrot.slane %v533_v15, 4  ;;  %v538_v4 = vrot.slane %v536_v57, 5 }
  0x6e   :  { %v787_v6 = vshrl.u32 %v3021_v45, 16  ;;  %v2030_v38 = vcombine.low %v2975_v53, %v2989_v26  ;;  %v548_v63 = vrot.slane %v547_v62, 4  ;;  %v552_v11 = vrot.slane %v550_v58, 5  ;;  %v3050_v53 = vld [vmem:[%s3296_s0 + $0x218] ss:$8 sps:$4 sm:$0xff]  }
  0x6f   :  { %v562_v13 = vrot.slane %v561_v0, 4  ;;  %v566_v14 = vrot.slane %v564_v1, 5  ;;  %v790_v16 = vshll.u32 %v3021_v45, 16  ;;  %v801_v17 = vshrl.u32 %v3028_v49, 16  ;;  %v1997_v62 = vld [vmem:[%s3296_s0 + $0x15c] sm:$0x1] }
  0x70   :  { %976 = vrot.lane.b32.xlu1 %v2022_v22, %s2309_s18  ;;  %1030 = vrot.lane.b32.xlu0 %v2029_v25, %s2307_s27  ;;  %v525_v26 = vsel %vm2421_vm2, %v520_v54, %v524_v43  ;;  %v539_v21 = vsel %vm2421_vm2, %v534_v3, %v538_v4  ;;  %v789_v20 = vrot.slane %v787_v6, 4  ;;  %v804_v61 = vshll.u32 %v3028_v49, 16  ;;  %v3060_v22 = vld [vmem:[%s3296_s0 + $0x228] ss:$8 sps:$4 sm:$0xff]   ;;  %v1996_v43 = vld [vmem:[%s3296_s0 + $0x154] sm:$0x1] }
  0x71   :  { %v792_v39 = vrot.slane %v790_v16, 5  ;;  %v803_v36 = vrot.slane %v801_v17, 4  ;;  %v815_v44 = vshrl.u32 %v3034_v2, 16  ;;  %v818_v47 = vshll.u32 %v3034_v2, 16  ;;  %v1998_v6 = vld [vmem:[%s3296_s0 + $0x164] sm:$0x1] }
  0x72   :  { %v806_v40 = vrot.slane %v804_v61, 5  ;;  %v829_v50 = vshrl.u32 %v3041_v12, 16  ;;  %v2045_v54 = vcombine.low %v525_v26, %v539_v21  ;;  %v553_v15 = vsel %vm2421_vm2, %v548_v63, %v552_v11 }
  0x73   :  { %v567_v57 = vsel %vm2421_vm2, %v562_v13, %v566_v14  ;;  %v832_v58 = vshll.u32 %v3041_v12, 16  ;;  %v817_v0 = vrot.slane %v815_v44, 4  ;;  %v820_v1 = vrot.slane %v818_v47, 5 }
  0x74   :  { %v3062_v25 = vpop.permute.xlu0 %922  ;;  %1032 = vrot.lane.b32.xlu1 %v2030_v38, %s2307_s27  ;;  %1086 = vrot.lane.b32.xlu0 %v3050_v53, %s2308_s15  ;;  %v831_v3 = vrot.slane %v829_v50, 4  ;;  %v793_v4 = vor.u32 %v792_v39, %v789_v20  ;;  %v796_v11 = vshll.u32 %v1995_v52, 16  ;;  %v807_v13 = vor.u32 %v806_v40, %v803_v36  ;;  %v1654_v40 = vld [vmem:[%s3298_s2] sm:$0x3] }
  0x75   :  { %v834_v63 = vrot.slane %v832_v58, 5  ;;  %v810_v14 = vshll.u32 %v1996_v43, 16  ;;  %v2046_v16 = vcombine.low %v553_v15, %v567_v57  ;;  %v2053_v17 = vcombine.low %v3021_v45, %v3028_v49  ;;  %v2299_v45 = vld [vmem:[%s3297_s1 + $0x10] ss:$0 sps:$4 sm:$0x33]  }
  0x76   :  { %v821_v26 = vor.u32 %v820_v1, %v817_v0  ;;  %v794_v21 = vrot.slane %v793_v4, 4  ;;  %v798_v20 = vrot.slane %v796_v11, 5  ;;  %v824_v61 = vshll.u32 %v1997_v62, 16  ;;  %v2295_v4 = vld [vmem:[%s3296_s0 + $0x1a0] ss:$8 sps:$4 sm:$0xff]  }
  0x77   :  { %v838_v39 = vshll.u32 %v1998_v6, 16  ;;  %v1021_v44 = vpop.permute.xlu1 %1020  ;;  %v808_v47 = vrot.slane %v807_v13, 4  ;;  %v812_v50 = vrot.slane %v810_v14, 5  ;;  %v835_v36 = vor.u32 %v834_v63, %v831_v3  ;;  %v2305_v13 = vld [vmem:[%s3296_s0 + $0xe8] ss:$8 sps:$4 sm:$0xff]  }
  0x78   :  { %v925_v38 = vpop.permute.xlu0 %924  ;;  %1088 = vrot.lane.b32.xlu1 %v3060_v22, %s2308_s15  ;;  %1126 = vrot.lane.b32.xlu0 %v2045_v54, %s2310_s6  ;;  %v2054_v49 = vcombine.low %v3034_v2, %v3041_v12  ;;  %v822_v52 = vrot.slane %v821_v26, 4  ;;  %vm1463_vm4 = vcmask 1041408   ;;  %v2294_v54 = vld [vmem:[%s3296_s0 + $0x190] ss:$8 sps:$4 sm:$0xff]   ;;  %v826_v15 = vrot.slane %v824_v61, 5 }
  0x79   :  { %v840_v57 = vrot.slane %v838_v39, 5  ;;  %v1465_v58 = vsel %vm1463_vm4, %v2299_v45, 0  ;;  %v1680_v43 = vsel %vm1463_vm4, %v1654_v40, 0  ;;  %v799_v2 = vsel %vm2421_vm2, %v794_v21, %v798_v20  ;;  %2244 = vmatprep.subr.msk.bf16.mxu0 %vm1463_vm4, %v2299_v45  ;;  %2245 = vmatprep.subr.msk.bf16.mxu1 %vm1463_vm4, %v1654_v40 }
  0x7a   :  { %v813_v12 = vsel %vm2421_vm2, %v808_v47, %v812_v50  ;;  %v836_v0 = vrot.slane %v835_v36, 4  ;;  %v2006_v1 = vcombine.low %v2933_v31, %v2941_v59  ;;  %2209 = vmatpush3.bf16.msra.mxu0 %v1465_v58  ;;  %2227 = vmatpush3.bf16.msra.mxu1 %v1680_v43  ;;  %v827_v63 = vsel %vm2421_vm2, %v822_v52, %v826_v15 }
  0x7b   :  { %v1077_v3 = vpop.permute.xlu1 %1076  ;;  %v2069_v6 = vcombine.low %v799_v2, %v813_v12  ;;  %vm1307_vm5 = vcmask 64512   ;;  %vm1324_vm6 = vcmask 97280   ;;  %v1288_v20 = vsel %vm1282_vm3, %v2000_v32, %v925_v38 }
  0x7c   :  { %1128 = vrot.lane.b32.xlu1 %v2046_v16, %s2310_s6  ;;  %1182 = vrot.lane.b32.xlu0 %v2053_v17, %s2311_s16  ;;  %v1019_v62 = vpop.permute.xlu0 %1018  ;;  %v841_v11 = vsel %vm2421_vm2, %v836_v0, %v840_v57  ;;  %vm1341_vm7 = vcmask 130048   ;;  %vm1358_vm8 = vcmask 162816   ;;  %vm1375_vm9 = vcmask 195584  }
  0x7d   :  { %2229 = vmatmul.mubr.msk.bf16.vlgmr.msra.gmra.mrb[0].mxu1 %vm1282_vm3, %v2305_v13  ;;  %v2070_v16 = vcombine.low %v827_v63, %v841_v11  ;;  %vm1392_vm10 = vcmask 228352   ;;  %vm1409_vm11 = vcmask 261120   ;;  %vm1446_vm12 = vcmask 293888  }
  0x7e   :  { %2232 = vmatprep.mubr.msk.bf16.mxu1 %vm1282_vm3, %v2631_v60  ;;  %v1285_v60 = vsel %vm1282_vm3, %v1999_v55, %v3062_v25  ;;  %vm1869_vm13 = vcmask 1040384   ;;  %vm1872_vm14 = vcmask 1042432  }
  0x80   :  { %1184 = vrot.lane.b32.xlu1 %v2054_v49, %s2311_s16  ;;  %1238 = vrot.lane.b32.xlu0 %v2294_v54, %s2312_s25  ;;  %v1075_v14 = vpop.permute.xlu0 %1074 }
  0x84   :  { %1240 = vrot.lane.b32.xlu1 %v2295_v4, %s2312_s25  ;;  %1278 = vrot.lane.b32.xlu0 %v2069_v6, %s2313_s17 }
  0x85   :  { %2233 = vmatmul.mubr.msk.bf16.gmra.mrb[4].mxu1 %vm1282_vm3, %v2670_v27 }
  0x86   :  { %v963_v17 = vpop.permute.xlu1 %962  ;;  %2236 = vmatprep.mubr.msk.bf16.mxu1 %vm1282_vm3, %v2835_v5 }
  0x87   :  { %v1309_v21 = vsel %vm1307_vm5, %v1285_v60, %v963_v17 }
  0x88   :  { %1280 = vrot.lane.b32.xlu1 %v2070_v16, %s2313_s17  ;;  %v1326_v5 = vsel %vm1324_vm6, %v1309_v21, %v1019_v62 }
  0x89   :  { %v1343_v55 = vsel %vm1341_vm7, %v1326_v5, %v1075_v14 }
  0x8a   :  { %v1115_v56 = vpop.permute.xlu0 %1114  ;;  %v965_v26 = vpop.permute.xlu1 %964 }
  0x8b   :  { %v1311_v27 = vsel %vm1307_vm5, %v1288_v20, %v965_v26  ;;  %v1360_v48 = vsel %vm1358_vm8, %v1343_v55, %v1115_v56 }
  0x8c   :  { %v1328_v19 = vsel %vm1324_vm6, %v1311_v27, %v1021_v44 }
  0x8d   :  { %2237 = vmatmul.mubr.msk.bf16.gmra.mrb[8].mxu1 %vm1282_vm3, %v2861_v37  ;;  %v1345_v32 = vsel %vm1341_vm7, %v1328_v19, %v1077_v3 }
  0x8e   :  { %v1171_v61 = vpop.permute.xlu0 %1170  ;;  %v1117_v39 = vpop.permute.xlu1 %1116  ;;  %2240 = vmatprep.mubr.msk.bf16.mxu1 %vm1282_vm3, %v3050_v53 }
  0x8f   :  { %v1377_v25 = vsel %vm1375_vm9, %v1360_v48, %v1171_v61  ;;  %v1362_v50 = vsel %vm1358_vm8, %v1345_v32, %v1117_v39 }
  0x92   :  { %v1227_v24 = vpop.permute.xlu0 %1226  ;;  %v1173_v42 = vpop.permute.xlu1 %1172 }
  0x93   :  { %v1394_v38 = vsel %vm1392_vm10, %v1377_v25, %v1227_v24  ;;  %v1379_v53 = vsel %vm1375_vm9, %v1362_v50, %v1173_v42 }
  0x95   :  { %2241 = vmatmul.mubr.msk.bf16.gmra.mrb[12].mxu1 %vm1282_vm3, %v3060_v22 }
  0x96   :  { %v1267_v44 = vpop.permute.xlu0 %1266  ;;  %v1229_v47 = vpop.permute.xlu1 %1228 }
  0x97   :  { %v1411_v37 = vsel %vm1409_vm11, %v1394_v38, %v1267_v44  ;;  %v1396_v36 = vsel %vm1392_vm10, %v1379_v53, %v1229_v47 }
  0x98   :  { %2210 = vmatprep.mubr.msk.bf16.mxu0 %vm1446_vm12, %v1411_v37 }
  0x9a   :  { %v1269_v40 = vpop.permute.xlu0 %1268  ;;  %v927_v45 = vpop.permute.xlu1 %926 }
  0x9b   :  { %v1413_v49 = vsel %vm1409_vm11, %v1396_v36, %v1269_v40  ;;  %v1291_v22 = vsel %vm1282_vm3, %v2001_v10, %v927_v45 }
  0x9c   :  { %2211 = vmatmul.mubr.msk.bf16.vlgmr.msra.gmra.mrb[0].mxu0 %vm1446_vm12, %v1413_v49 }
  0x9e   :  { %v929_v52 = vpop.permute.xlu1 %928  ;;  %v967_v54 = vpop.permute.xlu0 %966 }
  0x9f   :  { %v1313_v3 = vsel %vm1307_vm5, %v1291_v22, %v967_v54  ;;  %v1294_v13 = vsel %vm1282_vm3, %v2002_v7, %v929_v52 }
  0xa2   :  { %v969_v15 = vpop.permute.xlu1 %968  ;;  %v1023_v57 = vpop.permute.xlu0 %1022 }
  0xa3   :  { %v1330_v4 = vsel %vm1324_vm6, %v1313_v3, %v1023_v57  ;;  %v1315_v16 = vsel %vm1307_vm5, %v1294_v13, %v969_v15 }
  0xa6   :  { %v1025_v58 = vpop.permute.xlu1 %1024  ;;  %v1079_v43 = vpop.permute.xlu0 %1078 }
  0xa7   :  { %v1347_v11 = vsel %vm1341_vm7, %v1330_v4, %v1079_v43  ;;  %v1332_v29 = vsel %vm1324_vm6, %v1315_v16, %v1025_v58 }
  0xaa   :  { %v1081_v62 = vpop.permute.xlu1 %1080  ;;  %v1119_v2 = vpop.permute.xlu0 %1118 }
  0xab   :  { %v1364_v14 = vsel %vm1358_vm8, %v1347_v11, %v1119_v2  ;;  %v1349_v26 = vsel %vm1341_vm7, %v1332_v29, %v1081_v62 }
  0xae   :  { %v1121_v12 = vpop.permute.xlu1 %1120  ;;  %v1175_v0 = vpop.permute.xlu0 %1174 }
  0xaf   :  { %v1381_v23 = vsel %vm1375_vm9, %v1364_v14, %v1175_v0  ;;  %v1366_v41 = vsel %vm1358_vm8, %v1349_v26, %v1121_v12 }
  0xb2   :  { %v1177_v6 = vpop.permute.xlu1 %1176  ;;  %v1231_v63 = vpop.permute.xlu0 %1230 }
  0xb3   :  { %v1398_v10 = vsel %vm1392_vm10, %v1381_v23, %v1231_v63  ;;  %v1383_v51 = vsel %vm1375_vm9, %v1366_v41, %v1177_v6 }
  0xb6   :  { %v1233_v17 = vpop.permute.xlu1 %1232  ;;  %v1271_v56 = vpop.permute.xlu0 %1270 }
  0xb7   :  { %v1415_v60 = vsel %vm1409_vm11, %v1398_v10, %v1271_v56  ;;  %v1400_v7 = vsel %vm1392_vm10, %v1383_v51, %v1233_v17 }
  0xb8   :  { %2214 = vmatprep.mubr.msk.bf16.mxu0 %vm1446_vm12, %v1415_v60 }
  0xba   :  { %v931_v21 = vpop.permute.xlu1 %930  ;;  %v1273_v20 = vpop.permute.xlu0 %1272 }
  0xbb   :  { %v1417_v61 = vsel %vm1409_vm11, %v1400_v7, %v1273_v20  ;;  %v1297_v38 = vsel %vm1282_vm3, %v2003_v18, %v931_v21 }
  0xbc   :  { %2215 = vmatmul.mubr.msk.bf16.gmra.mrb[4].mxu0 %vm1446_vm12, %v1417_v61 }
  0xbe   :  { %v933_v27 = vpop.permute.xlu1 %932  ;;  %v971_v39 = vpop.permute.xlu0 %970 }
  0xbf   :  { %v1317_v44 = vsel %vm1307_vm5, %v1297_v38, %v971_v39  ;;  %v1300_v36 = vsel %vm1282_vm3, %v2004_v33, %v933_v27 }
  0xc2   :  { %v973_v5 = vpop.permute.xlu1 %972  ;;  %v1027_v19 = vpop.permute.xlu0 %1026 }
  0xc3   :  { %v1334_v47 = vsel %vm1324_vm6, %v1317_v44, %v1027_v19  ;;  %v1319_v45 = vsel %vm1307_vm5, %v1300_v36, %v973_v5 }
  0xc6   :  { %v1029_v24 = vpop.permute.xlu1 %1028  ;;  %v1083_v55 = vpop.permute.xlu0 %1082 }
  0xc7   :  { %v1351_v53 = vsel %vm1341_vm7, %v1334_v47, %v1083_v55  ;;  %v1336_v9 = vsel %vm1324_vm6, %v1319_v45, %v1029_v24 }
  0xca   :  { %v1085_v42 = vpop.permute.xlu1 %1084  ;;  %v1123_v48 = vpop.permute.xlu0 %1122 }
  0xcb   :  { %v1368_v40 = vsel %vm1358_vm8, %v1351_v53, %v1123_v48  ;;  %v1353_v54 = vsel %vm1341_vm7, %v1336_v9, %v1085_v42 }
  0xce   :  { %v1125_v32 = vpop.permute.xlu1 %1124  ;;  %v1179_v25 = vpop.permute.xlu0 %1178 }
  0xcf   :  { %v1385_v8 = vsel %vm1375_vm9, %v1368_v40, %v1179_v25  ;;  %v1370_v34 = vsel %vm1358_vm8, %v1353_v54, %v1125_v32 }
  0xd2   :  { %v1181_v37 = vpop.permute.xlu1 %1180  ;;  %v1235_v50 = vpop.permute.xlu0 %1234 }
  0xd3   :  { %v1402_v18 = vsel %vm1392_vm10, %v1385_v8, %v1235_v50  ;;  %v1387_v35 = vsel %vm1375_vm9, %v1370_v34, %v1181_v37 }
  0xd6   :  { %v1237_v49 = vpop.permute.xlu1 %1236  ;;  %v1275_v52 = vpop.permute.xlu0 %1274 }
  0xd7   :  { %v1419_v15 = vsel %vm1409_vm11, %v1402_v18, %v1275_v52  ;;  %v1404_v33 = vsel %vm1392_vm10, %v1387_v35, %v1237_v49 }
  0xd8   :  { %2218 = vmatprep.mubr.msk.bf16.mxu0 %vm1446_vm12, %v1419_v15 }
  0xda   :  { %v935_v57 = vpop.permute.xlu1 %934  ;;  %v1277_v58 = vpop.permute.xlu0 %1276 }
  0xdb   :  { %v1421_v43 = vsel %vm1409_vm11, %v1404_v33, %v1277_v58  ;;  %v1303_v13 = vsel %vm1282_vm3, %v2005_v46, %v935_v57 }
  0xdc   :  { %2219 = vmatmul.mubr.msk.bf16.gmra.mrb[8].mxu0 %vm1446_vm12, %v1421_v43 }
  0xde   :  { %v937_v62 = vpop.permute.xlu1 %936  ;;  %v975_v2 = vpop.permute.xlu0 %974 }
  0xdf   :  { %v1321_v14 = vsel %vm1307_vm5, %v1303_v13, %v975_v2  ;;  %v1306_v17 = vsel %vm1282_vm3, %v2006_v1, %v937_v62 }
  0xe2   :  { %v977_v12 = vpop.permute.xlu1 %976  ;;  %v1031_v0 = vpop.permute.xlu0 %1030 }
  0xe3   :  { %v1338_v16 = vsel %vm1324_vm6, %v1321_v14, %v1031_v0  ;;  %v1323_v26 = vsel %vm1307_vm5, %v1306_v17, %v977_v12 }
  0xe6   :  { %v1033_v22 = vpop.permute.xlu1 %1032  ;;  %v1087_v3 = vpop.permute.xlu0 %1086 }
  0xe7   :  { %v1355_v10 = vsel %vm1341_vm7, %v1338_v16, %v1087_v3  ;;  %v1340_v30 = vsel %vm1324_vm6, %v1323_v26, %v1033_v22 }
  0xea   :  { %v1089_v4 = vpop.permute.xlu1 %1088  ;;  %v1127_v6 = vpop.permute.xlu0 %1126 }
  0xeb   :  { %v1372_v56 = vsel %vm1358_vm8, %v1355_v10, %v1127_v6  ;;  %v1357_v51 = vsel %vm1341_vm7, %v1340_v30, %v1089_v4 }
  0xee   :  { %v1129_v63 = vpop.permute.xlu1 %1128  ;;  %v1183_v11 = vpop.permute.xlu0 %1182 }
  0xef   :  { %v1389_v28 = vsel %vm1375_vm9, %v1372_v56, %v1183_v11  ;;  %v1374_v31 = vsel %vm1358_vm8, %v1357_v51, %v1129_v63 }
  0xf2   :  { %v1185_v23 = vpop.permute.xlu1 %1184  ;;  %v1239_v29 = vpop.permute.xlu0 %1238 }
  0xf3   :  { %v1406_v46 = vsel %vm1392_vm10, %v1389_v28, %v1239_v29  ;;  %v1391_v59 = vsel %vm1375_vm9, %v1374_v31, %v1185_v23 }
  0xf6   :  { %v1241_v60 = vpop.permute.xlu1 %1240  ;;  %v1279_v41 = vpop.permute.xlu0 %1278 }
  0xf7   :  { %v1423_v7 = vsel %vm1409_vm11, %v1406_v46, %v1279_v41  ;;  %v1408_v1 = vsel %vm1392_vm10, %v1391_v59, %v1241_v60 }
  0xf8   :  { %2222 = vmatprep.mubr.msk.bf16.mxu0 %vm1446_vm12, %v1423_v7 }
  0xfa   :  { %v1281_v21 = vpop.permute.xlu1 %1280 }
  0xfb   :  { %v1425_v20 = vsel %vm1409_vm11, %v1408_v1, %v1281_v21 }
  0xfc   :  { %2223 = vmatmul.mubr.msk.bf16.gmra.mrb[12].mxu0 %vm1446_vm12, %v1425_v20 }
 0x150   :  { %v2230_v61 = vpop.f32.mrb[0].mxu1 }
 0x151   :  { %v1716_v27 = vpop.f32.mrb[1].mxu1  ;;  %v1834_v55 = vmul.f32 %v2230_v61, %v2230_v61 }
 0x152   :  { %v1832_v39 = vmul.f32 %v1716_v27, %v1716_v27  ;;  %v2231_v5 = vpop.f32.mrb[2].mxu1 }
 0x153   :  { %v2138_v19 = vpack.c.bf16 %v2231_v5, %v2230_v61  ;;  %v1719_v24 = vpop.f32.mrb[3].mxu1  ;;  %v1835_v25 = vmul.f32 %v2231_v5, %v2231_v5 }
 0x154   :  { %v2133_v42 = vpack.c.bf16 %v1719_v24, %v1716_v27  ;;  %v1811_v48 = vadd.f32 %v1719_v24, %v1716_v27  ;;  %v1833_v32 = vmul.f32 %v1719_v24, %v1719_v24 }
 0x155   :  { %2177 = vst [vmem:[%s3299_s4 + $0x8] sm:$0xff] %v2138_v19  }
 0x156   :  { %2134 = vst [vmem:[%s3299_s4] sm:$0xff] %v2133_v42   ;;  %v1812_v38 = vadd.f32 %v2230_v61, %v1811_v48  ;;  %v1848_v44 = vadd.f32 %v1833_v32, %v1832_v39 }
 0x158   :  { %v1849_v47 = vadd.f32 %v1848_v44, %v1834_v55  ;;  %v2234_v37 = vpop.f32.mrb[4].mxu1  ;;  %v1813_v50 = vadd.f32 %v2231_v5, %v1812_v38 }
 0x159   :  { %v1732_v53 = vpop.f32.mrb[5].mxu1  ;;  %v1838_v9 = vmul.f32 %v2234_v37, %v2234_v37 }
 0x15a   :  { %v1814_v36 = vadd.f32 %v1813_v50, %v1732_v53  ;;  %v1836_v40 = vmul.f32 %v1732_v53, %v1732_v53  ;;  %v1850_v45 = vadd.f32 %v1849_v47, %v1835_v25  ;;  %v2235_v8 = vpop.f32.mrb[6].mxu1 }
 0x15b   :  { %v2148_v18 = vpack.c.bf16 %v2235_v8, %v2234_v37  ;;  %v1735_v49 = vpop.f32.mrb[7].mxu1  ;;  %v1839_v35 = vmul.f32 %v2235_v8, %v2235_v8 }
 0x15c   :  { %v1851_v52 = vadd.f32 %v1850_v45, %v1836_v40  ;;  %v2143_v54 = vpack.c.bf16 %v1735_v49, %v1732_v53  ;;  %v1815_v15 = vadd.f32 %v1814_v36, %v1735_v49  ;;  %v1837_v34 = vmul.f32 %v1735_v49, %v1735_v49 }
 0x15d   :  { %2179 = vst [vmem:[%s3299_s4 + $0x18] sm:$0xff] %v2148_v18  }
 0x15e   :  { %2178 = vst [vmem:[%s3299_s4 + $0x10] sm:$0xff] %v2143_v54   ;;  %v1816_v33 = vadd.f32 %v2234_v37, %v1815_v15  ;;  %v1852_v57 = vadd.f32 %v1851_v52, %v1837_v34 }
 0x160   :  { %v1853_v58 = vadd.f32 %v1852_v57, %v1838_v9  ;;  %v2238_v43 = vpop.f32.mrb[8].mxu1  ;;  %v1817_v62 = vadd.f32 %v2235_v8, %v1816_v33 }
 0x161   :  { %v1748_v2 = vpop.f32.mrb[9].mxu1  ;;  %v1842_v4 = vmul.f32 %v2238_v43, %v2238_v43 }
 0x162   :  { %v1818_v12 = vadd.f32 %v1817_v62, %v1748_v2  ;;  %v1840_v0 = vmul.f32 %v1748_v2, %v1748_v2  ;;  %v1854_v22 = vadd.f32 %v1853_v58, %v1839_v35  ;;  %v2239_v3 = vpop.f32.mrb[10].mxu1 }
 0x163   :  { %v2158_v6 = vpack.c.bf16 %v2239_v3, %v2238_v43  ;;  %v1751_v63 = vpop.f32.mrb[11].mxu1  ;;  %v1843_v23 = vmul.f32 %v2239_v3, %v2239_v3 }
 0x164   :  { %v1855_v11 = vadd.f32 %v1854_v22, %v1840_v0  ;;  %v2153_v13 = vpack.c.bf16 %v1751_v63, %v1748_v2  ;;  %v1819_v14 = vadd.f32 %v1818_v12, %v1751_v63  ;;  %v1841_v16 = vmul.f32 %v1751_v63, %v1751_v63 }
 0x165   :  { %2181 = vst [vmem:[%s3299_s4 + $0x28] sm:$0xff] %v2158_v6  }
 0x166   :  { %2180 = vst [vmem:[%s3299_s4 + $0x20] sm:$0xff] %v2153_v13   ;;  %v1820_v29 = vadd.f32 %v2238_v43, %v1819_v14  ;;  %v1856_v10 = vadd.f32 %v1855_v11, %v1841_v16 }
 0x168   :  { %v1857_v17 = vadd.f32 %v1856_v10, %v1842_v4  ;;  %v2242_v56 = vpop.f32.mrb[12].mxu1  ;;  %v1821_v26 = vadd.f32 %v2239_v3, %v1820_v29 }
 0x169   :  { %v1764_v28 = vpop.f32.mrb[13].mxu1  ;;  %v1846_v19 = vmul.f32 %v2242_v56, %v2242_v56 }
 0x16a   :  { %v1822_v46 = vadd.f32 %v1821_v26, %v1764_v28  ;;  %v1844_v60 = vmul.f32 %v1764_v28, %v1764_v28  ;;  %v1858_v41 = vadd.f32 %v1857_v17, %v1843_v23  ;;  %v2243_v51 = vpop.f32.mrb[14].mxu1 }
 0x16b   :  { %v2168_v31 = vpack.c.bf16 %v2243_v51, %v2242_v56  ;;  %v1767_v59 = vpop.f32.mrb[15].mxu1  ;;  %v1847_v25 = vmul.f32 %v2243_v51, %v2243_v51 }
 0x16c   :  { %v1859_v21 = vadd.f32 %v1858_v41, %v1844_v60  ;;  %v2163_v20 = vpack.c.bf16 %v1767_v59, %v1764_v28  ;;  %v1823_v61 = vadd.f32 %v1822_v46, %v1767_v59  ;;  %v1845_v24 = vmul.f32 %v1767_v59, %v1767_v59 }
 0x16d   :  { %2183 = vst [vmem:[%s3299_s4 + $0x38] sm:$0xff] %v2168_v31  }
 0x16e   :  { %2182 = vst [vmem:[%s3299_s4 + $0x30] sm:$0xff] %v2163_v20   ;;  %v1824_v32 = vadd.f32 %v2242_v56, %v1823_v61  ;;  %v1860_v38 = vadd.f32 %v1859_v21, %v1845_v24 }
 0x16f   :  { %v2212_v30 = vpop.f32.mrb[0].mxu0 }
 0x170   :  { %v1501_v7 = vpop.f32.mrb[1].mxu0  ;;  %v1619_v44 = vmul.f32 %v2212_v30, %v2212_v30  ;;  %v3270_v50 = vadd.f32 %v2243_v51, %v1824_v32  ;;  %v1861_v53 = vadd.f32 %v1860_v38, %v1846_v19 }
 0x171   :  { %v2213_v1 = vpop.f32.mrb[2].mxu0  ;;  %v1617_v27 = vmul.f32 %v1501_v7, %v1501_v7 }
 0x172   :  { %v2098_v39 = vpack.c.bf16 %v2213_v1, %v2212_v30  ;;  %v1504_v5 = vpop.f32.mrb[3].mxu0  ;;  %v1620_v36 = vmul.f32 %v2213_v1, %v2213_v1  ;;  %v1862_v8 = vadd.f32 %v1861_v53, %v1847_v25  ;;  %v1826_v20 = vrot.slane %v3270_v50, 4 }
 0x173   :  { %v2093_v55 = vpack.c.bf16 %v1504_v5, %v1501_v7  ;;  %v1596_v42 = vadd.f32 %v1504_v5, %v1501_v7  ;;  %v1618_v48 = vmul.f32 %v1504_v5, %v1504_v5 }
 0x174   :  { %2170 = vst [vmem:[%s3300_s3 + $0x8] sm:$0xff] %v2098_v39   ;;  %v1863_v61 = vrot.slane %v1862_v8, 4  ;;  %v1827_v25 = vadd.f32 %v1826_v20, %v3270_v50 }
 0x175   :  { %2094 = vst [vmem:[%s3300_s3] sm:$0xff] %v2093_v55   ;;  %v1597_v47 = vadd.f32 %v2212_v30, %v1596_v42  ;;  %v1633_v37 = vadd.f32 %v1618_v48, %v1617_v27 }
 0x176   :  { %v1864_v38 = vadd.f32 %v1863_v61, %v1862_v8 }
 0x177   :  { %v1634_v40 = vadd.f32 %v1633_v37, %v1619_v44  ;;  %v1598_v45 = vadd.f32 %v2213_v1, %v1597_v47 }
 0x179   :  { %v1635_v9 = vadd.f32 %v1634_v40, %v1620_v36  ;;  %v1828_v40 = vrot.slane %v1827_v25, 2 }
 0x18f   :  { %v2216_v18 = vpop.f32.mrb[4].mxu0 }
 0x190   :  { %v1517_v49 = vpop.f32.mrb[5].mxu0  ;;  %v1623_v62 = vmul.f32 %v2216_v18, %v2216_v18 }
 0x191   :  { %v1599_v52 = vadd.f32 %v1598_v45, %v1517_v49  ;;  %v1621_v54 = vmul.f32 %v1517_v49, %v1517_v49  ;;  %v2217_v15 = vpop.f32.mrb[6].mxu0  ;;  %v1865_v45 = vrot.slane %v1864_v38, 2 }
 0x192   :  { %v2108_v34 = vpack.c.bf16 %v2217_v15, %v2216_v18  ;;  %v1520_v35 = vpop.f32.mrb[7].mxu0  ;;  %v1624_v0 = vmul.f32 %v2217_v15, %v2217_v15 }
 0x193   :  { %v1636_v33 = vadd.f32 %v1635_v9, %v1621_v54  ;;  %v2103_v57 = vpack.c.bf16 %v1520_v35, %v1517_v49  ;;  %v1600_v58 = vadd.f32 %v1599_v52, %v1520_v35  ;;  %v1622_v43 = vmul.f32 %v1520_v35, %v1520_v35 }
 0x194   :  { %2172 = vst [vmem:[%s3300_s3 + $0x18] sm:$0xff] %v2108_v34   ;;  %v1829_v54 = vadd.f32 %v1828_v40, %v1827_v25 }
 0x195   :  { %2171 = vst [vmem:[%s3300_s3 + $0x10] sm:$0xff] %v2103_v57   ;;  %v1601_v2 = vadd.f32 %v2216_v18, %v1600_v58  ;;  %v1637_v12 = vadd.f32 %v1636_v33, %v1622_v43 }
 0x196   :  { %v1830_v58 = vrot.slane %v1829_v54, 1 }
 0x197   :  { %v1638_v22 = vadd.f32 %v1637_v12, %v1623_v62  ;;  %v1602_v3 = vadd.f32 %v2217_v15, %v1601_v2  ;;  %v1866_v15 = vadd.f32 %v1865_v45, %v1864_v38 }
 0x198   :  { %v1831_v2 = vadd.f32 %v1830_v58, %v1829_v54 }
 0x199   :  { %v1639_v4 = vadd.f32 %v1638_v22, %v1624_v0  ;;  %v1867_v50 = vrot.slane %v1866_v15, 1 }
 0x19b   :  { %v1868_v12 = vadd.f32 %v1867_v50, %v1866_v15 }
 0x1af   :  { %v2220_v6 = vpop.f32.mrb[8].mxu0 }
 0x1b0   :  { %v1533_v63 = vpop.f32.mrb[9].mxu0  ;;  %v1627_v26 = vmul.f32 %v2220_v6, %v2220_v6 }
 0x1b1   :  { %v1603_v11 = vadd.f32 %v1602_v3, %v1533_v63  ;;  %v1625_v13 = vmul.f32 %v1533_v63, %v1533_v63  ;;  %v2221_v14 = vpop.f32.mrb[10].mxu0 }
 0x1b2   :  { %v2118_v16 = vpack.c.bf16 %v2221_v14, %v2220_v6  ;;  %v1536_v23 = vpop.f32.mrb[11].mxu0  ;;  %v1628_v46 = vmul.f32 %v2221_v14, %v2221_v14 }
 0x1b3   :  { %v1640_v29 = vadd.f32 %v1639_v4, %v1625_v13  ;;  %v2113_v10 = vpack.c.bf16 %v1536_v23, %v1533_v63  ;;  %v1604_v17 = vadd.f32 %v1603_v11, %v1536_v23  ;;  %v1626_v56 = vmul.f32 %v1536_v23, %v1536_v23 }
 0x1b4   :  { %2174 = vst [vmem:[%s3300_s3 + $0x28] sm:$0xff] %v2118_v16  }
 0x1b5   :  { %2173 = vst [vmem:[%s3300_s3 + $0x20] sm:$0xff] %v2113_v10   ;;  %v1605_v28 = vadd.f32 %v2220_v6, %v1604_v17  ;;  %v1641_v30 = vadd.f32 %v1640_v29, %v1626_v56 }
 0x1b7   :  { %v1642_v60 = vadd.f32 %v1641_v30, %v1627_v26  ;;  %v1606_v41 = vadd.f32 %v2221_v14, %v1605_v28 }
 0x1b9   :  { %v1643_v51 = vadd.f32 %v1642_v60, %v1628_v46 }
 0x1cf   :  { %v2224_v7 = vpop.f32.mrb[12].mxu0 }
 0x1d0   :  { %v1549_v31 = vpop.f32.mrb[13].mxu0  ;;  %v1631_v42 = vmul.f32 %v2224_v7, %v2224_v7 }
 0x1d1   :  { %v1607_v59 = vadd.f32 %v1606_v41, %v1549_v31  ;;  %v1629_v1 = vmul.f32 %v1549_v31, %v1549_v31  ;;  %v2225_v21 = vpop.f32.mrb[14].mxu0 }
 0x1d2   :  { %v2128_v27 = vpack.c.bf16 %v2225_v21, %v2224_v7  ;;  %v1552_v39 = vpop.f32.mrb[15].mxu0  ;;  %v1632_v44 = vmul.f32 %v2225_v21, %v2225_v21 }
 0x1d3   :  { %v1644_v5 = vadd.f32 %v1643_v51, %v1629_v1  ;;  %v2123_v19 = vpack.c.bf16 %v1552_v39, %v1549_v31  ;;  %v1608_v24 = vadd.f32 %v1607_v59, %v1552_v39  ;;  %v1630_v55 = vmul.f32 %v1552_v39, %v1552_v39 }
 0x1d4   :  { %2176 = vst [vmem:[%s3300_s3 + $0x38] sm:$0xff] %v2128_v27  }
 0x1d5   :  { %2175 = vst [vmem:[%s3300_s3 + $0x30] sm:$0xff] %v2123_v19   ;;  %v1609_v48 = vadd.f32 %v2224_v7, %v1608_v24  ;;  %v1645_v32 = vadd.f32 %v1644_v5, %v1630_v55 }
 0x1d7   :  { %v1610_v47 = vadd.f32 %v2225_v21, %v1609_v48  ;;  %v1646_v37 = vadd.f32 %v1645_v32, %v1631_v42 }
 0x1d9   :  { %v1611_v53 = vrot.slane %v1610_v47, 4  ;;  %v1647_v36 = vadd.f32 %v1646_v37, %v1632_v44 }
 0x1db   :  { %v1612_v9 = vadd.f32 %v1611_v53, %v1610_v47  ;;  %v1648_v18 = vrot.slane %v1647_v36, 4 }
 0x1dd   :  { %v1613_v49 = vrot.slane %v1612_v9, 2  ;;  %v1649_v52 = vadd.f32 %v1648_v18, %v1647_v36 }
 0x1df   :  { %v1614_v34 = vadd.f32 %v1613_v49, %v1612_v9  ;;  %v1650_v35 = vrot.slane %v1649_v52, 2 }
 0x1e1   :  { %v1615_v33 = vrot.slane %v1614_v34, 1  ;;  %v1651_v57 = vadd.f32 %v1650_v35, %v1649_v52 }
 0x1e3   :  { %v1652_v8 = vrot.slane %v1651_v57, 1  ;;  %v1616_v43 = vadd.f32 %v1615_v33, %v1614_v34 }
 0x1e5   :  { %v1653_v62 = vadd.f32 %v1652_v8, %v1651_v57 }
 0x1e7   :  { %v1870_v0 = vsel %vm1869_vm13, %v1616_v43, %v1653_v62 }
 0x1e8   :  { %v1871_v22 = vsel %vm1463_vm4, %v1870_v0, %v1831_v2 }
 0x1e9   :  { %v1873_v3 = vsel %vm1872_vm14, %v1871_v22, %v1868_v12 }
 0x1ea   :  { %1874 = vst [vmem:[%s3301_s5] sm:$0xf] %v1873_v3 }

// kernel: residual_block.4
= control target key start
LH: loop header
LB: loop body
LE: loop exit
PB: predicated region body
PF: predicated region fallthrough
CT: control target
= control target key end

     0   :  { %v4053_v2 = vmov 0   ;;  %vm118_vm0 = vsmask.f32 256  ;;  %v120_v21 = vld [vmem:[#allocation2 + $0x8] sm:$0x1]  ;;  %vm117_vm1 = vcmask 1040384   ;;  %s5176_s2 = inlined_call_operand.vmem [shape: bf16[3,384,128], index: 2, kind: input, shape index: {}]   ;;  %s5177_s0 = inlined_call_operand.vmem [shape: bf16[2,8,8,128], index: 0, kind: input, shape index: {}]   ;;  %s5178_s1 = inlined_call_operand.vmem [shape: f32[2,128], index: 1, kind: input, shape index: {}]   ;;  %s5179_s3 = inlined_call_operand.vmem [shape: bf16[2,8,8,128], index: 3, kind: output, shape index: {0}]   ;;  %s5180_s4 = inlined_call_operand.vmem [shape: f32[1,2,128], index: 4, kind: output, shape index: {1}]  }
   0x1   :  { %v3859_v0 = vld [vmem:[%s5176_s2 + $0x140] sm:$0xff]   ;;  %107 = vst [vmem:[#allocation2] sm:$0xf] %v4053_v2  ;;  %108 = vst [vmem:[#allocation2 + $0x4] sm:$0x1] %v4053_v2  ;;  %v3862_v4 = vld [vmem:[%s5176_s2 + $0x148] sm:$0xff]  }
   0x2   :  { %v3860_v1 = vld [vmem:[%s5176_s2 + $0x100] sm:$0xff]   ;;  %109 = vst [vmem:[#allocation2 + $0x50] sm:$0xf] %v4053_v2  ;;  %110 = vst [vmem:[#allocation2 + $0x54] sm:$0x1] %v4053_v2  ;;  %3666 = vmatprep.subr.bf16.mxu1 %v3859_v0  ;;  %v3863_v5 = vld [vmem:[%s5176_s2 + $0x108] sm:$0xff]  }
   0x3   :  { %112 = vst [vmem:[#allocation2 + $0x48] sm:$0xf] %v4053_v2  ;;  %113 = vst [vmem:[#allocation2 + $0x4c] sm:$0x1] %v4053_v2  ;;  %v3861_v3 = vld [vmem:[%s5176_s2 + $0xc0] sm:$0xff]   ;;  %3426 = vmatprep.subr.bf16.mxu0 %v3860_v1  ;;  %3667 = vmatpush3.bf16.msra.mxu1 %v3859_v0  ;;  %v3864_v6 = vld [vmem:[%s5176_s2 + $0xc8] sm:$0xff]  }
   0x4   :  { %114 = vst [vmem:[#allocation2 + $0x98] sm:$0xf] %v4053_v2  ;;  %115 = vst [vmem:[#allocation2 + $0x9c] sm:$0x1] %v4053_v2  ;;  %3427 = vmatpush3.bf16.msra.mxu0 %v3861_v3  ;;  %3668 = vmatprep.subr.bf16.mxu1 %v3862_v4  ;;  %v3865_v7 = vld [vmem:[%s5176_s2 + $0x150] sm:$0xff]   ;;  %v3868_v10 = vld [vmem:[%s5176_s2 + $0x158] sm:$0xff]  }
   0x5   :  { %3428 = vmatprep.subr.bf16.mxu0 %v3863_v5  ;;  %v3866_v8 = vld [vmem:[%s5176_s2 + $0x110] sm:$0xff]   ;;  %v3869_v11 = vld [vmem:[%s5176_s2 + $0x118] sm:$0xff]   ;;  %v3871_v13 = vld [vmem:[%s5176_s2 + $0x160] sm:$0xff]   ;;  %vm168_vm3 = vsmask.f32 7938  ;;  %vm442_vm5 = vcmask 1043456  }
   0x6   :  { %v3867_v9 = vld [vmem:[%s5176_s2 + $0xd0] sm:$0xff]   ;;  %v3870_v12 = vld [vmem:[%s5176_s2 + $0xd8] sm:$0xff]   ;;  %v3872_v14 = vld [vmem:[%s5176_s2 + $0x120] sm:$0xff]  }
   0x7   :  { %3669 = vmatpush3.bf16.msra.mxu1 %v3862_v4  ;;  %v3873_v15 = vld [vmem:[%s5176_s2 + $0xe0] sm:$0xff]   ;;  %v3874_v16 = vld [vmem:[%s5176_s2 + $0x168] sm:$0xff]   ;;  %v3877_v19 = vld [vmem:[%s5176_s2 + $0x170] sm:$0xff]  }
   0x8   :  { %3429 = vmatpush3.bf16.msra.mxu0 %v3864_v6  ;;  %3670 = vmatprep.subr.bf16.mxu1 %v3865_v7  ;;  %v3875_v17 = vld [vmem:[%s5176_s2 + $0x128] sm:$0xff]   ;;  %v3878_v20 = vld [vmem:[%s5176_s2 + $0x130] sm:$0xff]   ;;  %v3880_v23 = vld [vmem:[%s5176_s2 + $0x178] sm:$0xff]  }
   0x9   :  { %3430 = vmatprep.subr.bf16.mxu0 %v3866_v8  ;;  %v3876_v18 = vld [vmem:[%s5176_s2 + $0xe8] sm:$0xff]   ;;  %v3879_v22 = vld [vmem:[%s5176_s2 + $0xf0] sm:$0xff]   ;;  %v3881_v24 = vld [vmem:[%s5176_s2 + $0x138] sm:$0xff]  }
   0xa   :  { %v3341_v25 = vld [vmem:[%s5177_s0] sm:$0xff]   ;;  %vm4163_vm2 = vmand %vm117_vm1, %vm118_vm0  ;;  %v123_v31 = vld [vmem:[#allocation2 + $0x10] sm:$0x1] }
   0xb   :  { %3671 = vmatpush3.bf16.msra.mxu1 %v3865_v7  ;;  %v4154_v26 = vld [vmem:[%s5178_s1] ss:$0 sm:$0xff]  ;;  %v4159_v27 = vld [vmem:[%s5178_s1 + $0x1] ss:$0 sm:$0xff]  ;;  %v3342_v28 = vunpack.c.l.bf16 %v3341_v25  ;;  %v3343_v29 = vunpack.c.h.bf16 %v3341_v25  ;;  %v170_v32 = vld [vmem:[#allocation2 + $0xc] sm:$0x1] }
   0xc   :  { %3431 = vmatpush3.bf16.msra.mxu0 %v3867_v9  ;;  %3672 = vmatprep.subr.bf16.mxu1 %v3868_v10  ;;  %v3882_v33 = vld [vmem:[%s5176_s2 + $0xf8] sm:$0xff]   ;;  %v121_v34 = vsel %vm4163_vm2, 0, %v120_v21  ;;  %v124_v35 = vsel %vm4163_vm2, 0, %v123_v31  ;;  %vm4176_vm4 = vmand %vm117_vm1, %vm168_vm3  ;;  %v173_v37 = vld [vmem:[#allocation2 + $0x14] sm:$0x1] }
   0xd   :  { %3432 = vmatprep.subr.bf16.mxu0 %v3869_v11  ;;  %v3412_v38 = vld [vmem:[%s5177_s0 + $0x8] sm:$0xff]   ;;  %v54_v39 = vmul.f32 %v3342_v28, %v4154_v26  ;;  %v55_v40 = vmul.f32 %v3343_v29, %v4154_v26  ;;  %122 = vst [vmem:[#allocation2 + $0x8] sm:$0x1] %v121_v34  ;;  %125 = vst [vmem:[#allocation2 + $0x10] sm:$0x1] %v124_v35  ;;  %v171_v41 = vsel %vm4176_vm4, 0, %v170_v32 }
   0xe   :  { %v174_v42 = vsel %vm4176_vm4, 0, %v173_v37  ;;  %v126_v43 = vld [vmem:[#allocation2 + $0x18] sm:$0x1]  ;;  %v129_v44 = vld [vmem:[#allocation2 + $0x20] sm:$0x1]  ;;  %v3346_v45 = vunpack.c.l.bf16 %v3412_v38  ;;  %v3347_v46 = vunpack.c.h.bf16 %v3412_v38  ;;  %vm4210_vm6 = vmand %vm442_vm5, %vm168_vm3 }
   0xf   :  { %3673 = vmatpush3.bf16.msra.mxu1 %v3868_v10  ;;  %172 = vst [vmem:[#allocation2 + $0xc] sm:$0x1] %v171_v41  ;;  %175 = vst [vmem:[#allocation2 + $0x14] sm:$0x1] %v174_v42  ;;  %v127_v47 = vsel %vm4163_vm2, 0, %v126_v43  ;;  %v130_v48 = vsel %vm4163_vm2, 0, %v129_v44  ;;  %v75_v51 = vadd.f32 %v4159_v27, %v54_v39  ;;  %v76_v52 = vadd.f32 %v4159_v27, %v55_v40 }
  0x10   :  { %3433 = vmatpush3.bf16.msra.mxu0 %v3870_v12  ;;  %3674 = vmatprep.subr.bf16.mxu1 %v3871_v13  ;;  %v176_v49 = vld [vmem:[#allocation2 + $0x1c] sm:$0x1]  ;;  %v179_v50 = vld [vmem:[#allocation2 + $0x24] sm:$0x1]  ;;  %128 = vst [vmem:[#allocation2 + $0x18] sm:$0x1] %v127_v47  ;;  %v56_v55 = vmul.f32 %v3346_v45, %v4154_v26  ;;  %v57_v56 = vmul.f32 %v3347_v46, %v4154_v26 }
  0x11   :  { %3434 = vmatprep.subr.bf16.mxu0 %v3872_v14  ;;  %131 = vst [vmem:[#allocation2 + $0x20] sm:$0x1] %v130_v48  ;;  %v177_v53 = vsel %vm4176_vm4, 0, %v176_v49  ;;  %v180_v54 = vsel %vm4176_vm4, 0, %v179_v50  ;;  %v3891_v57 = vld [vmem:[%s5176_s2 + $0x40] sm:$0xff]   ;;  %v91_v58 = vmax.f32 %v75_v51, 0.0 }
  0x12   :  { %178 = vst [vmem:[#allocation2 + $0x1c] sm:$0x1] %v177_v53  ;;  %181 = vst [vmem:[#allocation2 + $0x24] sm:$0x1] %v180_v54  ;;  %v92_v59 = vmax.f32 %v76_v52, 0.0  ;;  %v3893_v60 = vld [vmem:[%s5176_s2 + $0x1c0] sm:$0xff]   ;;  %v77_v61 = vadd.f32 %v4159_v27, %v56_v55  ;;  %v78_v62 = vadd.f32 %v4159_v27, %v57_v56 }
  0x13   :  { %3675 = vmatpush3.bf16.msra.mxu1 %v3871_v13  ;;  %v3324_v63 = vpack.c.bf16 %v91_v58, %v91_v58  ;;  %v132_v34 = vld [vmem:[#allocation2 + $0x28] sm:$0x1]  ;;  %v135_v40 = vld [vmem:[#allocation2 + $0x30] sm:$0x1]  ;;  %v182_v41 = vld [vmem:[#allocation2 + $0x2c] sm:$0x1] }
  0x14   :  { %3435 = vmatpush3.bf16.msra.mxu0 %v3873_v15  ;;  %3676 = vmatprep.subr.bf16.mxu1 %v3874_v16  ;;  %v3325_v0 = vpack.c.bf16 %v92_v59, %v92_v59  ;;  %v93_v1 = vmax.f32 %v77_v61, 0.0  ;;  %v94_v2 = vmax.f32 %v78_v62, 0.0  ;;  %v444_v7 = vld [vmem:[#allocation2 + $0x8] sm:$0xf]  ;;  %v450_v13 = vld [vmem:[#allocation2 + $0x10] sm:$0xf] }
  0x15   :  { %3436 = vmatprep.subr.bf16.mxu0 %v3875_v17  ;;  %v283_v3 = vshrl.u32 %v3324_v63, 16  ;;  %v286_v4 = vshll.u32 %v3324_v63, 16  ;;  %v3414_v42 = vld [vmem:[%s5177_s0 + $0x18] sm:$0xff]   ;;  %v185_v47 = vld [vmem:[#allocation2 + $0x34] sm:$0x1]  ;;  %v133_v51 = vsel %vm4163_vm2, 0, %v132_v34 }
  0x16   :  { %v291_v5 = vshrl.u32 %v3325_v0, 16  ;;  %v294_v6 = vshll.u32 %v3325_v0, 16  ;;  %v3326_v8 = vpack.c.bf16 %v93_v1, %v93_v1  ;;  %v3327_v9 = vpack.c.bf16 %v94_v2, %v94_v2  ;;  %v447_v12 = vld [vmem:[#allocation2 + $0xc] sm:$0x1]  ;;  %v453_v15 = vld [vmem:[#allocation2 + $0x14] sm:$0x1] }
  0x17   :  { %3677 = vmatpush3.bf16.msra.mxu1 %v3874_v16  ;;  %v285_v10 = vrot.slane %v283_v3, 7  ;;  %v138_v48 = vld [vmem:[#allocation2 + $0x38] sm:$0x1]  ;;  %v136_v52 = vsel %vm4163_vm2, 0, %v135_v40  ;;  %v141_v53 = vld [vmem:[#allocation2 + $0x40] sm:$0x1]  ;;  %v3354_v63 = vunpack.c.l.bf16 %v3414_v42  ;;  %v3355_v0 = vunpack.c.h.bf16 %v3414_v42 }
  0x18   :  { %3437 = vmatpush3.bf16.msra.mxu0 %v3876_v18  ;;  %3678 = vmatprep.subr.bf16.mxu1 %v3877_v19  ;;  %v293_v11 = vrot.slane %v291_v5, 7  ;;  %v299_v16 = vshrl.u32 %v3326_v8, 16  ;;  %v302_v17 = vshll.u32 %v3326_v8, 16  ;;  %v307_v18 = vshrl.u32 %v3327_v9, 16  ;;  %v462_v28 = vld [vmem:[#allocation2 + $0x20] sm:$0xf] }
  0x19   :  { %3438 = vmatprep.subr.bf16.mxu0 %v3878_v20  ;;  %v288_v20 = vor.u32 %v286_v4, %v285_v10  ;;  %v289_v21 = vrot.slane %v285_v10, 4  ;;  %v459_v25 = vld [vmem:[#allocation2 + $0x1c] sm:$0x1]  ;;  %v465_v29 = vld [vmem:[#allocation2 + $0x24] sm:$0x1]  ;;  %v183_v61 = vsel %vm4176_vm4, 0, %v182_v41  ;;  %v61_v8 = vmul.f32 %v3355_v0, %v4154_v26 }
  0x1a   :  { %v301_v31 = vrot.slane %v299_v16, 7  ;;  %v309_v32 = vrot.slane %v307_v18, 7  ;;  %v188_v54 = vld [vmem:[#allocation2 + $0x3c] sm:$0x1]  ;;  %134 = vst [vmem:[#allocation2 + $0x28] sm:$0x1] %v133_v51 }
  0x1b   :  { %3679 = vmatpush3.bf16.msra.mxu1 %v3877_v19  ;;  %v310_v19 = vshll.u32 %v3327_v9, 16  ;;  %v445_v35 = vsel %vm4210_vm6, %v288_v20, %v444_v7  ;;  %v448_v37 = vsel %vm4163_vm2, %v289_v21, %v447_v12  ;;  %137 = vst [vmem:[#allocation2 + $0x30] sm:$0x1] %v136_v52  ;;  %v191_v59 = vld [vmem:[#allocation2 + $0x44] sm:$0x1]  ;;  %v186_v62 = vsel %vm4176_vm4, 0, %v185_v47 }
  0x1c   :  { %3439 = vmatpush3.bf16.msra.mxu0 %v3879_v22  ;;  %3680 = vmatprep.subr.bf16.mxu1 %v3880_v23  ;;  %v296_v22 = vor.u32 %v294_v6, %v293_v11  ;;  %446 = vst [vmem:[#allocation2 + $0x8] sm:$0xf] %v445_v35  ;;  %449 = vst [vmem:[#allocation2 + $0xc] sm:$0x1] %v448_v37  ;;  %v304_v43 = vor.u32 %v302_v17, %v301_v31  ;;  %v305_v44 = vrot.slane %v301_v31, 4  ;;  %v3896_v0 = vld [vmem:[%s5176_s2 + $0x48] sm:$0xff]  }
  0x1d   :  { %3440 = vmatprep.subr.bf16.mxu0 %v3881_v24  ;;  %v456_v24 = vld [vmem:[#allocation2 + $0x18] sm:$0xf]  ;;  %v312_v45 = vor.u32 %v310_v19, %v309_v32  ;;  %v313_v46 = vrot.slane %v309_v32, 4  ;;  %184 = vst [vmem:[#allocation2 + $0x2c] sm:$0x1] %v183_v61  ;;  %v139_v1 = vsel %vm4163_vm2, 0, %v138_v48  ;;  %v60_v7 = vmul.f32 %v3354_v63, %v4154_v26 }
  0x1e   :  { %v451_v38 = vsel %vm4210_vm6, %v296_v22, %v450_v13  ;;  %v457_v55 = vsel %vm4210_vm6, %v304_v43, %v456_v24  ;;  %v460_v56 = vsel %vm4163_vm2, %v305_v44, %v459_v25  ;;  %187 = vst [vmem:[#allocation2 + $0x34] sm:$0x1] %v186_v62  ;;  %v142_v2 = vsel %vm4163_vm2, 0, %v141_v53  ;;  %140 = vst [vmem:[#allocation2 + $0x38] sm:$0x1] %v139_v1  ;;  %v3956_v36 = vld [vmem:[%s5176_s2 + $0x1a8] sm:$0xff]  }
  0x1f   :  { %3681 = vmatpush3.bf16.msra.mxu1 %v3880_v23  ;;  %v297_v23 = vrot.slane %v293_v11, 4  ;;  %452 = vst [vmem:[#allocation2 + $0x10] sm:$0xf] %v451_v38  ;;  %v466_v58 = vsel %vm4163_vm2, %v313_v46, %v465_v29  ;;  %458 = vst [vmem:[#allocation2 + $0x18] sm:$0xf] %v457_v55  ;;  %v189_v4 = vsel %vm4176_vm4, 0, %v188_v54  ;;  %v82_v29 = vadd.f32 %v4159_v27, %v61_v8 }
  0x20   :  { %3441 = vmatpush3.bf16.msra.mxu0 %v3882_v33  ;;  %3506 = vmatprep.subr.bf16.mxu1 %v3891_v57  ;;  %v3413_v33 = vld [vmem:[%s5177_s0 + $0x10] sm:$0xff]   ;;  %v463_v57 = vsel %vm4210_vm6, %v312_v45, %v462_v28  ;;  %461 = vst [vmem:[#allocation2 + $0x1c] sm:$0x1] %v460_v56  ;;  %467 = vst [vmem:[#allocation2 + $0x24] sm:$0x1] %v466_v58  ;;  %v192_v5 = vsel %vm4176_vm4, 0, %v191_v59  ;;  %v81_v28 = vadd.f32 %v4159_v27, %v60_v7 }
  0x21   :  { %3586 = vmatprep.subr.bf16.mxu0 %v3893_v60  ;;  %v454_v39 = vsel %vm4163_vm2, %v297_v23, %v453_v15  ;;  %v3350_v49 = vunpack.c.l.bf16 %v3413_v33  ;;  %v3351_v50 = vunpack.c.h.bf16 %v3413_v33  ;;  %464 = vst [vmem:[#allocation2 + $0x20] sm:$0xf] %v463_v57  ;;  %143 = vst [vmem:[#allocation2 + $0x40] sm:$0x1] %v142_v2  ;;  %v468_v55 = vld [vmem:[#allocation2 + $0x28] sm:$0xf] }
  0x22   :  { %455 = vst [vmem:[#allocation2 + $0x14] sm:$0x1] %v454_v39  ;;  %190 = vst [vmem:[#allocation2 + $0x3c] sm:$0x1] %v189_v4  ;;  %v97_v56 = vmax.f32 %v81_v28, 0.0  ;;  %v98_v61 = vmax.f32 %v82_v29, 0.0 }
  0x23   :  { %v58_v60 = vmul.f32 %v3350_v49, %v4154_v26  ;;  %v59_v6 = vmul.f32 %v3351_v50, %v4154_v26  ;;  %193 = vst [vmem:[#allocation2 + $0x44] sm:$0x1] %v192_v5  ;;  %v4257_v9 = vld [vmem:[#allocation2 + $0x8] sm:$0xf]  ;;  %v940_v11 = vld [vmem:[#allocation2 + $0xc] sm:$0x1] }
  0x24   :  { %v956_v13 = vld [vmem:[#allocation2 + $0x8] sm:$0xe]  ;;  %v3020_v16 = vcombine.low %v4257_v9, %v940_v11  ;;  %v3892_v49 = vld [vmem:[%s5176_s2] sm:$0xff]   ;;  %v3330_v1 = vpack.c.bf16 %v97_v56, %v97_v56 }
  0x25   :  { %v79_v3 = vadd.f32 %v4159_v27, %v58_v60  ;;  %v3036_v18 = vcombine.low %v956_v13, %v940_v11  ;;  %v80_v25 = vadd.f32 %v4159_v27, %v59_v6  ;;  %v471_v60 = vld [vmem:[#allocation2 + $0x2c] sm:$0x1]  ;;  %v3331_v13 = vpack.c.bf16 %v98_v61, %v98_v61  ;;  %v480_v28 = vld [vmem:[#allocation2 + $0x38] sm:$0xf] }
  0x26   :  { %v4259_v10 = vld [vmem:[#allocation2 + $0x10] sm:$0xf]  ;;  %v4263_v21 = vld [vmem:[#allocation2 + $0x18] sm:$0xf]  ;;  %v1053_v41 = vshrl.u32 %v3020_v16, 16  ;;  %v1055_v42 = vshll.u32 %v3020_v16, 16 }
  0x27   :  { %v957_v15 = vld [vmem:[#allocation2 + $0x10] sm:$0xe]  ;;  %v95_v20 = vmax.f32 %v79_v3, 0.0  ;;  %v942_v23 = vld [vmem:[#allocation2 + $0x1c] sm:$0x1]  ;;  %v3100_v24 = vcombine.low %v4257_v9, %v4259_v10  ;;  %v1212_v31 = vrot.slane %v3036_v18, 1 }
  0x28   :  { %v4265_v22 = vld [vmem:[#allocation2 + $0x20] sm:$0xf]  ;;  %v943_v33 = vld [vmem:[#allocation2 + $0x24] sm:$0x1]  ;;  %v958_v34 = vld [vmem:[#allocation2 + $0x18] sm:$0xe]  ;;  %v4273_v35 = vcombine.low %v4263_v21, %v942_v23 }
  0x29   :  { %v941_v12 = vld [vmem:[#allocation2 + $0x14] sm:$0x1]  ;;  %v3328_v37 = vpack.c.bf16 %v95_v20, %v95_v20  ;;  %v959_v38 = vld [vmem:[#allocation2 + $0x20] sm:$0xe]  ;;  %v4276_v39 = vcombine.low %v4265_v22, %v943_v33  ;;  %v3038_v40 = vcombine.low %v958_v34, %v942_v23  ;;  %v1057_v48 = vrot.slane %v1055_v42, 1  ;;  %v3897_v4 = vld [vmem:[%s5176_s2 + $0x8] sm:$0xff]  }
  0x2a   :  { %v3021_v17 = vcombine.low %v4259_v10, %v941_v12  ;;  %v3037_v19 = vcombine.low %v957_v15, %v941_v12  ;;  %v3039_v44 = vcombine.low %v959_v38, %v943_v33  ;;  %v96_v50 = vmax.f32 %v80_v25, 0.0  ;;  %v3895_v3 = vld [vmem:[%s5176_s2 + $0x180] sm:$0xff]   ;;  %v474_v12 = vld [vmem:[#allocation2 + $0x30] sm:$0xf]  ;;  %v3908_v18 = vld [vmem:[%s5176_s2 + $0x1c8] sm:$0xff]  }
  0x2b   :  { %v1214_v47 = vrot.slane %v3038_v40, 1  ;;  %v315_v51 = vshrl.u32 %v3328_v37, 16  ;;  %v318_v54 = vshll.u32 %v3328_v37, 16  ;;  %v1058_v57 = vor.u32 %v1057_v48, %v1053_v41  ;;  %v477_v25 = vld [vmem:[#allocation2 + $0x34] sm:$0x1]  ;;  %v3910_v38 = vld [vmem:[%s5176_s2 + $0x188] sm:$0xff]  }
  0x2c   :  { %v1213_v32 = vrot.slane %v3037_v19, 1  ;;  %v1060_v45 = vshrl.u32 %v3021_v17, 16  ;;  %v1062_v46 = vshll.u32 %v3021_v17, 16  ;;  %v1215_v52 = vrot.slane %v3039_v44, 1  ;;  %v3906_v17 = vld [vmem:[%s5176_s2 + $0x50] sm:$0xff]  }
  0x2d   :  { %v3329_v58 = vpack.c.bf16 %v96_v50, %v96_v50  ;;  %v317_v59 = vrot.slane %v315_v51, 7  ;;  %v1067_v2 = vshrl.u32 %v4273_v35, 16  ;;  %v331_v15 = vshrl.u32 %v3330_v1, 16  ;;  %v483_v34 = vld [vmem:[#allocation2 + $0x3c] sm:$0x1] }
  0x2e   :  { %v3102_v43 = vcombine.low %v1212_v31, %v1213_v32  ;;  %v1064_v53 = vrot.slane %v1062_v46, 1  ;;  %v3105_v62 = vcombine.low %v1214_v47, %v1215_v52  ;;  %v334_v16 = vshll.u32 %v3330_v1, 16  ;;  %v486_v41 = vld [vmem:[#allocation2 + $0x40] sm:$0xf]  ;;  %v489_v42 = vld [vmem:[#allocation2 + $0x44] sm:$0x1] }
  0x2f   :  { %v320_v5 = vor.u32 %v318_v54, %v317_v59  ;;  %v321_v6 = vrot.slane %v317_v59, 4  ;;  %v323_v7 = vshrl.u32 %v3329_v58, 16  ;;  %v326_v8 = vshll.u32 %v3329_v58, 16  ;;  %v3415_v46 = vld [vmem:[%s5177_s0 + $0x20] sm:$0xff]   ;;  %v144_v47 = vld [vmem:[#allocation2 + $0x58] sm:$0x1] }
  0x30   :  { %3682 = vmatprep.mubr.bf16.mxu1 %v3102_v43  ;;  %v1065_v63 = vor.u32 %v1064_v53, %v1060_v45  ;;  %v1069_v29 = vshll.u32 %v4273_v35, 16  ;;  %v333_v31 = vrot.slane %v331_v15, 7  ;;  %v339_v32 = vshrl.u32 %v3331_v13, 16  ;;  %v3907_v45 = vld [vmem:[%s5176_s2 + $0x10] sm:$0xff]   ;;  %v194_v50 = vld [vmem:[#allocation2 + $0x5c] sm:$0x1] }
  0x31   :  { %3683 = vmatmul.mubr.bf16.vlgmr.msra.gmra.mrb[0].mxu1 %v3105_v62  ;;  %v325_v19 = vrot.slane %v323_v7, 7  ;;  %v469_v20 = vsel %vm4210_vm6, %v320_v5, %v468_v55  ;;  %v472_v23 = vsel %vm4163_vm2, %v321_v6, %v471_v60  ;;  %v342_v33 = vshll.u32 %v3331_v13, 16  ;;  %v197_v55 = vld [vmem:[#allocation2 + $0x64] sm:$0x1]  ;;  %v3416_v59 = vld [vmem:[%s5177_s0 + $0x28] sm:$0xff]   ;;  %v3912_v62 = vld [vmem:[%s5176_s2 + $0x18] sm:$0xff]  }
  0x32   :  { %v3101_v11 = vcombine.low %v1058_v57, %v1065_v63  ;;  %3507 = vmatpush3.bf16.msra.mxu1 %v3892_v49  ;;  %470 = vst [vmem:[#allocation2 + $0x28] sm:$0xf] %v469_v20  ;;  %473 = vst [vmem:[#allocation2 + $0x2c] sm:$0x1] %v472_v23  ;;  %v1074_v37 = vshrl.u32 %v4276_v39, 16  ;;  %v1071_v43 = vrot.slane %v1069_v29, 1  ;;  %v336_v48 = vor.u32 %v334_v16, %v333_v31 }
  0x33   :  { %3508 = vmatprep.subr.bf16.mxu1 %v3896_v0  ;;  %v328_v40 = vor.u32 %v326_v8, %v325_v19  ;;  %v329_v35 = vrot.slane %v325_v19, 4  ;;  %v1076_v44 = vshll.u32 %v4276_v39, 16  ;;  %v337_v9 = vrot.slane %v333_v31, 4  ;;  %v3911_v39 = vld [vmem:[%s5176_s2 + $0x58] sm:$0xff]   ;;  %v147_v49 = vld [vmem:[#allocation2 + $0x60] sm:$0x1] }
  0x34   :  { %1533 = vmatprep.mubr.bf16.mxu0 %v3101_v11  ;;  %v341_v10 = vrot.slane %v339_v32, 7  ;;  %v1072_v53 = vor.u32 %v1071_v43, %v1067_v2  ;;  %v481_v57 = vsel %vm4210_vm6, %v336_v48, %v480_v28  ;;  %v150_v60 = vld [vmem:[#allocation2 + $0x68] sm:$0x1]  ;;  %v3358_v63 = vunpack.c.l.bf16 %v3415_v46  ;;  %v153_v2 = vld [vmem:[#allocation2 + $0x70] sm:$0x1] }
  0x35   :  { %1534 = vmatmul.mubr.bf16.vlgmr.msra.gmra.mrb[0].mxu0 %v3100_v24  ;;  %v3103_v24 = vcombine.low %v4263_v21, %v4265_v22  ;;  %v475_v51 = vsel %vm4210_vm6, %v328_v40, %v474_v12  ;;  %v478_v52 = vsel %vm4163_vm2, %v329_v35, %v477_v25  ;;  %v1078_v54 = vrot.slane %v1076_v44, 1  ;;  %v3923_v21 = vld [vmem:[%s5176_s2 + $0x1d0] sm:$0xff]   ;;  %482 = vst [vmem:[#allocation2 + $0x38] sm:$0xf] %v481_v57  ;;  %v3921_v25 = vld [vmem:[%s5176_s2 + $0x60] sm:$0xff]   ;;  %v4379_v35 = vld [vmem:[%s5177_s0 + $0x38] sm:$0xff]  }
  0x36   :  { %3587 = vmatpush3.bf16.msra.mxu0 %v3895_v3  ;;  %3509 = vmatpush3.bf16.msra.mxu1 %v3897_v4  ;;  %476 = vst [vmem:[#allocation2 + $0x30] sm:$0xf] %v475_v51  ;;  %479 = vst [vmem:[#allocation2 + $0x34] sm:$0x1] %v478_v52  ;;  %v344_v22 = vor.u32 %v342_v33, %v341_v10  ;;  %v345_v56 = vrot.slane %v341_v10, 4  ;;  %v484_v58 = vsel %vm4163_vm2, %v337_v9, %v483_v34  ;;  %v3925_v4 = vld [vmem:[%s5176_s2 + $0x190] sm:$0xff]  }
  0x37   :  { %3588 = vmatprep.subr.bf16.mxu0 %v3908_v18  ;;  %3510 = vmatprep.subr.bf16.mxu1 %v3906_v17  ;;  %485 = vst [vmem:[#allocation2 + $0x3c] sm:$0x1] %v484_v58  ;;  %v1079_v61 = vor.u32 %v1078_v54, %v1074_v37  ;;  %v3359_v0 = vunpack.c.h.bf16 %v3415_v46  ;;  %v145_v1 = vsel %vm4163_vm2, 0, %v144_v47  ;;  %v200_v3 = vld [vmem:[#allocation2 + $0x6c] sm:$0x1]  ;;  %v148_v7 = vsel %vm4163_vm2, 0, %v147_v49 }
  0x38   :  { %v487_v5 = vsel %vm4210_vm6, %v344_v22, %v486_v41  ;;  %v490_v6 = vsel %vm4163_vm2, %v345_v56, %v489_v42  ;;  %146 = vst [vmem:[#allocation2 + $0x58] sm:$0x1] %v145_v1  ;;  %v195_v8 = vsel %vm4176_vm4, 0, %v194_v50  ;;  %v62_v16 = vmul.f32 %v3358_v63, %v4154_v26  ;;  %149 = vst [vmem:[#allocation2 + $0x60] sm:$0x1] %v148_v7  ;;  %v3417_v33 = vld [vmem:[%s5177_s0 + $0x30] sm:$0xff]  }
  0x39   :  { %v4351_v11 = vld [vmem:[#allocation2 + $0x28] sm:$0xf]  ;;  %v944_v12 = vld [vmem:[#allocation2 + $0x2c] sm:$0x1]  ;;  %488 = vst [vmem:[#allocation2 + $0x40] sm:$0xf] %v487_v5  ;;  %v3104_v15 = vcombine.low %v1072_v53, %v1079_v61  ;;  %v63_v17 = vmul.f32 %v3359_v0, %v4154_v26  ;;  %v3362_v18 = vunpack.c.l.bf16 %v3416_v59  ;;  %v3363_v23 = vunpack.c.h.bf16 %v3416_v59 }
  0x3a   :  { %3589 = vmatpush3.bf16.msra.mxu0 %v3910_v38  ;;  %v960_v13 = vld [vmem:[#allocation2 + $0x28] sm:$0xe]  ;;  %491 = vst [vmem:[#allocation2 + $0x44] sm:$0x1] %v490_v6  ;;  %3511 = vmatpush3.bf16.msra.mxu1 %v3907_v45  ;;  %196 = vst [vmem:[#allocation2 + $0x5c] sm:$0x1] %v195_v8  ;;  %v83_v28 = vadd.f32 %v4159_v27, %v62_v16  ;;  %v3366_v45 = vunpack.c.l.bf16 %v3417_v33  ;;  %v3367_v46 = vunpack.c.h.bf16 %v3417_v33  ;;  %v3370_v54 = vunpack.c.l.bf16 %v4379_v35 }
  0x3b   :  { %3590 = vmatprep.subr.bf16.mxu0 %v3923_v21  ;;  %v3040_v19 = vcombine.low %v960_v13, %v944_v12  ;;  %3512 = vmatprep.subr.bf16.mxu1 %v3911_v39  ;;  %v198_v20 = vsel %vm4176_vm4, 0, %v197_v55  ;;  %v84_v29 = vadd.f32 %v4159_v27, %v63_v17  ;;  %v64_v31 = vmul.f32 %v3362_v18, %v4154_v26  ;;  %v3922_v40 = vld [vmem:[%s5176_s2 + $0x20] sm:$0xff]   ;;  %v3926_v49 = vld [vmem:[%s5176_s2 + $0x68] sm:$0xff]   ;;  %v203_v53 = vld [vmem:[#allocation2 + $0x74] sm:$0x1] }
  0x3c   :  { %1541 = vmatprep.mubr.bf16.mxu0 %v3104_v15  ;;  %199 = vst [vmem:[#allocation2 + $0x64] sm:$0x1] %v198_v20  ;;  %v151_v32 = vsel %vm4163_vm2, 0, %v150_v60  ;;  %v65_v34 = vmul.f32 %v3363_v23, %v4154_v26  ;;  %v154_v37 = vsel %vm4163_vm2, 0, %v153_v2  ;;  %v201_v38 = vsel %vm4176_vm4, 0, %v200_v3 }
  0x3d   :  { %1542 = vmatmul.mubr.bf16.gmra.mrb[4].mxu0 %v3103_v24  ;;  %152 = vst [vmem:[#allocation2 + $0x68] sm:$0x1] %v151_v32  ;;  %v4381_v41 = vld [vmem:[#allocation2 + $0x30] sm:$0xf]  ;;  %v945_v42 = vld [vmem:[#allocation2 + $0x34] sm:$0x1]  ;;  %v85_v44 = vadd.f32 %v4159_v27, %v64_v31  ;;  %v4385_v47 = vcombine.low %v4351_v11, %v944_v12  ;;  %v4401_v57 = vmul.f32 %v3366_v45, %v4154_v26 }
  0x3e   :  { %v961_v43 = vld [vmem:[#allocation2 + $0x30] sm:$0xe]  ;;  %3513 = vmatpush3.bf16.msra.mxu1 %v3912_v62  ;;  %155 = vst [vmem:[#allocation2 + $0x70] sm:$0x1] %v154_v37  ;;  %202 = vst [vmem:[#allocation2 + $0x6c] sm:$0x1] %v201_v38  ;;  %3591 = vmatpush3.bf16.msra.mxu0 %v3925_v4  ;;  %v86_v39 = vadd.f32 %v4159_v27, %v65_v34  ;;  %v4396_v55 = vcombine.low %v4381_v41, %v945_v42 }
  0x3f   :  { %v3041_v48 = vcombine.low %v961_v43, %v945_v42  ;;  %v1216_v9 = vrot.slane %v3040_v19, 1  ;;  %v4387_v10 = vld [vmem:[#allocation2 + $0x3c] sm:$0x1]  ;;  %v962_v24 = vld [vmem:[#allocation2 + $0x38] sm:$0xe]  ;;  %3514 = vmatprep.subr.bf16.mxu1 %v3921_v25  ;;  %v99_v51 = vmax.f32 %v83_v28, 0.0  ;;  %v4407_v63 = vmul.f32 %v3367_v46, %v4154_v26 }
  0x40   :  { %v3042_v50 = vcombine.low %v962_v24, %v4387_v10  ;;  %v100_v52 = vmax.f32 %v84_v29, 0.0  ;;  %v101_v56 = vmax.f32 %v85_v44, 0.0  ;;  %v963_v58 = vld [vmem:[#allocation2 + $0x40] sm:$0xe]  ;;  %v3927_v62 = vld [vmem:[%s5176_s2 + $0x28] sm:$0xff]   ;;  %v102_v2 = vmax.f32 %v86_v39, 0.0 }
  0x41   :  { %v1217_v21 = vrot.slane %v3041_v48, 1  ;;  %v4398_v22 = vld [vmem:[#allocation2 + $0x44] sm:$0x1]  ;;  %v3332_v60 = vpack.c.bf16 %v99_v51, %v99_v51  ;;  %v204_v3 = vsel %vm4176_vm4, 0, %v203_v53  ;;  %v3936_v4 = vld [vmem:[%s5176_s2 + $0x70] sm:$0xff]   ;;  %v1081_v18 = vshrl.u32 %v4385_v47, 16 }
  0x42   :  { %v1218_v59 = vrot.slane %v3042_v50, 1  ;;  %v3333_v61 = vpack.c.bf16 %v100_v52, %v100_v52  ;;  %3515 = vmatpush3.bf16.msra.mxu1 %v3922_v40  ;;  %v3043_v1 = vcombine.low %v963_v58, %v4398_v22  ;;  %205 = vst [vmem:[#allocation2 + $0x74] sm:$0x1] %v204_v3  ;;  %v492_v13 = vld [vmem:[#allocation2 + $0x58] sm:$0xf]  ;;  %v3334_v16 = vpack.c.bf16 %v101_v56, %v101_v56  ;;  %v3937_v37 = vld [vmem:[%s5176_s2 + $0x30] sm:$0xff]  }
  0x43   :  { %v3108_v0 = vcombine.low %v1216_v9, %v1217_v21  ;;  %3516 = vmatprep.subr.bf16.mxu1 %v3926_v49  ;;  %v347_v5 = vshrl.u32 %v3332_v60, 16  ;;  %v350_v6 = vshll.u32 %v3332_v60, 16  ;;  %v495_v15 = vld [vmem:[#allocation2 + $0x5c] sm:$0x1]  ;;  %v3335_v17 = vpack.c.bf16 %v102_v2, %v102_v2  ;;  %v498_v23 = vld [vmem:[#allocation2 + $0x60] sm:$0xf] }
  0x44   :  { %v355_v7 = vshrl.u32 %v3333_v61, 16  ;;  %v358_v8 = vshll.u32 %v3333_v61, 16  ;;  %v1219_v12 = vrot.slane %v3043_v1, 1  ;;  %v1083_v25 = vshll.u32 %v4385_v47, 16  ;;  %v501_v31 = vld [vmem:[#allocation2 + $0x64] sm:$0x1] }
  0x45   :  { %3686 = vmatprep.mubr.bf16.mxu1 %v3108_v0  ;;  %v349_v19 = vrot.slane %v347_v5, 7  ;;  %v1088_v28 = vshrl.u32 %v4396_v55, 16  ;;  %v363_v32 = vshrl.u32 %v3334_v16, 16  ;;  %v366_v33 = vshll.u32 %v3334_v16, 16  ;;  %v504_v44 = vld [vmem:[#allocation2 + $0x68] sm:$0xf] }
  0x46   :  { %v357_v20 = vrot.slane %v355_v7, 7  ;;  %3517 = vmatpush3.bf16.msra.mxu1 %v3927_v62  ;;  %v3111_v29 = vcombine.low %v1218_v59, %v1219_v12  ;;  %v371_v34 = vshrl.u32 %v3335_v17, 16  ;;  %v507_v45 = vld [vmem:[#allocation2 + $0x6c] sm:$0x1]  ;;  %v374_v48 = vshll.u32 %v3335_v17, 16  ;;  %v3938_v7 = vld [vmem:[%s5176_s2 + $0x1d8] sm:$0xff]  }
  0x47   :  { %3518 = vmatprep.subr.bf16.mxu1 %v3936_v4  ;;  %v352_v38 = vor.u32 %v350_v6, %v349_v19  ;;  %v353_v40 = vrot.slane %v349_v19, 4  ;;  %v365_v46 = vrot.slane %v363_v32, 7  ;;  %v510_v9 = vld [vmem:[#allocation2 + $0x70] sm:$0xf]  ;;  %v1085_v24 = vrot.slane %v1083_v25, 1  ;;  %3592 = vmatprep.subr.bf16.mxu0 %v3938_v7  ;;  %v3940_v17 = vld [vmem:[%s5176_s2 + $0x198] sm:$0xff]  }
  0x48   :  { %v360_v42 = vor.u32 %v358_v8, %v357_v20  ;;  %v361_v43 = vrot.slane %v357_v20, 4  ;;  %3687 = vmatmul.mubr.bf16.gmra.mrb[4].mxu1 %v3111_v29  ;;  %v373_v47 = vrot.slane %v371_v34, 7  ;;  %v156_v39 = vld [vmem:[#allocation2 + $0x78] sm:$0x1]  ;;  %v159_v53 = vld [vmem:[#allocation2 + $0x80] sm:$0x1]  ;;  %v87_v2 = vadd.f32 %v4159_v27, %v4401_v57  ;;  %3593 = vmatpush3.bf16.msra.mxu0 %v3940_v17 }
  0x49   :  { %v493_v49 = vsel %vm4210_vm6, %v352_v38, %v492_v13  ;;  %v496_v50 = vsel %vm4163_vm2, %v353_v40, %v495_v15  ;;  %v206_v21 = vld [vmem:[#allocation2 + $0x7c] sm:$0x1]  ;;  %v209_v56 = vld [vmem:[#allocation2 + $0x84] sm:$0x1]  ;;  %v368_v58 = vor.u32 %v366_v33, %v365_v46  ;;  %v369_v59 = vrot.slane %v365_v46, 4 }
  0x4a   :  { %v499_v51 = vsel %vm4210_vm6, %v360_v42, %v498_v23  ;;  %v502_v52 = vsel %vm4163_vm2, %v361_v43, %v501_v31  ;;  %3519 = vmatpush3.bf16.msra.mxu1 %v3937_v37  ;;  %494 = vst [vmem:[#allocation2 + $0x58] sm:$0xf] %v493_v49  ;;  %497 = vst [vmem:[#allocation2 + $0x5c] sm:$0x1] %v496_v50  ;;  %v376_v60 = vor.u32 %v374_v48, %v373_v47  ;;  %v513_v62 = vld [vmem:[#allocation2 + $0x74] sm:$0x1] }
  0x4b   :  { %500 = vst [vmem:[#allocation2 + $0x60] sm:$0xf] %v499_v51  ;;  %503 = vst [vmem:[#allocation2 + $0x64] sm:$0x1] %v502_v52  ;;  %v377_v61 = vrot.slane %v373_v47, 4  ;;  %v1086_v0 = vor.u32 %v1085_v24, %v1081_v18  ;;  %v1090_v1 = vshll.u32 %v4396_v55, 16  ;;  %v88_v3 = vadd.f32 %v4159_v27, %v4407_v63 }
  0x4c   :  { %v162_v4 = vld [vmem:[#allocation2 + $0x88] sm:$0x1]  ;;  %v165_v5 = vld [vmem:[#allocation2 + $0x90] sm:$0x1]  ;;  %v212_v6 = vld [vmem:[#allocation2 + $0x8c] sm:$0x1]  ;;  %v505_v8 = vsel %vm4210_vm6, %v368_v58, %v504_v44  ;;  %v508_v12 = vsel %vm4163_vm2, %v369_v59, %v507_v45  ;;  %v511_v13 = vsel %vm4210_vm6, %v376_v60, %v510_v9  ;;  %v3371_v25 = vunpack.c.h.bf16 %v4379_v35 }
  0x4d   :  { %v514_v57 = vsel %vm4163_vm2, %v377_v61, %v513_v62  ;;  %506 = vst [vmem:[#allocation2 + $0x68] sm:$0xf] %v505_v8  ;;  %509 = vst [vmem:[#allocation2 + $0x6c] sm:$0x1] %v508_v12  ;;  %v1092_v27 = vrot.slane %v1090_v1, 1  ;;  %v103_v63 = vmax.f32 %v87_v2, 0.0  ;;  %v3106_v32 = vcombine.low %v4351_v11, %v4381_v41 }
  0x4e   :  { %512 = vst [vmem:[#allocation2 + $0x70] sm:$0xf] %v511_v13  ;;  %515 = vst [vmem:[#allocation2 + $0x74] sm:$0x1] %v514_v57  ;;  %v104_v15 = vmax.f32 %v88_v3, 0.0  ;;  %v157_v16 = vsel %vm4163_vm2, 0, %v156_v39  ;;  %v68_v34 = vmul.f32 %v3370_v54, %v4154_v26  ;;  %v69_v54 = vmul.f32 %v3371_v25, %v4154_v26 }
  0x4f   :  { %v3941_v18 = vld [vmem:[%s5176_s2 + $0x78] sm:$0xff]   ;;  %158 = vst [vmem:[#allocation2 + $0x78] sm:$0x1] %v157_v16  ;;  %v160_v19 = vsel %vm4163_vm2, 0, %v159_v53  ;;  %v207_v20 = vsel %vm4176_vm4, 0, %v206_v21  ;;  %v210_v23 = vsel %vm4176_vm4, 0, %v209_v56  ;;  %v1093_v31 = vor.u32 %v1092_v27, %v1088_v28 }
  0x50   :  { %v3942_v29 = vld [vmem:[%s5176_s2 + $0x38] sm:$0xff]   ;;  %161 = vst [vmem:[#allocation2 + $0x80] sm:$0x1] %v160_v19  ;;  %208 = vst [vmem:[#allocation2 + $0x7c] sm:$0x1] %v207_v20  ;;  %v3336_v33 = vpack.c.bf16 %v103_v63, %v103_v63  ;;  %v163_v37 = vsel %vm4163_vm2, 0, %v162_v4  ;;  %3520 = vmatprep.subr.bf16.mxu1 %v3941_v18  ;;  %v3337_v47 = vpack.c.bf16 %v104_v15, %v104_v15 }
  0x51   :  { %211 = vst [vmem:[#allocation2 + $0x84] sm:$0x1] %v210_v23  ;;  %v166_v38 = vsel %vm4163_vm2, 0, %v165_v5  ;;  %v213_v55 = vsel %vm4176_vm4, 0, %v212_v6  ;;  %v3946_v11 = vld [vmem:[%s5176_s2 + $0x1e0] sm:$0xff]   ;;  %v3107_v35 = vcombine.low %v1086_v0, %v1093_v31  ;;  %3521 = vmatpush3.bf16.msra.mxu1 %v3942_v29 }
  0x52   :  { %v4479_v41 = vld [vmem:[#allocation2 + $0x38] sm:$0xf]  ;;  %v4481_v28 = vld [vmem:[#allocation2 + $0x5c] sm:$0x1]  ;;  %164 = vst [vmem:[#allocation2 + $0x88] sm:$0x1] %v163_v37  ;;  %3594 = vmatprep.subr.bf16.mxu0 %v3946_v11 }
  0x53   :  { %167 = vst [vmem:[#allocation2 + $0x90] sm:$0x1] %v166_v38  ;;  %214 = vst [vmem:[#allocation2 + $0x8c] sm:$0x1] %v213_v55  ;;  %v4484_v40 = vld [vmem:[#allocation2 + $0x64] sm:$0x1]  ;;  %1549 = vmatprep.mubr.bf16.mxu0 %v3107_v35  ;;  %v4500_v50 = vcombine.low %v4479_v41, %v4387_v10 }
  0x54   :  { %v964_v42 = vld [vmem:[#allocation2 + $0x58] sm:$0xe]  ;;  %v965_v43 = vld [vmem:[#allocation2 + $0x60] sm:$0xe]  ;;  %v379_v48 = vshrl.u32 %v3336_v33, 16  ;;  %1550 = vmatmul.mubr.bf16.gmra.mrb[8].mxu0 %v3106_v32  ;;  %v382_v0 = vshll.u32 %v3336_v33, 16 }
  0x55   :  { %v4486_v44 = vld [vmem:[#allocation2 + $0x40] sm:$0xf]  ;;  %v3044_v45 = vcombine.low %v964_v42, %v4481_v28  ;;  %v3045_v46 = vcombine.low %v965_v43, %v4484_v40  ;;  %v4493_v9 = vld [vmem:[#allocation2 + $0x6c] sm:$0x1]  ;;  %v215_v49 = vld [vmem:[#allocation2 + $0x94] sm:$0x1] }
  0x56   :  { %v3948_v26 = vld [vmem:[%s5176_s2 + $0x1a0] sm:$0xff]   ;;  %v4502_v53 = vld [vmem:[#allocation2 + $0x74] sm:$0x1]  ;;  %v966_v21 = vld [vmem:[#allocation2 + $0x68] sm:$0xe]  ;;  %v4508_v59 = vcombine.low %v4486_v44, %v4398_v22  ;;  %v381_v62 = vrot.slane %v379_v48, 7 }
  0x57   :  { %v4051_v24 = vld [vmem:[%s5178_s1 + $0x1] ss:$0 sm:$0xff]  ;;  %v1220_v51 = vrot.slane %v3044_v45, 1  ;;  %v1221_v52 = vrot.slane %v3045_v46, 1  ;;  %3595 = vmatpush3.bf16.msra.mxu0 %v3948_v26  ;;  %v967_v60 = vld [vmem:[#allocation2 + $0x70] sm:$0xe]  ;;  %v3046_v61 = vcombine.low %v966_v21, %v4493_v9 }
  0x58   :  { %v89_v39 = vadd.f32 %v4051_v24, %v68_v34  ;;  %v90_v56 = vadd.f32 %v4051_v24, %v69_v54  ;;  %v4504_v58 = vld [vmem:[#allocation2] sm:$0xf]  ;;  %v556_v10 = vld [vmem:[#allocation2 + $0x4] sm:$0x1]  ;;  %v3047_v2 = vcombine.low %v967_v60, %v4502_v53  ;;  %v387_v3 = vshrl.u32 %v3337_v47, 16  ;;  %v3954_v22 = vld [vmem:[%s5176_s2 + $0x1e8] sm:$0xff]  }
  0x59   :  { %v3114_v1 = vcombine.low %v1220_v51, %v1221_v52  ;;  %v390_v4 = vshll.u32 %v3337_v47, 16  ;;  %v516_v5 = vld [vmem:[#allocation2 + $0x78] sm:$0xf]  ;;  %v519_v6 = vld [vmem:[#allocation2 + $0x7c] sm:$0x1]  ;;  %v1222_v7 = vrot.slane %v3046_v61, 1  ;;  %v384_v8 = vor.u32 %v382_v0, %v381_v62  ;;  %3596 = vmatprep.subr.bf16.mxu0 %v3954_v22 }
  0x5a   :  { %v385_v12 = vrot.slane %v381_v62, 4  ;;  %v105_v13 = vmax.f32 %v89_v39, 0.0  ;;  %v1223_v57 = vrot.slane %v3047_v2, 1  ;;  %v389_v27 = vrot.slane %v387_v3, 7  ;;  %v4517_v16 = vld [vmem:[#allocation2 + $0x58] sm:$0xf] }
  0x5b   :  { %3690 = vmatprep.mubr.bf16.mxu1 %v3114_v1  ;;  %v106_v63 = vmax.f32 %v90_v56, 0.0  ;;  %v216_v15 = vsel %vm4176_vm4, 0, %v215_v49  ;;  %v517_v17 = vsel %vm4210_vm6, %v384_v8, %v516_v5  ;;  %v522_v19 = vld [vmem:[#allocation2 + $0x80] sm:$0xf]  ;;  %v525_v20 = vld [vmem:[#allocation2 + $0x84] sm:$0x1]  ;;  %v4526_v29 = vcombine.low %v4504_v58, %v556_v10  ;;  %3597 = vmatpush3.bf16.msra.mxu0 %v3956_v36 }
  0x5c   :  { %v520_v18 = vsel %vm4163_vm2, %v385_v12, %v519_v6  ;;  %217 = vst [vmem:[#allocation2 + $0x94] sm:$0x1] %v216_v15  ;;  %v3338_v23 = vpack.c.bf16 %v105_v13, %v105_v13  ;;  %v4523_v25 = vld [vmem:[#allocation2 + $0x8] sm:$0xf]  ;;  %v3117_v31 = vcombine.low %v1222_v7, %v1223_v57  ;;  %v392_v32 = vor.u32 %v390_v4, %v389_v27  ;;  %v4531_v37 = vld [vmem:[#allocation2 + $0xc] sm:$0x1] }
  0x5d   :  { %v393_v33 = vrot.slane %v389_v27, 4  ;;  %518 = vst [vmem:[#allocation2 + $0x78] sm:$0xf] %v517_v17  ;;  %521 = vst [vmem:[#allocation2 + $0x7c] sm:$0x1] %v520_v18  ;;  %v3339_v34 = vpack.c.bf16 %v106_v63, %v106_v63  ;;  %v4536_v38 = vld [vmem:[%s5176_s2 + $0x80] sm:$0xff]   ;;  %v4558_v56 = vcombine.low %v4523_v25, %v4531_v37  ;;  %v3109_v57 = vcombine.low %v4479_v41, %v4486_v44 }
  0x5e   :  { %v395_v55 = vshrl.u32 %v3338_v23, 16  ;;  %v398_v11 = vshll.u32 %v3338_v23, 16  ;;  %v1095_v35 = vshrl.u32 %v4500_v50, 16  ;;  %v1097_v54 = vshll.u32 %v4500_v50, 16  ;;  %3691 = vmatmul.mubr.bf16.gmra.mrb[8].mxu1 %v3117_v31  ;;  %3698 = vmatprep.subr.bf16.mxu1 %v4536_v38  ;;  %v4545_v47 = vld [vmem:[#allocation2 + $0x60] sm:$0xf] }
  0x5f   :  { %v523_v42 = vsel %vm4210_vm6, %v392_v32, %v522_v19  ;;  %v526_v43 = vsel %vm4163_vm2, %v393_v33, %v525_v20  ;;  %v403_v45 = vshrl.u32 %v3339_v34, 16  ;;  %v406_v46 = vshll.u32 %v3339_v34, 16  ;;  %v3961_v49 = vld [vmem:[%s5176_s2 + $0x1f0] sm:$0xff]   ;;  %v528_v52 = vld [vmem:[#allocation2 + $0x88] sm:$0xf] }
  0x60   :  { %524 = vst [vmem:[#allocation2 + $0x80] sm:$0xf] %v523_v42  ;;  %527 = vst [vmem:[#allocation2 + $0x84] sm:$0x1] %v526_v43  ;;  %v397_v48 = vrot.slane %v395_v55, 7  ;;  %v1099_v26 = vrot.slane %v1097_v54, 1  ;;  %v4554_v50 = vcombine.low %v4517_v16, %v4481_v28  ;;  %3598 = vmatprep.subr.bf16.mxu0 %v3961_v49  ;;  %v3029_v63 = vcombine.low %v4545_v47, %v4484_v40 }
  0x61   :  { %v1102_v24 = vshrl.u32 %v4508_v59, 16  ;;  %v1104_v39 = vshll.u32 %v4508_v59, 16  ;;  %v405_v51 = vrot.slane %v403_v45, 7  ;;  %v531_v21 = vld [vmem:[#allocation2 + $0x8c] sm:$0x1]  ;;  %v669_v60 = vshrl.u32 %v4526_v29, 16 }
  0x62   :  { %v400_v61 = vor.u32 %v398_v11, %v397_v48  ;;  %v401_v62 = vrot.slane %v397_v48, 4  ;;  %v534_v59 = vld [vmem:[#allocation2 + $0x90] sm:$0xf]  ;;  %v1100_v0 = vor.u32 %v1099_v26, %v1095_v35  ;;  %v671_v4 = vshll.u32 %v4526_v29, 16  ;;  %v4574_v27 = vld [vmem:[#allocation2 + $0x14] sm:$0x1] }
  0x63   :  { %v1106_v10 = vrot.slane %v1104_v39, 1  ;;  %v4561_v1 = vld [vmem:[#allocation2 + $0x10] sm:$0xf]  ;;  %v408_v2 = vor.u32 %v406_v46, %v405_v51  ;;  %v409_v28 = vrot.slane %v405_v51, 4  ;;  %v537_v3 = vld [vmem:[#allocation2 + $0x94] sm:$0x1]  ;;  %v3112_v30 = vcombine.low %v4517_v16, %v4545_v47 }
  0x64   :  { %v1109_v5 = vshrl.u32 %v4554_v50, 16  ;;  %v3963_v6 = vld [vmem:[%s5176_s2 + $0x1b0] sm:$0xff]   ;;  %v952_v7 = vld [vmem:[#allocation2 + $0x7c] sm:$0x1]  ;;  %v968_v8 = vld [vmem:[#allocation2 + $0x78] sm:$0xe]  ;;  %v529_v12 = vsel %vm4210_vm6, %v400_v61, %v528_v52  ;;  %v532_v13 = vsel %vm4163_vm2, %v401_v62, %v531_v21  ;;  %v4597_v34 = vcombine.low %v4561_v1, %v4574_v27 }
  0x65   :  { %v1107_v22 = vor.u32 %v1106_v10, %v1102_v24  ;;  %v4578_v15 = vld [vmem:[#allocation2 + $0x68] sm:$0xf]  ;;  %v4580_v17 = vld [vmem:[#allocation2 + $0x70] sm:$0xf]  ;;  %v3048_v18 = vcombine.low %v968_v8, %v952_v7  ;;  %530 = vst [vmem:[#allocation2 + $0x88] sm:$0xf] %v529_v12  ;;  %v535_v19 = vsel %vm4210_vm6, %v408_v2, %v534_v59  ;;  %v538_v20 = vsel %vm4163_vm2, %v409_v28, %v537_v3 }
  0x66   :  { %533 = vst [vmem:[#allocation2 + $0x8c] sm:$0x1] %v532_v13  ;;  %v4586_v23 = vld [vmem:[#allocation2 + $0x18] sm:$0xf]  ;;  %v4588_v41 = vld [vmem:[#allocation2 + $0x1c] sm:$0x1]  ;;  %3599 = vmatpush3.bf16.msra.mxu0 %v3963_v6  ;;  %v3148_v42 = vcombine.low %v4504_v58, %v4523_v25  ;;  %v4611_v39 = vcombine.low %v4578_v15, %v4493_v9  ;;  %v4615_v49 = vcombine.low %v4580_v17, %v4502_v53 }
  0x67   :  { %536 = vst [vmem:[#allocation2 + $0x90] sm:$0xf] %v535_v19  ;;  %539 = vst [vmem:[#allocation2 + $0x94] sm:$0x1] %v538_v20  ;;  %v3110_v40 = vcombine.low %v1100_v0, %v1107_v22  ;;  %v678_v44 = vshll.u32 %v4558_v56, 16  ;;  %v1111_v36 = vshll.u32 %v4554_v50, 16  ;;  %v4607_v24 = vcombine.low %v4586_v23, %v4588_v41 }
  0x68   :  { %v953_v31 = vld [vmem:[#allocation2 + $0x84] sm:$0x1]  ;;  %v969_v32 = vld [vmem:[#allocation2 + $0x80] sm:$0xe]  ;;  %v673_v33 = vrot.slane %v671_v4, 1  ;;  %v676_v14 = vshrl.u32 %v4558_v56, 16  ;;  %v3115_v51 = vcombine.low %v4578_v15, %v4580_v17 }
  0x69   :  { %v4599_v55 = vld [vmem:[#allocation2 + $0x78] sm:$0xf]  ;;  %v3049_v11 = vcombine.low %v969_v32, %v953_v31  ;;  %v1224_v35 = vrot.slane %v3048_v18, 1  ;;  %1557 = vmatprep.mubr.bf16.mxu0 %v3110_v40  ;;  %v680_v54 = vrot.slane %v678_v44, 1  ;;  %v1113_v43 = vrot.slane %v1111_v36, 1 }
  0x6a   :  { %1558 = vmatmul.mubr.bf16.gmra.mrb[12].mxu0 %v3109_v57  ;;  %v1116_v45 = vshrl.u32 %v3029_v63, 16  ;;  %v1118_v46 = vshll.u32 %v3029_v63, 16  ;;  %v574_v48 = vld [vmem:[#allocation2 + $0x10] sm:$0xe]  ;;  %v4603_v26 = vld [vmem:[#allocation2 + $0x18] sm:$0xe]  ;;  %v4633_v10 = vcombine.low %v4599_v55, %v952_v7  ;;  %v674_v4 = vor.u32 %v673_v33, %v669_v60 }
  0x6b   :  { %v1225_v50 = vrot.slane %v3049_v11, 1  ;;  %v4619_v52 = vld [vmem:[#allocation2 + $0x20] sm:$0xf]  ;;  %v4621_v21 = vld [vmem:[#allocation2 + $0x28] sm:$0xf]  ;;  %v1114_v61 = vor.u32 %v1113_v43, %v1109_v5  ;;  %v683_v59 = vshrl.u32 %v4597_v34, 16  ;;  %v681_v5 = vor.u32 %v680_v54, %v676_v14 }
  0x6c   :  { %v4623_v56 = vld [vmem:[#allocation2 + $0x80] sm:$0xf]  ;;  %v1120_v62 = vrot.slane %v1118_v46, 1  ;;  %v685_v9 = vshll.u32 %v4597_v34, 16  ;;  %v4627_v0 = vld [vmem:[#allocation2 + $0x24] sm:$0x1]  ;;  %v3006_v19 = vcombine.low %v574_v48, %v4574_v27  ;;  %v3007_v29 = vcombine.low %v4603_v26, %v4588_v41 }
  0x6d   :  { %v3968_v53 = vld [vmem:[%s5176_s2 + $0x1f8] sm:$0xff]   ;;  %v3120_v2 = vcombine.low %v1224_v35, %v1225_v50  ;;  %v954_v28 = vld [vmem:[#allocation2 + $0x8c] sm:$0x1]  ;;  %v970_v3 = vld [vmem:[#allocation2 + $0x88] sm:$0xe]  ;;  %v690_v57 = vshrl.u32 %v4607_v24, 16  ;;  %v4648_v60 = vcombine.low %v4619_v52, %v4627_v0  ;;  %v3033_v27 = vcombine.low %v4623_v56, %v953_v31 }
  0x6e   :  { %v4637_v6 = vld [vmem:[#allocation2 + $0x2c] sm:$0x1]  ;;  %v955_v8 = vld [vmem:[#allocation2 + $0x94] sm:$0x1]  ;;  %v971_v12 = vld [vmem:[#allocation2 + $0x90] sm:$0xe]  ;;  %v3050_v13 = vcombine.low %v970_v3, %v954_v28  ;;  %v1121_v22 = vor.u32 %v1120_v62, %v1116_v45  ;;  %3600 = vmatprep.subr.bf16.mxu0 %v3968_v53  ;;  %v3149_v14 = vcombine.low %v674_v4, %v681_v5  ;;  %v3118_v58 = vcombine.low %v4599_v55, %v4623_v56 }
  0x6f   :  { %v692_v63 = vshll.u32 %v4607_v24, 16  ;;  %3694 = vmatprep.mubr.bf16.mxu1 %v3120_v2  ;;  %v4641_v7 = vld [vmem:[#allocation2 + $0x88] sm:$0xf]  ;;  %v3051_v18 = vcombine.low %v971_v12, %v955_v8  ;;  %v1123_v44 = vshrl.u32 %v4611_v39, 16  ;;  %v4653_v36 = vcombine.low %v4621_v21, %v4637_v6  ;;  %v3970_v32 = vld [vmem:[%s5176_s2 + $0x1b8] sm:$0xff]  }
  0x70   :  { %v1226_v20 = vrot.slane %v3050_v13, 1  ;;  %v3113_v40 = vcombine.low %v1114_v61, %v1121_v22  ;;  %v1125_v34 = vshll.u32 %v4611_v39, 16  ;;  %v4660_v11 = vld [vmem:[#allocation2 + $0x90] sm:$0xf]  ;;  %v687_v35 = vrot.slane %v685_v9, 1  ;;  %3601 = vmatpush3.bf16.msra.mxu0 %v3970_v32  ;;  %v4688_v13 = vld [vmem:[%s5176_s2 + $0x200] sm:$0xff]  }
  0x71   :  { %v1227_v33 = vrot.slane %v3051_v18, 1  ;;  %v694_v54 = vrot.slane %v692_v63, 1  ;;  %v1130_v43 = vshrl.u32 %v4615_v49, 16  ;;  %v1132_v45 = vshll.u32 %v4615_v49, 16  ;;  %v4672_v39 = vld [vmem:[#allocation2 + $0x30] sm:$0xf]  ;;  %3730 = vmatprep.subr.bf16.mxu0 %v4688_v13 }
  0x72   :  { %1565 = vmatprep.mubr.bf16.mxu0 %v3113_v40  ;;  %v4665_v46 = vcombine.low %v4641_v7, %v954_v28  ;;  %v4670_v31 = vrot.slane %v3006_v19, 1  ;;  %v1127_v24 = vrot.slane %v1125_v34, 1  ;;  %v4674_v50 = vld [vmem:[#allocation2 + $0x38] sm:$0xf]  ;;  %v699_v62 = vshll.u32 %v4648_v60, 16  ;;  %v3967_v32 = vld [vmem:[%s5176_s2 + $0x88] sm:$0xff]  }
  0x73   :  { %v3123_v48 = vcombine.low %v1226_v20, %v1227_v33  ;;  %1566 = vmatmul.mubr.bf16.gmra.mrb[16].mxu0 %v3112_v30  ;;  %v1134_v61 = vrot.slane %v1132_v45, 1  ;;  %v706_v49 = vshll.u32 %v4653_v36, 16  ;;  %v1137_v9 = vshrl.u32 %v4633_v10, 16  ;;  %v4679_v53 = vld [vmem:[#allocation2 + $0x34] sm:$0x1] }
  0x74   :  { %v1128_v2 = vor.u32 %v1127_v24, %v1123_v44  ;;  %v1139_v16 = vshll.u32 %v4633_v10, 16  ;;  %v1144_v47 = vshrl.u32 %v3033_v27, 16  ;;  %v1146_v30 = vshll.u32 %v3033_v27, 16  ;;  %v4682_v28 = vld [vmem:[#allocation2 + $0x3c] sm:$0x1] }
  0x75   :  { %3695 = vmatmul.mubr.bf16.gmra.mrb[12].mxu1 %v3123_v48  ;;  %v688_v3 = vor.u32 %v687_v35, %v683_v59  ;;  %v695_v4 = vor.u32 %v694_v54, %v690_v57  ;;  %v1135_v5 = vor.u32 %v1134_v61, %v1130_v43  ;;  %v697_v12 = vshrl.u32 %v4648_v60, 16  ;;  %v4709_v34 = vld [vmem:[#allocation2 + $0x54] sm:$0x1]  ;;  %v4714_v45 = vld [vmem:[#allocation2 + $0x58] sm:$0xf] }
  0x76   :  { %1919 = vmatprep.mubr.bf16.mxu1 %v3149_v14  ;;  %v3035_v22 = vcombine.low %v4660_v11, %v955_v8  ;;  %v1141_v63 = vrot.slane %v1139_v16, 1  ;;  %v1148_v18 = vrot.slane %v1146_v30, 1  ;;  %v4693_v10 = vcombine.low %v4672_v39, %v4679_v53  ;;  %v4707_v14 = vld [vmem:[#allocation2 + $0x50] sm:$0xf]  ;;  %v4716_v48 = vld [vmem:[#allocation2 + $0x5c] sm:$0x1] }
  0x77   :  { %v3116_v19 = vcombine.low %v1128_v2, %v1135_v5  ;;  %v701_v20 = vrot.slane %v699_v62, 1  ;;  %v704_v59 = vshrl.u32 %v4653_v36, 16  ;;  %v4698_v57 = vcombine.low %v4674_v50, %v4682_v28  ;;  %v4744_v26 = vld [vmem:[#allocation2 + $0x14] sm:$0x1] }
  0x78   :  { %v708_v60 = vrot.slane %v706_v49, 1  ;;  %v1142_v40 = vor.u32 %v1141_v63, %v1137_v9  ;;  %v1149_v44 = vor.u32 %v1148_v18, %v1144_v47  ;;  %v1151_v8 = vshrl.u32 %v4665_v46, 16 }
  0x79   :  { %v3152_v27 = vcombine.low %v688_v3, %v695_v4  ;;  %1573 = vmatprep.mubr.bf16.mxu0 %v3116_v19  ;;  %v713_v33 = vshll.u32 %v4693_v10, 16  ;;  %v1153_v36 = vshll.u32 %v4665_v46, 16  ;;  %v1158_v54 = vshrl.u32 %v3035_v22, 16  ;;  %v4762_v19 = vld [vmem:[#allocation2 + $0x60] sm:$0xf] }
  0x7a   :  { %v3119_v35 = vcombine.low %v1142_v40, %v1149_v44  ;;  %v1160_v43 = vshll.u32 %v3035_v22, 16  ;;  %v3151_v24 = vcombine.low %v4561_v1, %v4586_v23  ;;  %v720_v46 = vshll.u32 %v4698_v57, 16  ;;  %v4733_v1 = vld [vmem:[#allocation2 + $0x10] sm:$0xf]  ;;  %v4735_v23 = vld [vmem:[#allocation2 + $0x18] sm:$0xf] }
  0x7b   :  { %1574 = vmatmul.mubr.bf16.gmra.mrb[20].mxu0 %v3115_v51  ;;  %v1155_v61 = vrot.slane %v1153_v36, 1  ;;  %v4727_v15 = vrot.slane %v3007_v29, 1  ;;  %v702_v17 = vor.u32 %v701_v20, %v697_v12  ;;  %v4731_v62 = vcombine.low %v4707_v14, %v4709_v34  ;;  %v4746_v29 = vld [vmem:[#allocation2 + $0x1c] sm:$0x1] }
  0x7c   :  { %1581 = vmatprep.mubr.bf16.mxu0 %v3119_v35  ;;  %v1162_v51 = vrot.slane %v1160_v43, 1  ;;  %v709_v49 = vor.u32 %v708_v60, %v704_v59  ;;  %v711_v25 = vshrl.u32 %v4693_v10, 16  ;;  %v715_v9 = vrot.slane %v713_v33, 1  ;;  %v3982_v22 = vld [vmem:[%s5176_s2 + $0x98] sm:$0xff]   ;;  %v4778_v43 = vld [vmem:[#allocation2 + $0x68] sm:$0xf] }
  0x7d   :  { %1920 = vmatmul.mubr.bf16.vlgmr.msra.gmra.mrb[16].mxu1 %v3148_v42  ;;  %v1156_v41 = vor.u32 %v1155_v61, %v1151_v8  ;;  %v3974_v42 = vld [vmem:[%s5176_s2 + $0x90] sm:$0xff]   ;;  %v718_v2 = vshrl.u32 %v4698_v57, 16  ;;  %v3196_v55 = vcombine.low %v4733_v1, %v4744_v26  ;;  %v4753_v56 = vcombine.low %v4714_v45, %v4716_v48  ;;  %v4765_v57 = vld [vmem:[#allocation2 + $0x20] sm:$0xf]  ;;  %v4770_v8 = vld [vmem:[#allocation2 + $0x64] sm:$0x1] }
  0x7e   :  { %1927 = vmatprep.mubr.bf16.mxu1 %v3152_v27  ;;  %3699 = vmatpush3.bf16.msra.mxu1 %v4536_v38  ;;  %v1163_v16 = vor.u32 %v1162_v51, %v1158_v54  ;;  %v722_v38 = vrot.slane %v720_v46, 1  ;;  %v725_v47 = vshrl.u32 %v4731_v62, 16  ;;  %v3197_v30 = vcombine.low %v4735_v23, %v4746_v29  ;;  %v4780_v61 = vld [vmem:[#allocation2 + $0x6c] sm:$0x1]  ;;  %v2117_v51 = vld [vmem:[#allocation2 + $0x28] sm:$0xe] }
  0x7f   :  { %3700 = vmatprep.subr.bf16.mxu1 %v3967_v32  ;;  %v727_v4 = vshll.u32 %v4731_v62, 16  ;;  %v2211_v5 = vshrl.u32 %v3196_v55, 16  ;;  %v2213_v12 = vshll.u32 %v3196_v55, 16  ;;  %v3155_v63 = vcombine.low %v702_v17, %v709_v49  ;;  %v2116_v17 = vld [vmem:[#allocation2 + $0x20] sm:$0xe] }
  0x80   :  { %v3122_v3 = vcombine.low %v1156_v41, %v1163_v16  ;;  %v2218_v18 = vshrl.u32 %v3197_v30, 16  ;;  %v2220_v10 = vshll.u32 %v3197_v30, 16  ;;  %v732_v20 = vshrl.u32 %v4753_v56, 16  ;;  %v3992_v41 = vld [vmem:[%s5176_s2 + $0xa0] sm:$0xff]   ;;  %v4918_v27 = vld [vmem:[#allocation2 + $0x70] sm:$0xf] }
  0x81   :  { %v2215_v59 = vrot.slane %v2213_v12, 1  ;;  %v3154_v60 = vcombine.low %v4619_v52, %v4621_v21  ;;  %v734_v40 = vshll.u32 %v4753_v56, 16  ;;  %v716_v33 = vor.u32 %v715_v9, %v711_v25  ;;  %v2100_v52 = vld [vmem:[#allocation2 + $0x24] sm:$0x1]  ;;  %v2101_v21 = vld [vmem:[#allocation2 + $0x2c] sm:$0x1] }
  0x82   :  { %3701 = vmatpush3.bf16.msra.mxu1 %v3967_v32  ;;  %v2222_v44 = vrot.slane %v2220_v10, 1  ;;  %v4772_v32 = vld [vmem:[#allocation2 + $0x28] sm:$0xf]  ;;  %v723_v36 = vor.u32 %v722_v38, %v718_v2  ;;  %v3121_v35 = vcombine.low %v4641_v7, %v4660_v11  ;;  %v3198_v49 = vcombine.low %v4765_v57, %v2100_v52  ;;  %v4804_v10 = vld [vmem:[#allocation2 + $0x78] sm:$0xf]  ;;  %v4001_v56 = vld [vmem:[%s5176_s2 + $0xb0] sm:$0xff]  }
  0x83   :  { %1582 = vmatmul.mubr.bf16.gmra.mrb[24].mxu0 %v3118_v58  ;;  %3702 = vmatprep.subr.bf16.mxu1 %v3974_v42  ;;  %v2216_v54 = vor.u32 %v2215_v59, %v2211_v5  ;;  %v729_v58 = vrot.slane %v727_v4, 1  ;;  %v4786_v7 = vcombine.low %v4762_v19, %v4770_v8  ;;  %v3214_v11 = vcombine.low %v2116_v17, %v2100_v52  ;;  %v4797_v4 = vld [vmem:[#allocation2 + $0x70] sm:$0xf]  ;;  %v3997_v5 = vld [vmem:[%s5176_s2 + $0xa8] sm:$0xff]   ;;  %v4806_v59 = vld [vmem:[#allocation2 + $0x74] sm:$0x1] }
  0x84   :  { %1589 = vmatprep.mubr.bf16.mxu0 %v3122_v3  ;;  %v2223_v46 = vor.u32 %v2222_v44, %v2218_v18  ;;  %v3215_v25 = vcombine.low %v2117_v51, %v2101_v21  ;;  %v2225_v2 = vshrl.u32 %v3198_v49, 16  ;;  %v2227_v16 = vshll.u32 %v3198_v49, 16  ;;  %v4826_v51 = vld [vmem:[#allocation2 + $0x3c] sm:$0x1] }
  0x85   :  { %1928 = vmatmul.mubr.bf16.gmra.mrb[20].mxu1 %v3151_v24  ;;  %v3199_v24 = vcombine.low %v4772_v32, %v2101_v21  ;;  %v4793_v55 = vcombine.low %v4778_v43, %v4780_v61  ;;  %v4795_v3 = vrot.slane %v3214_v11, 1  ;;  %v3158_v12 = vcombine.low %v716_v33, %v723_v36  ;;  %v4817_v21 = vld [vmem:[#allocation2 + $0x38] sm:$0xf] }
  0x86   :  { %1935 = vmatprep.mubr.bf16.mxu1 %v3155_v63  ;;  %3703 = vmatpush3.bf16.msra.mxu1 %v3974_v42  ;;  %v736_v42 = vrot.slane %v734_v40, 1  ;;  %v3277_v9 = vcombine.low %v2216_v54, %v2223_v46  ;;  %v2229_v63 = vrot.slane %v2227_v16, 1  ;;  %v4802_v18 = vrot.slane %v3215_v25, 1  ;;  %v4809_v54 = vld [vmem:[#allocation2 + $0x30] sm:$0xf] }
  0x87   :  { %3704 = vmatprep.subr.bf16.mxu1 %v3982_v22  ;;  %v2232_v38 = vshrl.u32 %v3199_v24, 16  ;;  %v2234_v30 = vshll.u32 %v3199_v24, 16  ;;  %5195 = vst [vmem:[#allocation3_spill] sm:$0xff] %v4795_v3  ;;  %v741_v40 = vshll.u32 %v4786_v7, 16  ;;  %v3157_v52 = vcombine.low %v4672_v39, %v4674_v50  ;;  %v4819_v46 = vld [vmem:[#allocation2 + $0x34] sm:$0x1] }
  0x88   :  { %5196 = vst [vmem:[#allocation4_spill] sm:$0xff] %v4802_v18  ;;  %v3276_v33 = vcombine.low %v4733_v1, %v4735_v23  ;;  %v2230_v36 = vor.u32 %v2229_v63, %v2225_v2  ;;  %v730_v17 = vor.u32 %v729_v58, %v725_v47  ;;  %v748_v39 = vshll.u32 %v4793_v55, 16 }
  0x89   :  { %v2236_v44 = vrot.slane %v2234_v30, 1  ;;  %v3200_v1 = vcombine.low %v4809_v54, %v4819_v46  ;;  %v737_v23 = vor.u32 %v736_v42, %v732_v20  ;;  %v4834_v49 = vcombine.low %v4797_v4, %v4806_v59 }
  0x8a   :  { %3705 = vmatpush3.bf16.msra.mxu1 %v3982_v22  ;;  %v4815_v22 = vld [vmem:[#allocation2 + $0x7c] sm:$0x1]  ;;  %v3201_v62 = vcombine.low %v4817_v21, %v4826_v51  ;;  %v739_v47 = vshrl.u32 %v4786_v7, 16  ;;  %v746_v42 = vshrl.u32 %v4793_v55, 16  ;;  %v4850_v7 = vld [vmem:[%s5176_s2 + $0x208] sm:$0xff]  }
  0x8b   :  { %1590 = vmatmul.mubr.bf16.gmra.mrb[28].mxu0 %v3121_v35  ;;  %3706 = vmatprep.subr.bf16.mxu1 %v3992_v41  ;;  %v2237_v50 = vor.u32 %v2236_v44, %v2232_v38  ;;  %v4841_v24 = vcombine.low %v4804_v10, %v4815_v22  ;;  %v2241_v58 = vshll.u32 %v3200_v1, 16  ;;  %v2239_v11 = vshrl.u32 %v3200_v1, 16  ;;  %v4006_v38 = vld [vmem:[%s5176_s2 + $0xb8] sm:$0xff]   ;;  %v4859_v44 = vld [vmem:[#allocation2 + $0x48] sm:$0xf] }
  0x8c   :  { %2691 = vmatprep.mubr.bf16.mxu0 %v3277_v9  ;;  %v2246_v25 = vshrl.u32 %v3201_v62, 16  ;;  %v750_v9 = vrot.slane %v748_v39, 1  ;;  %v753_v2 = vshrl.u32 %v4834_v49, 16  ;;  %v3161_v30 = vcombine.low %v730_v17, %v737_v23  ;;  %v4866_v23 = vld [vmem:[#allocation2 + $0x4c] sm:$0x1] }
  0x8d   :  { %1936 = vmatmul.mubr.bf16.gmra.mrb[24].mxu1 %v3154_v60  ;;  %v743_v60 = vrot.slane %v741_v40, 1  ;;  %v3280_v20 = vcombine.low %v2230_v36, %v2237_v50  ;;  %v2243_v16 = vrot.slane %v2241_v58, 1  ;;  %v4857_v40 = vld [vmem:[#allocation2 + $0x40] sm:$0xf]  ;;  %v4861_v36 = vld [vmem:[#allocation2 + $0x44] sm:$0x1] }
  0x8e   :  { %1943 = vmatprep.mubr.bf16.mxu1 %v3158_v12  ;;  %3707 = vmatpush3.bf16.msra.mxu1 %v3992_v41  ;;  %v2248_v41 = vshll.u32 %v3201_v62, 16  ;;  %v755_v12 = vshll.u32 %v4834_v49, 16  ;;  %5197 = vst [vmem:[#allocation5_spill] sm:$0xff] %v4861_v36  ;;  %v760_v39 = vshrl.u32 %v4841_v24, 16  ;;  %v762_v17 = vshll.u32 %v4841_v24, 16  ;;  %5198 = vst [vmem:[#allocation6_spill] sm:$0xff] %v4866_v23 }
  0x8f   :  { %3708 = vmatprep.subr.bf16.mxu1 %v3997_v5  ;;  %v744_v55 = vor.u32 %v743_v60, %v739_v47  ;;  %v2244_v50 = vor.u32 %v2243_v16, %v2239_v11  ;;  %v4874_v62 = vld [vmem:[#allocation2 + $0x80] sm:$0xf]  ;;  %v3202_v47 = vcombine.low %v4857_v40, %v4861_v36  ;;  %v3203_v60 = vcombine.low %v4859_v44, %v4866_v23  ;;  %v4880_v24 = vld [vmem:[#allocation2 + $0x88] sm:$0xf]  ;;  %v4886_v11 = vld [vmem:[#allocation2 + $0x8c] sm:$0x1] }
  0x90   :  { %v2250_v63 = vrot.slane %v2248_v41, 1  ;;  %v757_v58 = vrot.slane %v755_v12, 1  ;;  %v4894_v12 = vld [vmem:[#allocation2 + $0x68] sm:$0xf]  ;;  %v4896_v35 = vld [vmem:[#allocation2 + $0x64] sm:$0x1] }
  0x91   :  { %v2262_v16 = vshll.u32 %v3203_v60, 16  ;;  %v4920_v23 = vld [vmem:[#allocation2 + $0x78] sm:$0xf]  ;;  %v4929_v49 = vld [vmem:[%s5176_s2 + $0x220] sm:$0xff]  }
  0x92   :  { %3709 = vmatpush3.bf16.msra.mxu1 %v3997_v5  ;;  %v2251_v1 = vor.u32 %v2250_v63, %v2246_v25  ;;  %v751_v5 = vor.u32 %v750_v9, %v746_v42  ;;  %v2255_v25 = vshll.u32 %v3202_v47, 16  ;;  %v2253_v42 = vshrl.u32 %v3202_v47, 16 }
  0x93   :  { %2692 = vmatmul.mubr.bf16.vlgmr.msra.gmra.mrb[32].mxu0 %v3276_v33  ;;  %3710 = vmatprep.subr.bf16.mxu1 %v4001_v56  ;;  %v4872_v33 = vld [vmem:[%s5176_s2 + $0x210] sm:$0xff]   ;;  %v2260_v9 = vshrl.u32 %v3203_v60, 16  ;;  %v2264_v47 = vrot.slane %v2262_v16, 1  ;;  %v4902_v60 = vld [vmem:[#allocation2 + $0x6c] sm:$0x1] }
  0x94   :  { %3731 = vmatpush3.bf16.msra.mxu0 %v4688_v13  ;;  %2699 = vmatprep.mubr.bf16.mxu0 %v3280_v20  ;;  %v4884_v20 = vld [vmem:[#allocation2 + $0x84] sm:$0x1]  ;;  %v3283_v41 = vcombine.low %v2244_v50, %v2251_v1  ;;  %v3164_v63 = vcombine.low %v744_v55, %v751_v5  ;;  %v3003_v1 = vcombine.low %v4880_v24, %v4886_v11 }
  0x95   :  { %1944 = vmatmul.mubr.bf16.gmra.mrb[28].mxu1 %v3157_v52  ;;  %3732 = vmatprep.subr.bf16.mxu0 %v4850_v7  ;;  %v3279_v52 = vcombine.low %v4765_v57, %v4772_v32  ;;  %v764_v57 = vrot.slane %v762_v17, 1  ;;  %v2257_v32 = vrot.slane %v2255_v25, 1  ;;  %v3002_v50 = vcombine.low %v4874_v62, %v4884_v20 }
  0x96   :  { %1951 = vmatprep.mubr.bf16.mxu1 %v3161_v30  ;;  %3711 = vmatpush3.bf16.msra.mxu1 %v4001_v56  ;;  %v4889_v30 = vld [vmem:[#allocation2 + $0x60] sm:$0xf]  ;;  %v3160_v56 = vcombine.low %v4707_v14, %v4714_v45  ;;  %v4909_v45 = vld [vmem:[%s5176_s2 + $0x218] sm:$0xff]   ;;  %v3205_v55 = vcombine.low %v4894_v12, %v4902_v60  ;;  %v2265_v17 = vor.u32 %v2264_v47, %v2260_v9  ;;  %v776_v3 = vshll.u32 %v3003_v1, 16 }
  0x97   :  { %3712 = vmatprep.subr.bf16.mxu1 %v4006_v38  ;;  %v3204_v14 = vcombine.low %v4889_v30, %v4896_v35  ;;  %v765_v25 = vor.u32 %v764_v57, %v760_v39  ;;  %v769_v18 = vshll.u32 %v3002_v50, 16  ;;  %v767_v47 = vshrl.u32 %v3002_v50, 16  ;;  %v4959_v50 = vld [vmem:[%s5176_s2 + $0x230] sm:$0xff]  }
  0x98   :  { %3733 = vmatpush3.bf16.msra.mxu0 %v4850_v7  ;;  %v2276_v16 = vshll.u32 %v3205_v55, 16  ;;  %v778_v36 = vrot.slane %v776_v3, 1  ;;  %v4952_v3 = vld [vmem:[#allocation2 + $0x84] sm:$0x1] }
  0x99   :  { %3734 = vmatprep.subr.bf16.mxu0 %v4872_v33  ;;  %v2269_v5 = vshll.u32 %v3204_v14, 16  ;;  %v2267_v9 = vshrl.u32 %v3204_v14, 16  ;;  %v771_v14 = vrot.slane %v769_v18, 1  ;;  %v4954_v18 = vld [vmem:[#allocation2 + $0x8c] sm:$0x1] }
  0x9a   :  { %3713 = vmatpush3.bf16.msra.mxu1 %v4006_v38  ;;  %v2258_v38 = vor.u32 %v2257_v32, %v2253_v42  ;;  %v3282_v42 = vcombine.low %v4809_v54, %v4817_v21  ;;  %v2278_v57 = vrot.slane %v2276_v16, 1  ;;  %v3163_v21 = vcombine.low %v4762_v19, %v4778_v43  ;;  %v4947_v19 = vld [vmem:[#allocation2 + $0x80] sm:$0xf]  ;;  %v4950_v43 = vld [vmem:[#allocation2 + $0x88] sm:$0xf] }
  0x9b   :  { %2700 = vmatmul.mubr.bf16.gmra.mrb[36].mxu0 %v3279_v52  ;;  %3762 = vmatprep.subr.bf16.mxu1 %v4688_v13  ;;  %v758_v52 = vor.u32 %v757_v58, %v753_v2  ;;  %v4931_v2 = vld [vmem:[#allocation2 + $0x7c] sm:$0x1] }
  0x9c   :  { %2707 = vmatprep.mubr.bf16.mxu0 %v3283_v41  ;;  %3735 = vmatpush3.bf16.msra.mxu0 %v4872_v33  ;;  %v4922_v41 = vld [vmem:[#allocation2 + $0x74] sm:$0x1]  ;;  %5200 = vst [vmem:[#allocation8_spill] sm:$0xff] %v4931_v2  ;;  %v3286_v58 = vcombine.low %v2258_v38, %v2265_v17  ;;  %v3207_v54 = vcombine.low %v4920_v23, %v4931_v2  ;;  %v4944_v17 = vld [vmem:[%s5176_s2 + $0x228] sm:$0xff]  }
  0x9d   :  { %1952 = vmatmul.mubr.bf16.gmra.mrb[32].mxu1 %v3160_v56  ;;  %3736 = vmatprep.subr.bf16.mxu0 %v4909_v45  ;;  %5199 = vst [vmem:[#allocation7_spill] sm:$0xff] %v4922_v41  ;;  %v2274_v56 = vshrl.u32 %v3205_v55, 16  ;;  %v3206_v39 = vcombine.low %v4918_v27, %v4922_v41  ;;  %v3167_v32 = vcombine.low %v758_v52, %v765_v25  ;;  %v774_v55 = vshrl.u32 %v3003_v1, 16 }
  0x9e   :  { %1959 = vmatprep.mubr.bf16.mxu1 %v3164_v63  ;;  %v2271_v63 = vrot.slane %v2269_v5, 1  ;;  %v2290_v38 = vshll.u32 %v3207_v54, 16  ;;  %v772_v1 = vor.u32 %v771_v14, %v767_v47  ;;  %v3285_v25 = vcombine.low %v4857_v40, %v4859_v44  ;;  %v4052_v44 = vld [vmem:[#allocation2 + $0x4] sm:$0x1]  ;;  %v4975_v14 = vld [vmem:[%s5176_s2 + $0x238] sm:$0xff]  }
  0x9f   :  { %v2283_v41 = vshll.u32 %v3206_v39, 16  ;;  %v2279_v16 = vor.u32 %v2278_v57, %v2274_v56  ;;  %v779_v52 = vor.u32 %v778_v36, %v774_v55  ;;  %v2281_v56 = vshrl.u32 %v3206_v39, 16 }
  0xa0   :  { %3737 = vmatpush3.bf16.msra.mxu0 %v4909_v45  ;;  %v2272_v5 = vor.u32 %v2271_v63, %v2267_v9  ;;  %v573_v9 = vld [vmem:[#allocation2 + $0x8] sm:$0xe]  ;;  %v2288_v63 = vshrl.u32 %v3207_v54, 16  ;;  %v2292_v57 = vrot.slane %v2290_v38, 1  ;;  %v3208_v2 = vcombine.low %v4947_v19, %v4952_v3 }
  0xa1   :  { %3738 = vmatprep.subr.bf16.mxu0 %v4929_v49  ;;  %v3166_v36 = vcombine.low %v4797_v4, %v4804_v10  ;;  %v3170_v40 = vcombine.low %v772_v1, %v779_v52  ;;  %v4978_v4 = vld [vmem:[#allocation2 + $0x90] sm:$0xf]  ;;  %v4980_v10 = vld [vmem:[#allocation2 + $0x98] sm:$0xf] }
  0xa2   :  { %v2293_v47 = vor.u32 %v2292_v57, %v2288_v63  ;;  %v2297_v55 = vshll.u32 %v3208_v2, 16  ;;  %v2114_v52 = vld [vmem:[#allocation2 + $0x10] sm:$0xe]  ;;  %v2295_v63 = vshrl.u32 %v3208_v2, 16 }
  0xa3   :  { %2708 = vmatmul.mubr.bf16.gmra.mrb[40].mxu0 %v3282_v42  ;;  %v572_v42 = vld [vmem:[#allocation2] sm:$0xe] }
  0xa4   :  { %2715 = vmatprep.mubr.bf16.mxu0 %v3286_v58  ;;  %3739 = vmatpush3.bf16.msra.mxu0 %v4929_v49  ;;  %v2285_v58 = vrot.slane %v2283_v41, 1  ;;  %v3004_v39 = vcombine.low %v572_v42, %v4052_v44  ;;  %v3005_v41 = vcombine.low %v573_v9, %v4531_v37  ;;  %v4984_v37 = vld [vmem:[#allocation2 + $0x9c] sm:$0x1]  ;;  %v3288_v42 = vcombine.low %v4889_v30, %v4894_v12  ;;  %v576_v9 = vld [vmem:[#allocation2 + $0x20] sm:$0xe] }
  0xa5   :  { %1960 = vmatmul.mubr.bf16.gmra.mrb[36].mxu1 %v3163_v21  ;;  %3740 = vmatprep.subr.bf16.mxu0 %v4944_v17  ;;  %v3289_v21 = vcombine.low %v2272_v5, %v2279_v16  ;;  %v4982_v5 = vld [vmem:[#allocation2 + $0x94] sm:$0x1]  ;;  %5202 = vst [vmem:[#allocation10_spill] sm:$0xff] %v4984_v37  ;;  %v3212_v30 = vcombine.low %v2114_v52, %v4744_v26 }
  0xa6   :  { %1967 = vmatprep.mubr.bf16.mxu1 %v3167_v32  ;;  %v3209_v32 = vcombine.low %v4950_v43, %v4954_v18  ;;  %v2286_v54 = vor.u32 %v2285_v58, %v2281_v56  ;;  %5201 = vst [vmem:[#allocation9_spill] sm:$0xff] %v4982_v5  ;;  %v828_v16 = vrot.slane %v3004_v39, 1  ;;  %v829_v1 = vrot.slane %v3005_v41, 1  ;;  %v577_v56 = vld [vmem:[#allocation2 + $0x28] sm:$0xe] }
  0xa7   :  { %v3210_v44 = vcombine.low %v4978_v4, %v4982_v5  ;;  %v3169_v39 = vcombine.low %v4874_v62, %v4880_v24  ;;  %v3008_v2 = vcombine.low %v576_v9, %v4627_v0  ;;  %v578_v0 = vld [vmem:[#allocation2 + $0x30] sm:$0xe]  ;;  %v579_v24 = vld [vmem:[#allocation2 + $0x38] sm:$0xe] }
  0xa8   :  { %3741 = vmatpush3.bf16.msra.mxu0 %v4944_v17  ;;  %v2304_v38 = vshll.u32 %v3209_v32, 16  ;;  %v3292_v58 = vcombine.low %v2286_v54, %v2293_v47  ;;  %v2302_v57 = vshrl.u32 %v3209_v32, 16  ;;  %v3150_v41 = vcombine.low %v828_v16, %v829_v1  ;;  %v580_v16 = vld [vmem:[#allocation2 + $0x50] sm:$0xe]  ;;  %v581_v1 = vld [vmem:[#allocation2 + $0x58] sm:$0xe] }
  0xa9   :  { %3742 = vmatprep.subr.bf16.mxu0 %v4959_v50  ;;  %v3009_v32 = vcombine.low %v577_v56, %v4637_v6  ;;  %v5000_v54 = vrot.slane %v3212_v30, 1  ;;  %v3291_v6 = vcombine.low %v4918_v27, %v4920_v23  ;;  %v2309_v52 = vshrl.u32 %v3210_v44, 16  ;;  %v585_v30 = vld [vmem:[#allocation2 + $0x78] sm:$0xe] }
  0xaa   :  { %v5203_v23 = vcombine.low %v4670_v31, %v4727_v15 }
  0xab   :  { %2716 = vmatmul.mubr.bf16.gmra.mrb[44].mxu0 %v3285_v25  ;;  %v2115_v25 = vld [vmem:[#allocation2 + $0x18] sm:$0xe]  ;;  %v833_v62 = vrot.slane %v3009_v32, 1  ;;  %v3017_v32 = vcombine.low %v585_v30, %v4815_v22  ;;  %v2122_v22 = vld [vmem:[#allocation2 + $0x60] sm:$0xe] }
  0xac   :  { %2723 = vmatprep.mubr.bf16.mxu0 %v3289_v21  ;;  %3743 = vmatpush3.bf16.msra.mxu0 %v4959_v50  ;;  %v2299_v21 = vrot.slane %v2297_v55, 1  ;;  %v3213_v12 = vcombine.low %v2115_v25, %v4746_v29  ;;  %v832_v29 = vrot.slane %v3008_v2, 1 }
  0xad   :  { %1968 = vmatmul.mubr.bf16.gmra.mrb[40].mxu1 %v3166_v36  ;;  %3744 = vmatprep.subr.bf16.mxu0 %v4975_v14  ;;  %v2306_v36 = vrot.slane %v2304_v38, 1 }
  0xae   :  { %1975 = vmatprep.mubr.bf16.mxu1 %v3170_v40  ;;  %v3211_v40 = vcombine.low %v4980_v10, %v4984_v37  ;;  %v5002_v47 = vrot.slane %v3213_v12, 1  ;;  %v2300_v55 = vor.u32 %v2299_v21, %v2295_v63  ;;  %v2311_v37 = vshll.u32 %v3210_v44, 16 }
  0xaf   :  { %v2307_v38 = vor.u32 %v2306_v36, %v2302_v57  ;;  %v3011_v63 = vcombine.low %v579_v24, %v4682_v28  ;;  %v3156_v57 = vcombine.low %v832_v29, %v833_v62  ;;  %v3012_v21 = vcombine.low %v580_v16, %v4709_v34  ;;  %v587_v29 = vld [vmem:[#allocation2 + $0x88] sm:$0xe] }
  0xb0   :  { %3745 = vmatpush3.bf16.msra.mxu0 %v4975_v14  ;;  %v2318_v5 = vshll.u32 %v3211_v40, 16  ;;  %v3278_v26 = vcombine.low %v5000_v54, %v5002_v47  ;;  %v2316_v9 = vshrl.u32 %v3211_v40, 16  ;;  %v3013_v36 = vcombine.low %v581_v1, %v4716_v48  ;;  %v583_v40 = vld [vmem:[#allocation2 + $0x68] sm:$0xe]  ;;  %v584_v48 = vld [vmem:[#allocation2 + $0x70] sm:$0xe] }
  0xb1   :  { %v3295_v25 = vcombine.low %v2300_v55, %v2307_v38  ;;  %v835_v44 = vrot.slane %v3011_v63, 1  ;;  %v3294_v34 = vcombine.low %v4947_v19, %v4950_v43  ;;  %v3015_v15 = vcombine.low %v583_v40, %v4780_v61  ;;  %v2118_v55 = vld [vmem:[#allocation2 + $0x30] sm:$0xe]  ;;  %v2119_v38 = vld [vmem:[#allocation2 + $0x38] sm:$0xe] }
  0xb2   :  { %v2320_v56 = vrot.slane %v2318_v5, 1  ;;  %v837_v28 = vrot.slane %v3013_v36, 1  ;;  %v582_v5 = vld [vmem:[#allocation2 + $0x60] sm:$0xe]  ;;  %v3016_v2 = vcombine.low %v584_v48, %v4806_v59  ;;  %v841_v61 = vrot.slane %v3017_v32, 1  ;;  %v5204_v54 = vld [vmem:[#allocation5_spill] sm:$0xff] }
  0xb3   :  { %2724 = vmatmul.mubr.bf16.gmra.mrb[48].mxu0 %v3288_v42  ;;  %v2313_v42 = vrot.slane %v2311_v37, 1  ;;  %v3014_v31 = vcombine.low %v582_v5, %v4770_v8  ;;  %v839_v43 = vrot.slane %v3015_v15, 1  ;;  %v3297_v59 = vcombine.low %v4978_v4, %v4980_v10  ;;  %v2123_v62 = vld [vmem:[#allocation2 + $0x68] sm:$0xe]  ;;  %v2120_v4 = vld [vmem:[#allocation2 + $0x40] sm:$0xe] }
  0xb4   :  { %2731 = vmatprep.mubr.bf16.mxu0 %v3292_v58  ;;  %v3010_v58 = vcombine.low %v578_v0, %v4679_v53  ;;  %v2321_v27 = vor.u32 %v2320_v56, %v2316_v9  ;;  %v836_v53 = vrot.slane %v3012_v21, 1  ;;  %v840_v8 = vrot.slane %v3016_v2, 1  ;;  %v2126_v9 = vld [vmem:[#allocation2 + $0x80] sm:$0xe]  ;;  %v2127_v56 = vld [vmem:[#allocation2 + $0x88] sm:$0xe] }
  0xb5   :  { %1976 = vmatmul.mubr.bf16.gmra.mrb[44].mxu1 %v3169_v39  ;;  %v2314_v39 = vor.u32 %v2313_v42, %v2309_v52  ;;  %v838_v19 = vrot.slane %v3014_v31, 1  ;;  %v3216_v0 = vcombine.low %v2118_v55, %v4819_v46  ;;  %v3217_v24 = vcombine.low %v2119_v38, %v4826_v51  ;;  %v2125_v42 = vld [vmem:[#allocation2 + $0x78] sm:$0xe]  ;;  %v5207_v36 = vld [vmem:[#allocation8_spill] sm:$0xff]  ;;  %v5211_v31 = vld [vmem:[#allocation9_spill] sm:$0xff] }
  0xb6   :  { %3714 = vmatprep.mubr.bf16.mxu1 %v3150_v41  ;;  %v834_v37 = vrot.slane %v3010_v58, 1  ;;  %v3168_v1 = vcombine.low %v840_v8, %v841_v61  ;;  %v3220_v52 = vcombine.low %v2122_v22, %v4896_v35  ;;  %v3218_v47 = vcombine.low %v2120_v4, %v5204_v54 }
  0xb7   :  { %v3298_v12 = vcombine.low %v2314_v39, %v2321_v27  ;;  %v2374_v46 = vrot.slane %v3216_v0, 1  ;;  %v2375_v51 = vrot.slane %v3217_v24, 1  ;;  %v3223_v39 = vcombine.low %v2125_v42, %v5207_v36 }
  0xb8   :  { %v3159_v41 = vcombine.low %v834_v37, %v835_v44  ;;  %v2378_v35 = vrot.slane %v3220_v52, 1  ;;  %v3225_v37 = vcombine.low %v2127_v56, %v4954_v18  ;;  %v5208_v44 = vld [vmem:[#allocation3_spill] sm:$0xff]  ;;  %v2376_v5 = vrot.slane %v3218_v47, 1 }
  0xb9   :  { %v3284_v63 = vcombine.low %v2374_v46, %v2375_v51  ;;  %v2381_v48 = vrot.slane %v3223_v39, 1 }
  0xba   :  { %v2383_v30 = vrot.slane %v3225_v37, 1 }
  0xbb   :  { %2732 = vmatmul.mubr.bf16.gmra.mrb[52].mxu0 %v3291_v6  ;;  %v3165_v6 = vcombine.low %v838_v19, %v839_v43 }
  0xbc   :  { %2739 = vmatprep.mubr.bf16.mxu0 %v3295_v25  ;;  %v3221_v25 = vcombine.low %v2123_v62, %v4902_v60 }
  0xbd   :  { %3715 = vmatmul.mubr.bf16.vlgmr.msra.gmra.mrb[0].mxu1 %v5203_v23  ;;  %v3224_v23 = vcombine.low %v2126_v9, %v4952_v3  ;;  %v2128_v3 = vld [vmem:[#allocation2 + $0x90] sm:$0xe] }
  0xbe   :  { %3770 = vmatpush3.bf16.msra.mxu1 %v4688_v13  ;;  %3718 = vmatprep.mubr.bf16.mxu1 %v3156_v57  ;;  %v3162_v13 = vcombine.low %v836_v53, %v837_v28  ;;  %v2379_v60 = vrot.slane %v3221_v25, 1  ;;  %v5206_v57 = vld [vmem:[#allocation7_spill] sm:$0xff]  ;;  %v5209_v53 = vld [vmem:[#allocation4_spill] sm:$0xff]  ;;  %v3226_v15 = vcombine.low %v2128_v3, %v5211_v31 }
  0xbf   :  { %3763 = vmatprep.subr.bf16.mxu1 %v4850_v7  ;;  %v5210_v28 = vcombine.low %v5208_v44, %v5209_v53 }
  0xc0   :  { %v2384_v19 = vrot.slane %v3226_v15, 1 }
  0xc2   :  { %3771 = vmatpush3.bf16.msra.mxu1 %v4850_v7  ;;  %v586_v7 = vld [vmem:[#allocation2 + $0x80] sm:$0xe] }
  0xc3   :  { %3764 = vmatprep.subr.bf16.mxu1 %v4872_v33  ;;  %2740 = vmatmul.mubr.bf16.gmra.mrb[56].mxu0 %v3294_v34  ;;  %v3018_v16 = vcombine.low %v586_v7, %v4884_v20  ;;  %v2121_v20 = vld [vmem:[#allocation2 + $0x48] sm:$0xe] }
  0xc4   :  { %2747 = vmatprep.mubr.bf16.mxu0 %v3298_v12  ;;  %v2129_v12 = vld [vmem:[#allocation2 + $0x98] sm:$0xe] }
  0xc5   :  { %3719 = vmatmul.mubr.bf16.gmra.mrb[4].mxu1 %v3159_v41 }
  0xc6   :  { %3772 = vmatpush3.bf16.msra.mxu1 %v4872_v33  ;;  %3722 = vmatprep.mubr.bf16.mxu1 %v3162_v13  ;;  %v3019_v33 = vcombine.low %v587_v29, %v4886_v11  ;;  %v842_v11 = vrot.slane %v3018_v16, 1  ;;  %v5212_v13 = vld [vmem:[#allocation10_spill] sm:$0xff] }
  0xc7   :  { %3765 = vmatprep.subr.bf16.mxu1 %v4909_v45  ;;  %v3227_v2 = vcombine.low %v2129_v12, %v5212_v13 }
  0xc8   :  { %v843_v10 = vrot.slane %v3019_v33, 1 }
  0xca   :  { %3773 = vmatpush3.bf16.msra.mxu1 %v4909_v45  ;;  %v2124_v45 = vld [vmem:[#allocation2 + $0x70] sm:$0xe]  ;;  %v3171_v27 = vcombine.low %v842_v11, %v843_v10 }
  0xcb   :  { %3766 = vmatprep.subr.bf16.mxu1 %v4929_v49  ;;  %2748 = vmatmul.mubr.bf16.gmra.mrb[60].mxu0 %v3297_v59  ;;  %v3222_v21 = vcombine.low %v2124_v45, %v5206_v57 }
  0xcc   :  { %3746 = vmatprep.mubr.bf16.mxu0 %v3278_v26  ;;  %v5205_v26 = vld [vmem:[#allocation6_spill] sm:$0xff] }
  0xcd   :  { %3723 = vmatmul.mubr.bf16.gmra.mrb[8].mxu1 %v3165_v6  ;;  %v3219_v58 = vcombine.low %v2121_v20, %v5205_v26  ;;  %v2380_v34 = vrot.slane %v3222_v21, 1 }
  0xce   :  { %3774 = vmatpush3.bf16.msra.mxu1 %v4929_v49  ;;  %3726 = vmatprep.mubr.bf16.mxu1 %v3168_v1  ;;  %v3290_v49 = vcombine.low %v2378_v35, %v2379_v60 }
  0xcf   :  { %3767 = vmatprep.subr.bf16.mxu1 %v4944_v17  ;;  %v2377_v40 = vrot.slane %v3219_v58, 1  ;;  %v3293_v41 = vcombine.low %v2380_v34, %v2381_v48 }
  0xd1   :  { %v3287_v18 = vcombine.low %v2376_v5, %v2377_v40 }
  0xd2   :  { %3775 = vmatpush3.bf16.msra.mxu1 %v4944_v17  ;;  %v2382_v17 = vrot.slane %v3224_v23, 1 }
  0xd3   :  { %3768 = vmatprep.subr.bf16.mxu1 %v4959_v50  ;;  %3747 = vmatmul.mubr.bf16.vlgmr.msra.gmra.mrb[64].mxu0 %v5210_v28 }
  0xd4   :  { %3750 = vmatprep.mubr.bf16.mxu0 %v3284_v63  ;;  %v3296_v32 = vcombine.low %v2382_v17, %v2383_v30 }
  0xd5   :  { %3727 = vmatmul.mubr.bf16.gmra.mrb[12].mxu1 %v3171_v27 }
  0xd6   :  { %3776 = vmatpush3.bf16.msra.mxu1 %v4959_v50  ;;  %3754 = vmatprep.mubr.bf16.mxu1 %v3290_v49  ;;  %v2385_v50 = vrot.slane %v3227_v2, 1 }
  0xd7   :  { %3769 = vmatprep.subr.bf16.mxu1 %v4975_v14 }
  0xd8   :  { %v3299_v43 = vcombine.low %v2384_v19, %v2385_v50 }
  0xda   :  { %3777 = vmatpush3.bf16.msra.mxu1 %v4975_v14 }
  0xdb   :  { %3751 = vmatmul.mubr.bf16.gmra.mrb[68].mxu0 %v3287_v18 }
  0xdd   :  { %3755 = vmatmul.mubr.bf16.vlgmr.msra.gmra.mrb[8].mxu1 %v3293_v41 }
  0xde   :  { %3758 = vmatprep.mubr.bf16.mxu1 %v3296_v32 }
  0xe5   :  { %3759 = vmatmul.mubr.bf16.gmra.mrb[12].mxu1 %v3299_v43 }
 0x108   :  { %v3442_v55 = vpop.f32.mrb[0].mxu0 }
 0x109   :  { %v3443_v38 = vpop.f32.mrb[1].mxu0 }
 0x10a   :  { %v3444_v8 = vadd.f32 %v3443_v38, %v3442_v55  ;;  %v3445_v61 = vpop.f32.mrb[2].mxu0 }
 0x10b   :  { %v3446_v7 = vpop.f32.mrb[3].mxu0 }
 0x10c   :  { %v3447_v29 = vadd.f32 %v3446_v7, %v3445_v61 }
 0x110   :  { %v3448_v59 = vpop.f32.mrb[4].mxu0 }
 0x111   :  { %v3449_v22 = vpop.f32.mrb[5].mxu0 }
 0x112   :  { %v3450_v62 = vadd.f32 %v3449_v22, %v3448_v59  ;;  %v3451_v0 = vpop.f32.mrb[6].mxu0 }
 0x113   :  { %v3452_v24 = vpop.f32.mrb[7].mxu0 }
 0x114   :  { %v3453_v14 = vadd.f32 %v3452_v24, %v3451_v0 }
 0x127   :  { %v3454_v6 = vpop.f32.mrb[8].mxu0 }
 0x128   :  { %v3455_v16 = vpop.f32.mrb[9].mxu0 }
 0x129   :  { %v3456_v33 = vadd.f32 %v3455_v16, %v3454_v6  ;;  %v3457_v1 = vpop.f32.mrb[10].mxu0 }
 0x12a   :  { %v3458_v52 = vpop.f32.mrb[11].mxu0 }
 0x12b   :  { %v3459_v25 = vadd.f32 %v3458_v52, %v3457_v1 }
 0x13d   :  { %v3460_v46 = vpop.f32.mrb[12].mxu0 }
 0x13e   :  { %v3461_v51 = vpop.f32.mrb[13].mxu0 }
 0x13f   :  { %v5058_v4 = vadd.f32 %v3461_v51, %v3460_v46  ;;  %v3463_v20 = vpop.f32.mrb[14].mxu0 }
 0x140   :  { %v3464_v11 = vpop.f32.mrb[15].mxu0 }
 0x141   :  { %v5060_v10 = vadd.f32 %v3464_v11, %v3463_v20 }
 0x146   :  { %v3466_v45 = vpop.f32.mrb[16].mxu0 }
 0x147   :  { %v3467_v42 = vpop.f32.mrb[17].mxu0 }
 0x148   :  { %v5062_v35 = vadd.f32 %v3467_v42, %v3466_v45  ;;  %v3469_v60 = vpop.f32.mrb[18].mxu0 }
 0x149   :  { %v3470_v9 = vpop.f32.mrb[19].mxu0 }
 0x14a   :  { %v5064_v56 = vadd.f32 %v3470_v9, %v3469_v60 }
 0x14e   :  { %v3472_v54 = vpop.f32.mrb[20].mxu0 }
 0x14f   :  { %v3473_v47 = vpop.f32.mrb[21].mxu0 }
 0x150   :  { %v3522_v26 = vpop.f32.mrb[16].mxu1  ;;  %v5066_v58 = vadd.f32 %v3473_v47, %v3472_v54  ;;  %v3475_v63 = vpop.f32.mrb[22].mxu0 }
 0x151   :  { %v3523_v57 = vpop.f32.mrb[17].mxu1  ;;  %v3476_v21 = vpop.f32.mrb[23].mxu0 }
 0x152   :  { %v3524_v36 = vadd.f32 %v3523_v57, %v3522_v26  ;;  %v3525_v39 = vpop.f32.mrb[18].mxu1  ;;  %v5068_v27 = vadd.f32 %v3476_v21, %v3475_v63 }
 0x153   :  { %v3526_v49 = vpop.f32.mrb[19].mxu1 }
 0x154   :  { %v3527_v23 = vadd.f32 %v3526_v49, %v3525_v39  ;;  %v5070_v37 = vadd.f32 %v3524_v36, %v3444_v8 }
 0x156   :  { %v3478_v44 = vpop.f32.mrb[24].mxu0  ;;  %v5072_v53 = vadd.f32 %v3527_v23, %v3447_v29 }
 0x157   :  { %v3479_v28 = vpop.f32.mrb[25].mxu0 }
 0x158   :  { %v3528_v5 = vpop.f32.mrb[20].mxu1  ;;  %v5074_v40 = vadd.f32 %v3479_v28, %v3478_v44  ;;  %v3481_v34 = vpop.f32.mrb[26].mxu0 }
 0x159   :  { %v3529_v48 = vpop.f32.mrb[21].mxu1  ;;  %v3482_v17 = vpop.f32.mrb[27].mxu0 }
 0x15a   :  { %v3530_v30 = vadd.f32 %v3529_v48, %v3528_v5  ;;  %v3531_v3 = vpop.f32.mrb[22].mxu1  ;;  %v5076_v12 = vadd.f32 %v3482_v17, %v3481_v34 }
 0x15b   :  { %v3532_v18 = vpop.f32.mrb[23].mxu1 }
 0x15c   :  { %v3533_v41 = vadd.f32 %v3532_v18, %v3531_v3  ;;  %v5078_v31 = vadd.f32 %v3530_v30, %v3450_v62 }
 0x15e   :  { %v3484_v15 = vpop.f32.mrb[28].mxu0  ;;  %v5080_v13 = vadd.f32 %v3533_v41, %v3453_v14 }
 0x15f   :  { %v3485_v2 = vpop.f32.mrb[29].mxu0 }
 0x160   :  { %v3534_v32 = vpop.f32.mrb[24].mxu1  ;;  %v5082_v19 = vadd.f32 %v3485_v2, %v3484_v15  ;;  %v3487_v50 = vpop.f32.mrb[30].mxu0 }
 0x161   :  { %v3535_v43 = vpop.f32.mrb[25].mxu1  ;;  %v3488_v55 = vpop.f32.mrb[31].mxu0 }
 0x162   :  { %v3536_v38 = vadd.f32 %v3535_v43, %v3534_v32  ;;  %v3537_v8 = vpop.f32.mrb[26].mxu1  ;;  %v5084_v61 = vadd.f32 %v3488_v55, %v3487_v50 }
 0x163   :  { %v3538_v7 = vpop.f32.mrb[27].mxu1 }
 0x164   :  { %v3539_v29 = vadd.f32 %v3538_v7, %v3537_v8  ;;  %v5086_v59 = vadd.f32 %v3536_v38, %v3456_v33 }
 0x166   :  { %v3602_v22 = vpop.f32.mrb[32].mxu0  ;;  %v5088_v62 = vadd.f32 %v3539_v29, %v3459_v25 }
 0x167   :  { %v3603_v0 = vpop.f32.mrb[33].mxu0 }
 0x168   :  { %v3540_v24 = vpop.f32.mrb[28].mxu1  ;;  %v5090_v14 = vadd.f32 %v3603_v0, %v3602_v22  ;;  %v3605_v6 = vpop.f32.mrb[34].mxu0 }
 0x169   :  { %v3541_v16 = vpop.f32.mrb[29].mxu1  ;;  %v3606_v1 = vpop.f32.mrb[35].mxu0 }
 0x16a   :  { %v3542_v52 = vadd.f32 %v3541_v16, %v3540_v24  ;;  %v3543_v46 = vpop.f32.mrb[30].mxu1  ;;  %v5092_v51 = vadd.f32 %v3606_v1, %v3605_v6 }
 0x16b   :  { %v3544_v20 = vpop.f32.mrb[31].mxu1 }
 0x16c   :  { %v3545_v11 = vadd.f32 %v3544_v20, %v3543_v46  ;;  %v5095_v45 = vadd.f32 %v3542_v52, %v5058_v4 }
 0x16e   :  { %v3608_v33 = vpop.f32.mrb[36].mxu0  ;;  %v5098_v25 = vadd.f32 %v3545_v11, %v5060_v10 }
 0x16f   :  { %v3609_v42 = vpop.f32.mrb[37].mxu0 }
 0x170   :  { %v3546_v60 = vpop.f32.mrb[32].mxu1  ;;  %v5100_v9 = vadd.f32 %v3609_v42, %v3608_v33  ;;  %v3611_v54 = vpop.f32.mrb[38].mxu0 }
 0x171   :  { %v3547_v47 = vpop.f32.mrb[33].mxu1  ;;  %v3612_v26 = vpop.f32.mrb[39].mxu0 }
 0x172   :  { %v3548_v63 = vadd.f32 %v3547_v47, %v3546_v60  ;;  %v3549_v57 = vpop.f32.mrb[34].mxu1  ;;  %v5102_v21 = vadd.f32 %v3612_v26, %v3611_v54 }
 0x173   :  { %v3550_v36 = vpop.f32.mrb[35].mxu1 }
 0x174   :  { %v3813_v39 = vadd.f32 %v3548_v63, %v5062_v35  ;;  %v3551_v4 = vadd.f32 %v3550_v36, %v3549_v57 }
 0x176   :  { %v3819_v49 = vadd.f32 %v3551_v4, %v5064_v56  ;;  %v3614_v23 = vpop.f32.mrb[40].mxu0 }
 0x177   :  { %v3615_v10 = vpop.f32.mrb[41].mxu0 }
 0x178   :  { %v3552_v44 = vpop.f32.mrb[36].mxu1  ;;  %v5106_v28 = vadd.f32 %v3615_v10, %v3614_v23  ;;  %v3617_v5 = vpop.f32.mrb[42].mxu0 }
 0x179   :  { %v3553_v34 = vpop.f32.mrb[37].mxu1  ;;  %v3618_v48 = vpop.f32.mrb[43].mxu0 }
 0x17a   :  { %v3554_v17 = vadd.f32 %v3553_v34, %v3552_v44  ;;  %v3555_v30 = vpop.f32.mrb[38].mxu1  ;;  %v5108_v3 = vadd.f32 %v3618_v48, %v3617_v5 }
 0x17b   :  { %v3556_v18 = vpop.f32.mrb[39].mxu1 }
 0x17c   :  { %v3810_v41 = vadd.f32 %v3554_v17, %v5066_v58  ;;  %v3557_v15 = vadd.f32 %v3556_v18, %v3555_v30 }
 0x17e   :  { %v3816_v35 = vadd.f32 %v3557_v15, %v5068_v27  ;;  %v3620_v2 = vpop.f32.mrb[44].mxu0 }
 0x17f   :  { %v3621_v56 = vpop.f32.mrb[45].mxu0 }
 0x180   :  { %v3558_v32 = vpop.f32.mrb[40].mxu1  ;;  %v3622_v50 = vadd.f32 %v3621_v56, %v3620_v2  ;;  %v3623_v43 = vpop.f32.mrb[46].mxu0 }
 0x181   :  { %v3559_v55 = vpop.f32.mrb[41].mxu1  ;;  %v3624_v38 = vpop.f32.mrb[47].mxu0 }
 0x182   :  { %v3560_v8 = vadd.f32 %v3559_v55, %v3558_v32  ;;  %v3561_v7 = vpop.f32.mrb[42].mxu1  ;;  %v3625_v29 = vadd.f32 %v3624_v38, %v3623_v43 }
 0x183   :  { %v3562_v22 = vpop.f32.mrb[43].mxu1 }
 0x184   :  { %v3825_v0 = vadd.f32 %v3560_v8, %v5074_v40  ;;  %v3563_v24 = vadd.f32 %v3562_v22, %v3561_v7 }
 0x186   :  { %v3831_v6 = vadd.f32 %v3563_v24, %v5076_v12  ;;  %v3626_v58 = vpop.f32.mrb[48].mxu0 }
 0x187   :  { %v3627_v16 = vpop.f32.mrb[49].mxu0 }
 0x188   :  { %v3564_v1 = vpop.f32.mrb[44].mxu1  ;;  %v3628_v27 = vadd.f32 %v3627_v16, %v3626_v58  ;;  %v3629_v52 = vpop.f32.mrb[50].mxu0 }
 0x189   :  { %v3565_v46 = vpop.f32.mrb[45].mxu1  ;;  %v3630_v20 = vpop.f32.mrb[51].mxu0 }
 0x18a   :  { %v3566_v11 = vadd.f32 %v3565_v46, %v3564_v1  ;;  %v3567_v33 = vpop.f32.mrb[46].mxu1  ;;  %v3631_v42 = vadd.f32 %v3630_v20, %v3629_v52  ;;  %v5114_v60 = vadd.f32 %v3813_v39, %v3628_v27 }
 0x18b   :  { %v3568_v54 = vpop.f32.mrb[47].mxu1 }
 0x18c   :  { %v3822_v47 = vadd.f32 %v3566_v11, %v5082_v19  ;;  %v3569_v26 = vadd.f32 %v3568_v54, %v3567_v33  ;;  %v5117_v40 = vadd.f32 %v3819_v49, %v3631_v42 }
 0x18e   :  { %v3828_v12 = vadd.f32 %v3569_v26, %v5084_v61  ;;  %v3632_v63 = vpop.f32.mrb[52].mxu0 }
 0x18f   :  { %v3633_v57 = vpop.f32.mrb[53].mxu0 }
 0x190   :  { %v3716_v36 = vpop.f32.mrb[0].mxu1  ;;  %v3634_v4 = vadd.f32 %v3633_v57, %v3632_v63  ;;  %v3635_v23 = vpop.f32.mrb[54].mxu0 }
 0x191   :  { %v3779_v10 = vadd.f32 %v5078_v31, %v3716_v36  ;;  %v2018_v44 = vpop.f32.mrb[1].mxu1  ;;  %v3636_v5 = vpop.f32.mrb[55].mxu0 }
 0x192   :  { %v3783_v39 = vadd.f32 %v5070_v37, %v2018_v44  ;;  %v3717_v34 = vpop.f32.mrb[2].mxu1  ;;  %v3637_v48 = vadd.f32 %v3636_v5, %v3635_v23  ;;  %v5122_v17 = vadd.f32 %v3810_v41, %v3634_v4 }
 0x193   :  { %v3787_v19 = vadd.f32 %v5080_v13, %v3717_v34  ;;  %v2021_v49 = vpop.f32.mrb[3].mxu1  ;;  %v3780_v61 = vadd.f32 %v3779_v10, %v5100_v9 }
 0x194   :  { %v3791_v30 = vadd.f32 %v5072_v53, %v2021_v49  ;;  %v5127_v18 = vadd.f32 %v3816_v35, %v3637_v48  ;;  %v3784_v15 = vadd.f32 %v3783_v39, %v5090_v14 }
 0x195   :  { %v3788_v31 = vadd.f32 %v3787_v19, %v5102_v21 }
 0x196   :  { %v3638_v2 = vpop.f32.mrb[56].mxu0  ;;  %v3792_v37 = vadd.f32 %v3791_v30, %v5092_v51 }
 0x197   :  { %v3639_v56 = vpop.f32.mrb[57].mxu0 }
 0x198   :  { %v3720_v32 = vpop.f32.mrb[4].mxu1  ;;  %v3640_v41 = vadd.f32 %v3639_v56, %v3638_v2  ;;  %v3641_v43 = vpop.f32.mrb[58].mxu0 }
 0x199   :  { %v3795_v13 = vadd.f32 %v5095_v45, %v3720_v32  ;;  %v2034_v55 = vpop.f32.mrb[5].mxu1  ;;  %v3642_v38 = vpop.f32.mrb[59].mxu0 }
 0x19a   :  { %v3799_v9 = vadd.f32 %v5086_v59, %v2034_v55  ;;  %v3721_v53 = vpop.f32.mrb[6].mxu1  ;;  %v3643_v35 = vadd.f32 %v3642_v38, %v3641_v43  ;;  %v5134_v8 = vadd.f32 %v3825_v0, %v3640_v41 }
 0x19b   :  { %v3803_v14 = vadd.f32 %v5098_v25, %v3721_v53  ;;  %v2037_v21 = vpop.f32.mrb[7].mxu1  ;;  %v3796_v7 = vadd.f32 %v3795_v13, %v3622_v50 }
 0x19c   :  { %v3807_v51 = vadd.f32 %v5088_v62, %v2037_v21  ;;  %v3800_v22 = vadd.f32 %v3799_v9, %v5106_v28  ;;  %v5139_v24 = vadd.f32 %v3831_v6, %v3643_v35 }
 0x19d   :  { %v3804_v58 = vadd.f32 %v3803_v14, %v3625_v29 }
 0x19e   :  { %v3644_v45 = vpop.f32.mrb[60].mxu0  ;;  %v3808_v16 = vadd.f32 %v3807_v51, %v5108_v3 }
 0x19f   :  { %v3645_v1 = vpop.f32.mrb[61].mxu0 }
 0x1a0   :  { %v3646_v59 = vadd.f32 %v3645_v1, %v3644_v45  ;;  %v3647_v27 = vpop.f32.mrb[62].mxu0 }
 0x1a1   :  { %v3648_v52 = vpop.f32.mrb[63].mxu0 }
 0x1a2   :  { %v3649_v0 = vadd.f32 %v3648_v52, %v3647_v27  ;;  %v3823_v46 = vadd.f32 %v3822_v47, %v3646_v59 }
 0x1a4   :  { %v3829_v20 = vadd.f32 %v3828_v12, %v3649_v0 }
 0x1a6   :  { %v3748_v25 = vpop.f32.mrb[64].mxu0 }
 0x1a7   :  { %v3781_v11 = vadd.f32 %v3780_v61, %v3748_v25  ;;  %v2790_v50 = vpop.f32.mrb[65].mxu0 }
 0x1a8   :  { %v3785_v33 = vadd.f32 %v3784_v15, %v2790_v50  ;;  %v3749_v62 = vpop.f32.mrb[66].mxu0 }
 0x1a9   :  { %v3789_v42 = vadd.f32 %v3788_v31, %v3749_v62  ;;  %v2793_v28 = vpop.f32.mrb[67].mxu0  ;;  %v2924_v57 = vmul.f32 %v3781_v11, %v3781_v11 }
 0x1aa   :  { %v3793_v6 = vadd.f32 %v3792_v37, %v2793_v28  ;;  %v2922_v29 = vmul.f32 %v3785_v33, %v3785_v33 }
 0x1ab   :  { %v3380_v54 = vpack.c.bf16 %v3789_v42, %v3781_v11  ;;  %v2925_v44 = vmul.f32 %v3789_v42, %v3789_v42 }
 0x1ac   :  { %v3375_v26 = vpack.c.bf16 %v3793_v6, %v3785_v33  ;;  %v2901_v63 = vadd.f32 %v3793_v6, %v3785_v33  ;;  %v2923_v3 = vmul.f32 %v3793_v6, %v3793_v6 }
 0x1ad   :  { %3419 = vst [vmem:[%s5179_s3 + $0x8] sm:$0xff] %v3380_v54  }
 0x1ae   :  { %3376 = vst [vmem:[%s5179_s3] sm:$0xff] %v3375_v26   ;;  %v2902_v47 = vadd.f32 %v3781_v11, %v2901_v63  ;;  %v2938_v12 = vadd.f32 %v2923_v3, %v2922_v29  ;;  %v3752_v36 = vpop.f32.mrb[68].mxu0 }
 0x1af   :  { %v3797_v4 = vadd.f32 %v3796_v7, %v3752_v36  ;;  %v2806_v23 = vpop.f32.mrb[69].mxu0 }
 0x1b0   :  { %v3756_v10 = vpop.f32.mrb[8].mxu1  ;;  %v2939_v5 = vadd.f32 %v2938_v12, %v2924_v57  ;;  %v3801_v39 = vadd.f32 %v3800_v22, %v2806_v23  ;;  %v2903_v34 = vadd.f32 %v3789_v42, %v2902_v47  ;;  %v3753_v48 = vpop.f32.mrb[70].mxu0 }
 0x1b1   :  { %v3812_v19 = vadd.f32 %v5122_v17, %v3756_v10  ;;  %v2822_v49 = vpop.f32.mrb[9].mxu1  ;;  %v3805_v61 = vadd.f32 %v3804_v58, %v3753_v48  ;;  %v2809_v30 = vpop.f32.mrb[71].mxu0  ;;  %v2928_v7 = vmul.f32 %v3797_v4, %v3797_v4 }
 0x1b2   :  { %v3815_v15 = vadd.f32 %v5114_v60, %v2822_v49  ;;  %v3757_v31 = vpop.f32.mrb[10].mxu1  ;;  %v2904_v2 = vadd.f32 %v3801_v39, %v2903_v34  ;;  %v2926_v37 = vmul.f32 %v3801_v39, %v3801_v39  ;;  %v2940_v56 = vadd.f32 %v2939_v5, %v2925_v44 }
 0x1b3   :  { %v3818_v32 = vadd.f32 %v5127_v18, %v3757_v31  ;;  %v2825_v41 = vpop.f32.mrb[11].mxu1  ;;  %v3390_v43 = vpack.c.bf16 %v3805_v61, %v3797_v4  ;;  %v3809_v38 = vadd.f32 %v3808_v16, %v2809_v30  ;;  %v2929_v59 = vmul.f32 %v3805_v61, %v3805_v61 }
 0x1b4   :  { %v3821_v13 = vadd.f32 %v5117_v40, %v2825_v41  ;;  %v2941_v55 = vadd.f32 %v2940_v56, %v2926_v37  ;;  %v2930_v25 = vmul.f32 %v3815_v15, %v3815_v15  ;;  %v2932_v42 = vmul.f32 %v3812_v19, %v3812_v19 }
 0x1b5   :  { %v3400_v9 = vpack.c.bf16 %v3818_v32, %v3812_v19  ;;  %3421 = vst [vmem:[%s5179_s3 + $0x18] sm:$0xff] %v3390_v43   ;;  %v3385_v53 = vpack.c.bf16 %v3809_v38, %v3801_v39  ;;  %v2905_v60 = vadd.f32 %v3809_v38, %v2904_v2  ;;  %v2927_v35 = vmul.f32 %v3809_v38, %v3809_v38 }
 0x1b6   :  { %v3395_v17 = vpack.c.bf16 %v3821_v13, %v3815_v15  ;;  %v2933_v6 = vmul.f32 %v3818_v32, %v3818_v32 }
 0x1b7   :  { %3423 = vst [vmem:[%s5179_s3 + $0x28] sm:$0xff] %v3400_v9   ;;  %3420 = vst [vmem:[%s5179_s3 + $0x10] sm:$0xff] %v3385_v53   ;;  %v2906_v18 = vadd.f32 %v3797_v4, %v2905_v60  ;;  %v2942_v51 = vadd.f32 %v2941_v55, %v2927_v35 }
 0x1b8   :  { %3422 = vst [vmem:[%s5179_s3 + $0x20] sm:$0xff] %v3395_v17   ;;  %v3760_v40 = vpop.f32.mrb[12].mxu1 }
 0x1b9   :  { %v3824_v14 = vadd.f32 %v3823_v46, %v3760_v40  ;;  %v2838_v21 = vpop.f32.mrb[13].mxu1  ;;  %v2907_v45 = vadd.f32 %v3805_v61, %v2906_v18  ;;  %v2943_v27 = vadd.f32 %v2942_v51, %v2928_v7  ;;  %v2931_v46 = vmul.f32 %v3821_v13, %v3821_v13 }
 0x1ba   :  { %v3827_v22 = vadd.f32 %v5134_v8, %v2838_v21  ;;  %v3761_v58 = vpop.f32.mrb[14].mxu1 }
 0x1bb   :  { %v3830_v16 = vadd.f32 %v3829_v20, %v3761_v58  ;;  %v2841_v1 = vpop.f32.mrb[15].mxu1  ;;  %v2908_v0 = vadd.f32 %v3815_v15, %v2907_v45  ;;  %v2944_v50 = vadd.f32 %v2943_v27, %v2929_v59  ;;  %v2936_v36 = vmul.f32 %v3824_v14, %v3824_v14 }
 0x1bc   :  { %v3833_v52 = vadd.f32 %v5139_v24, %v2841_v1  ;;  %v2934_v26 = vmul.f32 %v3827_v22, %v3827_v22 }
 0x1bd   :  { %v3410_v11 = vpack.c.bf16 %v3830_v16, %v3824_v14  ;;  %v2909_v62 = vadd.f32 %v3821_v13, %v2908_v0  ;;  %v2945_v8 = vadd.f32 %v2944_v50, %v2930_v25  ;;  %v2937_v10 = vmul.f32 %v3830_v16, %v3830_v16 }
 0x1be   :  { %v3405_v33 = vpack.c.bf16 %v3833_v52, %v3827_v22  ;;  %v2935_v57 = vmul.f32 %v3833_v52, %v3833_v52 }
 0x1bf   :  { %3425 = vst [vmem:[%s5179_s3 + $0x38] sm:$0xff] %v3410_v11   ;;  %v2910_v20 = vadd.f32 %v3812_v19, %v2909_v62  ;;  %v2946_v28 = vadd.f32 %v2945_v8, %v2931_v46 }
 0x1c0   :  { %3424 = vst [vmem:[%s5179_s3 + $0x30] sm:$0xff] %v3405_v33  }
 0x1c1   :  { %v2911_v24 = vadd.f32 %v3818_v32, %v2910_v20  ;;  %v2947_v54 = vadd.f32 %v2946_v28, %v2932_v42 }
 0x1c3   :  { %v2912_v29 = vadd.f32 %v3827_v22, %v2911_v24  ;;  %v2948_v63 = vadd.f32 %v2947_v54, %v2933_v6 }
 0x1c5   :  { %v2913_v3 = vadd.f32 %v3833_v52, %v2912_v29  ;;  %v2949_v47 = vadd.f32 %v2948_v63, %v2934_v26 }
 0x1c7   :  { %v2914_v12 = vadd.f32 %v3824_v14, %v2913_v3  ;;  %v2950_v4 = vadd.f32 %v2949_v47, %v2935_v57 }
 0x1c9   :  { %v2915_v23 = vadd.f32 %v3830_v16, %v2914_v12  ;;  %v2951_v44 = vadd.f32 %v2950_v4, %v2936_v36 }
 0x1cb   :  { %v2916_v5 = vrot.slane %v2915_v23, 4  ;;  %v2952_v39 = vadd.f32 %v2951_v44, %v2937_v10 }
 0x1cd   :  { %v2917_v34 = vadd.f32 %v2916_v5, %v2915_v23  ;;  %v2953_v48 = vrot.slane %v2952_v39, 4 }
 0x1cf   :  { %v2918_v19 = vrot.slane %v2917_v34, 2  ;;  %v2954_v49 = vadd.f32 %v2953_v48, %v2952_v39 }
 0x1d1   :  { %v2919_v61 = vadd.f32 %v2918_v19, %v2917_v34  ;;  %v2955_v30 = vrot.slane %v2954_v49, 2 }
 0x1d3   :  { %v2920_v15 = vrot.slane %v2919_v61, 1  ;;  %v2956_v31 = vadd.f32 %v2955_v30, %v2954_v49 }
 0x1d5   :  { %v2957_v2 = vrot.slane %v2956_v31, 1  ;;  %v2921_v37 = vadd.f32 %v2920_v15, %v2919_v61 }
 0x1d7   :  { %v2958_v56 = vadd.f32 %v2957_v2, %v2956_v31 }
 0x1d9   :  { %v2960_v32 = vsel %vm117_vm1, %v2921_v37, %v2958_v56 }
 0x1da   :  { %2961 = vst [vmem:[%s5180_s4] sm:$0x3] %v2960_v32 }

</bundles_post_ra>
